<compile_context>
chip_gen: v7x
topology: tpu7x:2x2x1
jax: 0.10.0
libtpu: 0.0.40
codegen_flags: <defaults>
</compile_context>

<pallas_src>
import functools
import math

import jax
import jax.numpy as jnp
from jax.experimental import pallas as pl
from jax.experimental.pallas import tpu as pltpu


# Preferred tile sizes for real BERT shapes.  The demo in __main__ shrinks them so the
# tiny test shapes still exercise the multi-step K-reduction / vocab-reduction paths.
TILES = dict(tm=256, tn=512, tk=512, tv=2048)
ATTN_HEAD_GROUP = 4
# TODO(synk): for production shapes also set
# pltpu.CompilerParams(vmem_limit_bytes=...) per pallas_call (32 MiB scoped default on
# v6e/v7x, 16 MiB on v5e) and re-derive tiles against the 64 MiB physical budget on v7x.


def pick_tile(dim, preferred, align):
    """Largest tile <= preferred that divides dim and respects the (8,128) rule."""
    if dim <= preferred:
        return dim
    t = (preferred // align) * align
    while t >= align:
        if dim % t == 0:
            return t
        t -= align
    return dim  # full dim is always legal


# ----------------------------- Pallas kernels -----------------------------

def _dense_kernel(x_ref, w_ref, b_ref, o_ref, acc_ref, *, activation):
    """Tiled matmul + bias (+ activation). grid = (M/tm, N/tn, K/tk)."""
    k = pl.program_id(2)

    @pl.when(k == 0)
    def _():
        acc_ref[...] = jnp.zeros(acc_ref.shape, acc_ref.dtype)

    acc_ref[...] += jnp.dot(x_ref[...], w_ref[...],
                            preferred_element_type=jnp.float32)

    @pl.when(k == pl.num_programs(2) - 1)
    def _():
        y = acc_ref[...] + b_ref[...]
        if activation == "gelu":
            y = jax.nn.gelu(y, approximate=True)
        o_ref[...] = y.astype(o_ref.dtype)


def dense(x, w, b, activation=None, out_dtype=jnp.bfloat16):
    """x:(M,K) bf16, w:(K,N) bf16, b:(1,N) f32 -> (M,N) out_dtype."""
    M, K = x.shape
    _, N = w.shape
    tm = pick_tile(M, TILES["tm"], 8)
    tn = pick_tile(N, TILES["tn"], 128)
    tk = pick_tile(K, TILES["tk"], 128)
    kernel = functools.partial(_dense_kernel, activation=activation)
    return pl.pallas_call(
        kernel,
        out_shape=jax.ShapeDtypeStruct((M, N), out_dtype),
        grid=(M // tm, N // tn, K // tk),
        in_specs=[
            pl.BlockSpec((tm, tk), lambda i, j, k: (i, k)),
            pl.BlockSpec((tk, tn), lambda i, j, k: (k, j)),
            pl.BlockSpec((1, tn), lambda i, j, k: (0, j)),
        ],
        out_specs=pl.BlockSpec((tm, tn), lambda i, j, k: (i, j)),
        scratch_shapes=[pltpu.VMEM((tm, tn), jnp.float32)],
        compiler_params=pltpu.CompilerParams(
            dimension_semantics=("parallel", "parallel", "arbitrary")),
    )(x, w, b)


def _dense_ln_kernel(x_ref, w_ref, b_ref, *rest, eps, activation, has_residual):
    """Tiled matmul + bias (+GELU) (+residual) + LayerNorm. grid = (M/tm, K/tk)."""
    if has_residual:
        r_ref, g_ref, bt_ref, o_ref, acc_ref = rest
    else:
        r_ref = None
        g_ref, bt_ref, o_ref, acc_ref = rest
    k = pl.program_id(1)

    @pl.when(k == 0)
    def _():
        acc_ref[...] = jnp.zeros(acc_ref.shape, acc_ref.dtype)

    acc_ref[...] += jnp.dot(x_ref[...], w_ref[...],
                            preferred_element_type=jnp.float32)

    @pl.when(k == pl.num_programs(1) - 1)
    def _():
        y = acc_ref[...] + b_ref[...]
        if activation == "gelu":
            y = jax.nn.gelu(y, approximate=True)
        if has_residual:
            y = y + r_ref[...].astype(jnp.float32)
        mu = jnp.mean(y, axis=-1, keepdims=True)
        yc = y - mu
        var = jnp.mean(yc * yc, axis=-1, keepdims=True)
        o_ref[...] = (yc * jax.lax.rsqrt(var + eps) * g_ref[...]
                      + bt_ref[...]).astype(o_ref.dtype)


def dense_residual_ln(x, w, b, gamma, beta, residual=None, activation=None,
                      eps=1e-12, out_dtype=jnp.bfloat16):
    """Fused dense -> (+residual) -> LayerNorm.  Output width kept full (LN needs it)."""
    M, K = x.shape
    _, N = w.shape
    tm = pick_tile(M, TILES["tm"], 8)
    tk = pick_tile(K, TILES["tk"], 128)
    in_specs = [
        pl.BlockSpec((tm, tk), lambda i, k: (i, k)),
        pl.BlockSpec((tk, N), lambda i, k: (k, 0)),
        pl.BlockSpec((1, N), lambda i, k: (0, 0)),
    ]
    args = [x, w, b]
    if residual is not None:
        in_specs.append(pl.BlockSpec((tm, N), lambda i, k: (i, 0)))
        args.append(residual)
    in_specs += [pl.BlockSpec((1, N), lambda i, k: (0, 0)),
                 pl.BlockSpec((1, N), lambda i, k: (0, 0))]
    args += [gamma, beta]
    kernel = functools.partial(_dense_ln_kernel, eps=eps, activation=activation,
                               has_residual=residual is not None)
    return pl.pallas_call(
        kernel,
        out_shape=jax.ShapeDtypeStruct((M, N), out_dtype),
        grid=(M // tm, K // tk),
        in_specs=in_specs,
        out_specs=pl.BlockSpec((tm, N), lambda i, k: (i, 0)),
        scratch_shapes=[pltpu.VMEM((tm, N), jnp.float32)],
        compiler_params=pltpu.CompilerParams(
            dimension_semantics=("parallel", "arbitrary")),
    )(*args)


def _ffn_kernel(x_ref, wi_ref, bi_ref, wo_ref, bo_ref, g_ref, b_ref, o_ref, *, eps):
    """Whole FFN block: gelu(x@wi+bi)@wo2+bo2 + x -> LayerNorm.  Intermediate stays in VMEM."""
    x = x_ref[...]                                              # (tm, H) bf16
    inter = jnp.dot(x, wi_ref[...], preferred_element_type=jnp.float32) + bi_ref[...]
    inter = jax.nn.gelu(inter, approximate=True)
    y = jnp.dot(inter.astype(wo_ref.dtype), wo_ref[...],
                preferred_element_type=jnp.float32) + bo_ref[...]
    y = y + x.astype(jnp.float32)                               # residual = FFN input
    mu = jnp.mean(y, axis=-1, keepdims=True)
    yc = y - mu
    var = jnp.mean(yc * yc, axis=-1, keepdims=True)
    o_ref[...] = (yc * jax.lax.rsqrt(var + eps) * g_ref[...]
                  + b_ref[...]).astype(o_ref.dtype)


def ffn_residual_ln(x, wi, bi, wo2, bo2, gamma, beta, eps=1e-12,
                    out_dtype=jnp.bfloat16):
    M, H = x.shape
    I = wi.shape[1]
    tm = pick_tile(M, TILES["tm"], 8)
    kernel = functools.partial(_ffn_kernel, eps=eps)
    return pl.pallas_call(
        kernel,
        out_shape=jax.ShapeDtypeStruct((M, H), out_dtype),
        grid=(M // tm,),
        in_specs=[
            pl.BlockSpec((tm, H), lambda i: (i, 0)),
            pl.BlockSpec((H, I), lambda i: (0, 0)),
            pl.BlockSpec((1, I), lambda i: (0, 0)),
            pl.BlockSpec((I, H), lambda i: (0, 0)),
            pl.BlockSpec((1, H), lambda i: (0, 0)),
            pl.BlockSpec((1, H), lambda i: (0, 0)),
            pl.BlockSpec((1, H), lambda i: (0, 0)),
        ],
        out_specs=pl.BlockSpec((tm, H), lambda i: (i, 0)),
        compiler_params=pltpu.CompilerParams(dimension_semantics=("parallel",)),
    )(x, wi, bi, wo2, bo2, gamma, beta)


def _ln_kernel(x_ref, g_ref, b_ref, o_ref, *, eps):
    x = x_ref[...].astype(jnp.float32)
    mu = jnp.mean(x, axis=-1, keepdims=True)
    xc = x - mu
    var = jnp.mean(xc * xc, axis=-1, keepdims=True)
    o_ref[...] = (xc * jax.lax.rsqrt(var + eps) * g_ref[...]
                  + b_ref[...]).astype(o_ref.dtype)


def layernorm(x, gamma, beta, eps=1e-12, out_dtype=jnp.bfloat16):
    """Standalone row-tiled LayerNorm (embedding LN) — no zeros-residual streamed."""
    M, H = x.shape
    tm = pick_tile(M, TILES["tm"], 8)
    kernel = functools.partial(_ln_kernel, eps=eps)
    return pl.pallas_call(
        kernel,
        out_shape=jax.ShapeDtypeStruct((M, H), out_dtype),
        grid=(M // tm,),
        in_specs=[
            pl.BlockSpec((tm, H), lambda i: (i, 0)),
            pl.BlockSpec((1, H), lambda i: (0, 0)),
            pl.BlockSpec((1, H), lambda i: (0, 0)),
        ],
        out_specs=pl.BlockSpec((tm, H), lambda i: (i, 0)),
        compiler_params=pltpu.CompilerParams(dimension_semantics=("parallel",)),
    )(x, gamma, beta)


def _attn_kernel(q_ref, k_ref, v_ref, bias_ref, o_ref, *, scale):
    """Softmax attention for a group of heads of one batch element."""
    q = q_ref[0]                       # (G, L, Dh) bf16
    k = k_ref[0]
    v = v_ref[0]
    bias = bias_ref[0]                 # (1, 1, L) f32 additive key mask
    s = jnp.einsum("gqd,gkd->gqk", q, k,
                   preferred_element_type=jnp.float32) * scale + bias
    s = s - jnp.max(s, axis=-1, keepdims=True)
    p = jnp.exp(s)
    l = jnp.sum(p, axis=-1, keepdims=True)
    p = p * pl.reciprocal(l, approx=True)
    o_ref[0] = jnp.einsum("gqk,gkd->gqd", p.astype(v.dtype), v,
                          preferred_element_type=jnp.float32).astype(o_ref.dtype)


def attention(q, k, v, attn_bias, head_dim):
    """q/k/v: (N, nh, L, Dh) bf16; attn_bias: (N, 1, 1, L) f32 (shared across heads)."""
    # TODO(synk): for L >= ~1k switch to a flash-style KV-tiled kernel (online softmax,
    # m/l/acc scratch, kv axis "arbitrary") to bound VMEM on v7x.
    N, nh, L, Dh = q.shape
    G = pick_tile(nh, ATTN_HEAD_GROUP, 1)
    kernel = functools.partial(_attn_kernel, scale=1.0 / math.sqrt(head_dim))
    return pl.pallas_call(
        kernel,
        out_shape=jax.ShapeDtypeStruct((N, nh, L, Dh), q.dtype),
        grid=(N, nh // G),
        in_specs=[
            pl.BlockSpec((1, G, L, Dh), lambda b, g: (b, g, 0, 0)),
            pl.BlockSpec((1, G, L, Dh), lambda b, g: (b, g, 0, 0)),
            pl.BlockSpec((1, G, L, Dh), lambda b, g: (b, g, 0, 0)),
            pl.BlockSpec((1, 1, 1, L), lambda b, g: (b, 0, 0, 0)),
        ],
        out_specs=pl.BlockSpec((1, G, L, Dh), lambda b, g: (b, g, 0, 0)),
        compiler_params=pltpu.CompilerParams(
            dimension_semantics=("parallel", "parallel")),
    )(q, k, v, attn_bias)


def _decoder_ce_kernel(h_ref, we_ref, db_ref, lab_ref, o_ref,
                       m_ref, l_ref, gold_ref, *, tv):
    """Tied decoder matmul fused with cross-entropy via online LSE over vocab tiles.

    Logits are never written to HBM.  grid = (M/tm, V/tv), vocab axis is the reduction.
    Tied weight is pre-transposed to (H, V) so every tile is MXU-native (k, n).
    """
    j = pl.program_id(1)

    @pl.when(j == 0)
    def _():
        m_ref[...] = jnp.full(m_ref.shape, -jnp.inf, jnp.float32)
        l_ref[...] = jnp.zeros(l_ref.shape, jnp.float32)
        gold_ref[...] = jnp.zeros(gold_ref.shape, jnp.float32)

    # logits tile: (tm, H) @ (H, tv)
    s = jnp.dot(h_ref[...], we_ref[...],
                preferred_element_type=jnp.float32) + db_ref[...]
    labels = lab_ref[...]                                           # (tm, 1) i32
    col = jax.lax.broadcasted_iota(jnp.int32, s.shape, 1) + j * tv
    gold_ref[...] += jnp.sum(jnp.where(col == labels, s, 0.0), axis=-1, keepdims=True)

    m_prev = m_ref[...]
    m_new = jnp.maximum(m_prev, jnp.max(s, axis=-1, keepdims=True))
    l_ref[...] = (l_ref[...] * jnp.exp(m_prev - m_new)
                  + jnp.sum(jnp.exp(s - m_new), axis=-1, keepdims=True))
    m_ref[...] = m_new

    @pl.when(j == pl.num_programs(1) - 1)
    def _():
        # per-token CE (lse - gold); -100 labels never match -> gold = 0 (masked later)
        o_ref[...] = m_ref[...] + jnp.log(l_ref[...]) - gold_ref[...]


def decoder_ce(h, word_emb_t, decoder_b, labels):
    """h:(M,H) bf16, word_emb_t:(H,V) bf16, decoder_b:(1,V) f32, labels:(M,) i32 -> (M,1) f32."""
    M, H = h.shape
    V = word_emb_t.shape[1]
    tm = pick_tile(M, TILES["tm"], 8)
    tv = pick_tile(V, TILES["tv"], 128)
    labels2 = labels.reshape(M, 1).astype(jnp.int32)
    kernel = functools.partial(_decoder_ce_kernel, tv=tv)
    return pl.pallas_call(
        kernel,
        out_shape=jax.ShapeDtypeStruct((M, 1), jnp.float32),
        grid=(M // tm, V // tv),
        in_specs=[
            pl.BlockSpec((tm, H), lambda i, j: (i, 0)),
            pl.BlockSpec((H, tv), lambda i, j: (0, j)),
            pl.BlockSpec((1, tv), lambda i, j: (0, j)),
            pl.BlockSpec((tm, 1), lambda i, j: (i, 0)),
        ],
        out_specs=pl.BlockSpec((tm, 1), lambda i, j: (i, 0)),
        scratch_shapes=[pltpu.VMEM((tm, 1), jnp.float32),
                        pltpu.VMEM((tm, 1), jnp.float32),
                        pltpu.VMEM((tm, 1), jnp.float32)],
        compiler_params=pltpu.CompilerParams(
            dimension_semantics=("parallel", "arbitrary")),
    )(h, word_emb_t, decoder_b, labels2)


# ----------------------------- plain-JAX glue -----------------------------

def init_params(key, cfg):
    V, H, P, I = cfg["vocab"], cfg["hidden"], cfg["max_pos"], cfg["inter"]
    ks = iter(jax.random.split(key, 8 + 12 * cfg["layers"]))
    n = lambda shape: (0.02 * jax.random.normal(next(ks), shape)).astype(jnp.float32)
    params = {
        "word_emb": n((V, H)), "pos_emb": n((P, H)), "type_emb": n((2, H)),
        "emb_ln_g": jnp.ones((H,), jnp.float32), "emb_ln_b": jnp.zeros((H,), jnp.float32),
        "head_w": n((H, H)), "head_b": jnp.zeros((H,), jnp.float32),
        "head_ln_g": jnp.ones((H,), jnp.float32), "head_ln_b": jnp.zeros((H,), jnp.float32),
        "decoder_b": jnp.zeros((V,), jnp.float32),
        "layers": [],
    }
    for _ in range(cfg["layers"]):
        params["layers"].append({
            "wq": n((H, H)), "bq": jnp.zeros((H,), jnp.float32),
            "wk": n((H, H)), "bk": jnp.zeros((H,), jnp.float32),
            "wv": n((H, H)), "bv": jnp.zeros((H,), jnp.float32),
            "wo": n((H, H)), "bo": jnp.zeros((H,), jnp.float32),
            "ln1_g": jnp.ones((H,), jnp.float32), "ln1_b": jnp.zeros((H,), jnp.float32),
            "wi": n((H, I)), "bi": jnp.zeros((I,), jnp.float32),
            "wo2": n((I, H)), "bo2": jnp.zeros((H,), jnp.float32),
            "ln2_g": jnp.ones((H,), jnp.float32), "ln2_b": jnp.zeros((H,), jnp.float32),
        })
    return params


def prepare_params(raw, cfg):
    """Cast matmul weights to bf16 ONCE, concat Q/K/V, pre-transpose the tied decoder
    weight to (H, V), reshape vectors to (1, N) f32."""
    bf = lambda a: a.astype(jnp.bfloat16)
    r2 = lambda a: a.reshape(1, -1).astype(jnp.float32)
    p = {
        "word_emb": raw["word_emb"],              # f32 for the embedding gather
        "word_emb_t": bf(raw["word_emb"].T),      # tied decoder weight, MXU-native (H, V)
        "pos_emb": raw["pos_emb"], "type_emb": raw["type_emb"],
        "emb_ln_g": r2(raw["emb_ln_g"]), "emb_ln_b": r2(raw["emb_ln_b"]),
        "head_w": bf(raw["head_w"]), "head_b": r2(raw["head_b"]),
        "head_ln_g": r2(raw["head_ln_g"]), "head_ln_b": r2(raw["head_ln_b"]),
        "decoder_b": r2(raw["decoder_b"]),
        "layers": [],
    }
    for lyr in raw["layers"]:
        p["layers"].append({
            "wqkv": bf(jnp.concatenate([lyr["wq"], lyr["wk"], lyr["wv"]], axis=1)),
            "bqkv": jnp.concatenate([lyr["bq"], lyr["bk"], lyr["bv"]])
                    .reshape(1, -1).astype(jnp.float32),
            "wo": bf(lyr["wo"]), "bo": r2(lyr["bo"]),
            "ln1_g": r2(lyr["ln1_g"]), "ln1_b": r2(lyr["ln1_b"]),
            "wi": bf(lyr["wi"]), "bi": r2(lyr["bi"]),
            "wo2": bf(lyr["wo2"]), "bo2": r2(lyr["bo2"]),
            "ln2_g": r2(lyr["ln2_g"]), "ln2_b": r2(lyr["ln2_b"]),
        })
    return p


def mask_tokens(key, inputs, cfg, mlm_probability, replace_prob=0.1, original_prob=0.1,
                ignore_index=-100):
    # mirrors BertModelWithLoss._mask_tokens (torch.bernoulli -> jax.random.bernoulli)
    k1, k2, k3, k4 = jax.random.split(key, 4)
    labels = inputs
    special = jnp.zeros(inputs.shape, dtype=bool)
    for sp in (cfg["pad_id"], cfg["cls_id"], cfg["sep_id"], cfg["mask_id"]):
        special = special | (inputs == sp)
    prob = jnp.where(special, 0.0, mlm_probability)
    mlm_mask = jax.random.bernoulli(k1, prob)
    labels = jnp.where(mlm_mask, labels, ignore_index)
    keep_mask_prob = 1.0 - replace_prob - original_prob
    mask_token_mask = jax.random.bernoulli(k2, keep_mask_prob, inputs.shape) & mlm_mask
    inputs = jnp.where(mask_token_mask, cfg["mask_id"], inputs)
    rep_prob = replace_prob / (replace_prob + original_prob)
    replace_token_mask = (jax.random.bernoulli(k3, rep_prob, inputs.shape)
                          & mlm_mask & ~mask_token_mask)
    random_words = jax.random.randint(k4, inputs.shape, 0, cfg["vocab"], dtype=jnp.int32)
    inputs = jnp.where(replace_token_mask, random_words, inputs)
    return inputs, labels, mlm_mask


def get_pad_mask_and_token_type(input_ids, sentA_length, pad_id):
    attention_mask = input_ids != pad_id
    L = input_ids.shape[1]
    token_type_ids = (jnp.arange(L)[None, :] >= sentA_length[:, None]).astype(jnp.int32)
    return attention_mask, token_type_ids


def bert_forward_with_loss(params, masked_inputs, attention_mask, token_type_ids,
                           labels, mlm_mask, cfg):
    N, L = masked_inputs.shape
    H, nh = cfg["hidden"], cfg["heads"]
    dh = H // nh
    M = N * L

    # embeddings: XLA fuses the gathers + adds into one pass; the row-tiled LN kernel
    # consumes that single (M, H) f32 buffer (no zeros residual, no extra materialization)
    emb = (params["word_emb"][masked_inputs]
           + params["pos_emb"][jnp.arange(L)][None, :, :]
           + params["type_emb"][token_type_ids]).astype(jnp.float32)
    x = layernorm(emb.reshape(M, H), params["emb_ln_g"], params["emb_ln_b"])

    # additive key-padding bias, shared across heads via index_map (no repeat)
    attn_bias = ((1.0 - attention_mask.astype(jnp.float32)) * -1e9).reshape(N, 1, 1, L)

    for layer in params["layers"]:
        # fused QKV projection: one matmul against the concatenated (H, 3H) weight
        qkv = dense(x, layer["wqkv"], layer["bqkv"])            # (M, 3H) bf16
        # single XLA transpose splits Q/K/V and forms heads in one copy
        qkvh = qkv.reshape(N, L, 3, nh, dh).transpose(2, 0, 3, 1, 4)  # (3, N, nh, L, dh)
        ctx = attention(qkvh[0], qkvh[1], qkvh[2], attn_bias, dh)
        ctx = ctx.transpose(0, 2, 1, 3).reshape(M, H)
        # attention output projection + residual + LayerNorm, fused
        x = dense_residual_ln(ctx, layer["wo"], layer["bo"],
                              gamma=layer["ln1_g"], beta=layer["ln1_b"], residual=x)
        # whole FFN (wi + GELU + wo2 + residual + LayerNorm) in one kernel
        x = ffn_residual_ln(x, layer["wi"], layer["bi"], layer["wo2"], layer["bo2"],
                            gamma=layer["ln2_g"], beta=layer["ln2_b"])

    # MLM head transform: dense + GELU + LayerNorm, fused (no residual)
    # NOTE: tanh-approx GELU; HF BERT default is exact erf GELU (tiny numeric diff).
    h = dense_residual_ln(x, params["head_w"], params["head_b"],
                          gamma=params["head_ln_g"], beta=params["head_ln_b"],
                          residual=None, activation="gelu")

    # tied decoder + masked cross-entropy, fused: logits never hit HBM
    per_tok = decoder_ce(h, params["word_emb_t"], params["decoder_b"],
                         labels.reshape(M))                      # (M, 1) f32

    mask_f = mlm_mask.reshape(M).astype(jnp.float32)
    num = jnp.sum(per_tok[:, 0] * mask_f)
    den = jnp.maximum(jnp.sum(mask_f), 1.0)   # guard: no NaN if zero tokens were masked
    return num / den                          # == bert_loss[mlm_mask].mean()


if __name__ == "__main__":
    # Small tiles so the tiny demo shapes still exercise the multi-step K-reduction,
    # multi-N-tile and multi-vocab-tile paths (real shapes would keep the defaults).
    TILES.update(tm=16, tn=128, tk=128, tv=128)

    cfg = dict(vocab=512, hidden=256, heads=4, layers=2, inter=512, max_pos=32,
               pad_id=0, cls_id=1, sep_id=2, mask_id=3)
    N, L = 2, 16
    mask_prob = 0.25

    key = jax.random.PRNGKey(0)
    kp, kd, km = jax.random.split(key, 3)
    raw_params = init_params(kp, cfg)
    params = prepare_params(raw_params, cfg)

    input_ids = jax.random.randint(kd, (N, L), 4, cfg["vocab"], dtype=jnp.int32)
    input_ids = input_ids.at[:, 0].set(cfg["cls_id"])
    input_ids = input_ids.at[0, 10].set(cfg["sep_id"])
    input_ids = input_ids.at[0, 11:].set(cfg["pad_id"])
    input_ids = input_ids.at[1, 14].set(cfg["sep_id"])
    input_ids = input_ids.at[1, 15:].set(cfg["pad_id"])
    sentA_length = jnp.array([5, 7], dtype=jnp.int32)

    masked_inputs, labels, mlm_mask = mask_tokens(km, input_ids, cfg, mask_prob)
    attention_mask, token_type_ids = get_pad_mask_and_token_type(
        masked_inputs, sentA_length, cfg["pad_id"])

    loss_fn = jax.jit(lambda p, mi, am, tt, lab, mm:
                      bert_forward_with_loss(p, mi, am, tt, lab, mm, cfg))
    bert_loss = loss_fn(params, masked_inputs, attention_mask, token_type_ids,
                        labels, mlm_mask)
    metrics_for_wandb = {"mlm_ratio": mask_prob}
    # TODO(synk): probe branch (POS-tag running scores / wandb metrics) is host-side
    # bookkeeping with boolean fancy indexing; not a TPU-kernel workload, left out.

    jax.block_until_ready(bert_loss)
    print("KERNEL_OK")
</pallas_src>

<mosaic_0001>
module attributes {stable_mosaic.version = 11 : i64} {
  func.func @_ln_kernel(%arg0: i32, %arg1: memref<16x256xf32, #tpu.memory_space<vmem>>, %arg2: memref<1x256xf32, #tpu.memory_space<vmem>>, %arg3: memref<1x256xf32, #tpu.memory_space<vmem>>, %arg4: memref<16x256xbf16, #tpu.memory_space<vmem>>) attributes {dimension_semantics = [#tpu.dimension_semantics<parallel>], iteration_bounds = array<i64: 2>, scalar_prefetch = 0 : i64, scratch_operands = 0 : i64, tpu.core_type = #tpu.core_type<tc>, window_params = [{transform_indices = @transform_0, window_bounds = array<i64: 16, 256>}, {pipeline_mode = #tpu.pipeline_mode<synchronous>, transform_indices = @transform_1, window_bounds = array<i64: 1, 256>}, {pipeline_mode = #tpu.pipeline_mode<synchronous>, transform_indices = @transform_2, window_bounds = array<i64: 1, 256>}, {transform_indices = @transform_3, window_bounds = array<i64: 16, 256>}]} {
    %c0 = arith.constant 0 : index
    %c0_0 = arith.constant 0 : index
    %0 = vector.load %arg1[%c0, %c0_0] : memref<16x256xf32, #tpu.memory_space<vmem>>, vector<16x256xf32>
    %cst = arith.constant dense<0.000000e+00> : vector<16xf32>
    %1 = vector.multi_reduction <add>, %0, %cst [1] : vector<16x256xf32> to vector<16xf32>
    %2 = vector.shape_cast %1 : vector<16xf32> to vector<16x1xf32>
    %cst_1 = arith.constant 2.560000e+02 : f32
    %3 = vector.broadcast %cst_1 : f32 to vector<16x1xf32>
    %4 = arith.divf %2, %3 : vector<16x1xf32>
    %5 = vector.broadcast %4 : vector<16x1xf32> to vector<16x256xf32>
    %6 = arith.subf %0, %5 : vector<16x256xf32>
    %7 = arith.mulf %6, %6 : vector<16x256xf32>
    %cst_2 = arith.constant dense<0.000000e+00> : vector<16xf32>
    %8 = vector.multi_reduction <add>, %7, %cst_2 [1] : vector<16x256xf32> to vector<16xf32>
    %9 = vector.shape_cast %8 : vector<16xf32> to vector<16x1xf32>
    %cst_3 = arith.constant 2.560000e+02 : f32
    %10 = vector.broadcast %cst_3 : f32 to vector<16x1xf32>
    %11 = arith.divf %9, %10 : vector<16x1xf32>
    %cst_4 = arith.constant 9.99999996E-13 : f32
    %12 = vector.broadcast %cst_4 : f32 to vector<16x1xf32>
    %13 = arith.addf %11, %12 : vector<16x1xf32>
    %14 = math.rsqrt %13 : vector<16x1xf32>
    %15 = vector.broadcast %14 : vector<16x1xf32> to vector<16x256xf32>
    %16 = arith.mulf %6, %15 : vector<16x256xf32>
    %c0_5 = arith.constant 0 : index
    %c0_6 = arith.constant 0 : index
    %17 = vector.load %arg2[%c0_5, %c0_6] : memref<1x256xf32, #tpu.memory_space<vmem>>, vector<1x256xf32>
    %18 = vector.broadcast %17 : vector<1x256xf32> to vector<16x256xf32>
    %19 = arith.mulf %16, %18 : vector<16x256xf32>
    %c0_7 = arith.constant 0 : index
    %c0_8 = arith.constant 0 : index
    %20 = vector.load %arg3[%c0_7, %c0_8] : memref<1x256xf32, #tpu.memory_space<vmem>>, vector<1x256xf32>
    %21 = vector.broadcast %20 : vector<1x256xf32> to vector<16x256xf32>
    %22 = arith.addf %19, %21 : vector<16x256xf32>
    %23 = arith.truncf %22 : vector<16x256xf32> to vector<16x256xbf16>
    %c0_9 = arith.constant 0 : index
    %c0_10 = arith.constant 0 : index
    %24 = vector.load %arg4[%c0_9, %c0_10] : memref<16x256xbf16, #tpu.memory_space<vmem>>, vector<16x256xbf16>
    tpu.vector_store %arg4[%c0_9, %c0_10], %23 {strides = array<i32>} : memref<16x256xbf16, #tpu.memory_space<vmem>>, vector<16x256xbf16>,
    return
  }
  func.func @transform_0(%arg0: i32) -> (i32, i32) {
    %c0_i32 = arith.constant 0 : i32
    %c0_i32_0 = arith.constant 0 : i32
    return %arg0, %c0_i32 : i32, i32
  }
  func.func @transform_1(%arg0: i32) -> (i32, i32) {
    %c0_i32 = arith.constant 0 : i32
    %c0_i32_0 = arith.constant 0 : i32
    %c0_i32_1 = arith.constant 0 : i32
    return %c0_i32, %c0_i32_0 : i32, i32
  }
  func.func @transform_2(%arg0: i32) -> (i32, i32) {
    %c0_i32 = arith.constant 0 : i32
    %c0_i32_0 = arith.constant 0 : i32
    %c0_i32_1 = arith.constant 0 : i32
    return %c0_i32, %c0_i32_0 : i32, i32
  }
  func.func @transform_3(%arg0: i32) -> (i32, i32) {
    %c0_i32 = arith.constant 0 : i32
    %c0_i32_0 = arith.constant 0 : i32
    return %arg0, %c0_i32 : i32, i32
  }
}

module attributes {stable_mosaic.version = 11 : i64} {
  func.func @_dense_kernel(%arg0: i32, %arg1: i32, %arg2: i32, %arg3: memref<16x128xbf16, #tpu.memory_space<vmem>>, %arg4: memref<128x128xbf16, #tpu.memory_space<vmem>>, %arg5: memref<1x128xf32, #tpu.memory_space<vmem>>, %arg6: memref<16x128xbf16, #tpu.memory_space<vmem>>, %arg7: memref<16x128xf32, #tpu.memory_space<vmem>>) attributes {dimension_semantics = [#tpu.dimension_semantics<parallel>, #tpu.dimension_semantics<parallel>, #tpu.dimension_semantics<arbitrary>], iteration_bounds = array<i64: 2, 6, 2>, scalar_prefetch = 0 : i64, scratch_operands = 1 : i64, tpu.core_type = #tpu.core_type<tc>, window_params = [{transform_indices = @transform_0, window_bounds = array<i64: 16, 128>}, {transform_indices = @transform_1, window_bounds = array<i64: 128, 128>}, {transform_indices = @transform_2, window_bounds = array<i64: 1, 128>}, {transform_indices = @transform_3, window_bounds = array<i64: 16, 128>}]} {
    %c0_i32 = arith.constant 0 : i32
    %0 = arith.cmpi eq, %arg2, %c0_i32 : i32
    %1 = arith.extui %0 : i1 to i32
    %c0_i32_0 = arith.constant 0 : i32
    %2 = arith.cmpi ne, %1, %c0_i32_0 : i32
    scf.if %2 {
      %cst_9 = arith.constant 0.000000e+00 : f32
      %12 = vector.broadcast %cst_9 : f32 to vector<16x128xf32>
      %c0_10 = arith.constant 0 : index
      %c0_11 = arith.constant 0 : index
      %13 = vector.load %arg7[%c0_10, %c0_11] : memref<16x128xf32, #tpu.memory_space<vmem>>, vector<16x128xf32>
      tpu.vector_store %arg7[%c0_10, %c0_11], %12 {strides = array<i32>} : memref<16x128xf32, #tpu.memory_space<vmem>>, vector<16x128xf32>,
    } else {
    }
    %c0 = arith.constant 0 : index
    %c0_1 = arith.constant 0 : index
    %3 = vector.load %arg7[%c0, %c0_1] : memref<16x128xf32, #tpu.memory_space<vmem>>, vector<16x128xf32>
    %c0_2 = arith.constant 0 : index
    %c0_3 = arith.constant 0 : index
    %4 = vector.load %arg3[%c0_2, %c0_3] : memref<16x128xbf16, #tpu.memory_space<vmem>>, vector<16x128xbf16>
    %c0_4 = arith.constant 0 : index
    %c0_5 = arith.constant 0 : index
    %5 = vector.load %arg4[%c0_4, %c0_5] : memref<128x128xbf16, #tpu.memory_space<vmem>>, vector<128x128xbf16>
    %cst = arith.constant dense<0.000000e+00> : vector<16x128xf32>
    %6 = tpu.matmul %4, %5, %cst {dimension_numbers = #tpu.dot_dimension_numbers<[1], [0], [0], [1], [0, 0, 1, 1], [], []>} : vector<16x128xbf16>, vector<128x128xbf16>, vector<16x128xf32> -> vector<16x128xf32>
    %7 = arith.addf %3, %6 : vector<16x128xf32>
    %c0_6 = arith.constant 0 : index
    %c0_7 = arith.constant 0 : index
    %8 = vector.load %arg7[%c0_6, %c0_7] : memref<16x128xf32, #tpu.memory_space<vmem>>, vector<16x128xf32>
    tpu.vector_store %arg7[%c0_6, %c0_7], %7 {strides = array<i32>} : memref<16x128xf32, #tpu.memory_space<vmem>>, vector<16x128xf32>,
    %c1_i32 = arith.constant 1 : i32
    %9 = arith.cmpi eq, %arg2, %c1_i32 : i32
    %10 = arith.extui %9 : i1 to i32
    %c0_i32_8 = arith.constant 0 : i32
    %11 = arith.cmpi ne, %10, %c0_i32_8 : i32
    scf.if %11 {
      %c0_9 = arith.constant 0 : index
      %c0_10 = arith.constant 0 : index
      %12 = vector.load %arg7[%c0_9, %c0_10] : memref<16x128xf32, #tpu.memory_space<vmem>>, vector<16x128xf32>
      %c0_11 = arith.constant 0 : index
      %c0_12 = arith.constant 0 : index
      %13 = vector.load %arg5[%c0_11, %c0_12] : memref<1x128xf32, #tpu.memory_space<vmem>>, vector<1x128xf32>
      %14 = vector.broadcast %13 : vector<1x128xf32> to vector<16x128xf32>
      %15 = arith.addf %12, %14 : vector<16x128xf32>
      %16 = arith.truncf %15 : vector<16x128xf32> to vector<16x128xbf16>
      %c0_13 = arith.constant 0 : index
      %c0_14 = arith.constant 0 : index
      %17 = vector.load %arg6[%c0_13, %c0_14] : memref<16x128xbf16, #tpu.memory_space<vmem>>, vector<16x128xbf16>
      tpu.vector_store %arg6[%c0_13, %c0_14], %16 {strides = array<i32>} : memref<16x128xbf16, #tpu.memory_space<vmem>>, vector<16x128xbf16>,
    } else {
    }
    return
  }
  func.func @transform_0(%arg0: i32, %arg1: i32, %arg2: i32) -> (i32, i32) {
    %c0_i32 = arith.constant 0 : i32
    return %arg0, %arg2 : i32, i32
  }
  func.func @transform_1(%arg0: i32, %arg1: i32, %arg2: i32) -> (i32, i32) {
    %c0_i32 = arith.constant 0 : i32
    return %arg2, %arg1 : i32, i32
  }
  func.func @transform_2(%arg0: i32, %arg1: i32, %arg2: i32) -> (i32, i32) {
    %c0_i32 = arith.constant 0 : i32
    %c0_i32_0 = arith.constant 0 : i32
    return %c0_i32, %arg1 : i32, i32
  }
  func.func @transform_3(%arg0: i32, %arg1: i32, %arg2: i32) -> (i32, i32) {
    %c0_i32 = arith.constant 0 : i32
    return %arg0, %arg1 : i32, i32
  }
}

module attributes {stable_mosaic.version = 11 : i64} {
  func.func @_attn_kernel(%arg0: i32, %arg1: i32, %arg2: memref<1x4x16x64xbf16, #tpu.memory_space<vmem>>, %arg3: memref<1x4x16x64xbf16, #tpu.memory_space<vmem>>, %arg4: memref<1x4x16x64xbf16, #tpu.memory_space<vmem>>, %arg5: memref<1x1x1x16xf32, #tpu.memory_space<vmem>>, %arg6: memref<1x4x16x64xbf16, #tpu.memory_space<vmem>>) attributes {dimension_semantics = [#tpu.dimension_semantics<parallel>, #tpu.dimension_semantics<parallel>], iteration_bounds = array<i64: 2, 1>, scalar_prefetch = 0 : i64, scratch_operands = 0 : i64, tpu.core_type = #tpu.core_type<tc>, window_params = [{transform_indices = @transform_0, window_bounds = array<i64: 1, 4, 16, 64>}, {transform_indices = @transform_1, window_bounds = array<i64: 1, 4, 16, 64>}, {transform_indices = @transform_2, window_bounds = array<i64: 1, 4, 16, 64>}, {transform_indices = @transform_3, window_bounds = array<i64: 1, 1, 1, 16>}, {transform_indices = @transform_4, window_bounds = array<i64: 1, 4, 16, 64>}]} {
    %c0 = arith.constant 0 : index
    %c0_0 = arith.constant 0 : index
    %c0_1 = arith.constant 0 : index
    %c0_2 = arith.constant 0 : index
    %0 = vector.load %arg2[%c0, %c0_0, %c0_1, %c0_2] : memref<1x4x16x64xbf16, #tpu.memory_space<vmem>>, vector<1x4x16x64xbf16>
    %1 = vector.shape_cast %0 : vector<1x4x16x64xbf16> to vector<4x16x64xbf16>
    %c0_3 = arith.constant 0 : index
    %c0_4 = arith.constant 0 : index
    %c0_5 = arith.constant 0 : index
    %c0_6 = arith.constant 0 : index
    %2 = vector.load %arg3[%c0_3, %c0_4, %c0_5, %c0_6] : memref<1x4x16x64xbf16, #tpu.memory_space<vmem>>, vector<1x4x16x64xbf16>
    %3 = vector.shape_cast %2 : vector<1x4x16x64xbf16> to vector<4x16x64xbf16>
    %c0_7 = arith.constant 0 : index
    %c0_8 = arith.constant 0 : index
    %c0_9 = arith.constant 0 : index
    %c0_10 = arith.constant 0 : index
    %4 = vector.load %arg4[%c0_7, %c0_8, %c0_9, %c0_10] : memref<1x4x16x64xbf16, #tpu.memory_space<vmem>>, vector<1x4x16x64xbf16>
    %5 = vector.shape_cast %4 : vector<1x4x16x64xbf16> to vector<4x16x64xbf16>
    %c0_11 = arith.constant 0 : index
    %c0_12 = arith.constant 0 : index
    %c0_13 = arith.constant 0 : index
    %c0_14 = arith.constant 0 : index
    %6 = vector.load %arg5[%c0_11, %c0_12, %c0_13, %c0_14] : memref<1x1x1x16xf32, #tpu.memory_space<vmem>>, vector<1x1x1x16xf32>
    %7 = vector.shape_cast %6 : vector<1x1x1x16xf32> to vector<1x1x16xf32>
    "tpu.trace_start"() <{level = 10 : i32, message = "gqd,gkd->gqk"}> : () -> ()
    %cst = arith.constant dense<0.000000e+00> : vector<4x16x16xf32>
    %8 = tpu.matmul %1, %3, %cst {dimension_numbers = #tpu.dot_dimension_numbers<[2], [2], [1], [1], [0, 0, 0, 1, 1, 1], [0], [0]>} : vector<4x16x64xbf16>, vector<4x16x64xbf16>, vector<4x16x16xf32> -> vector<4x16x16xf32>
    "tpu.trace_stop"() : () -> ()
    %cst_15 = arith.constant 1.250000e-01 : f32
    %9 = vector.broadcast %cst_15 : f32 to vector<4x16x16xf32>
    %10 = arith.mulf %8, %9 : vector<4x16x16xf32>
    %11 = vector.broadcast %7 : vector<1x1x16xf32> to vector<4x16x16xf32>
    %12 = arith.addf %10, %11 : vector<4x16x16xf32>
    %cst_16 = arith.constant dense<0xFF800000> : vector<4x16xf32>
    %13 = vector.multi_reduction <maximumf>, %12, %cst_16 [2] : vector<4x16x16xf32> to vector<4x16xf32>
    %14 = vector.shape_cast %13 : vector<4x16xf32> to vector<4x16x1xf32>
    %15 = vector.broadcast %14 : vector<4x16x1xf32> to vector<4x16x16xf32>
    %16 = arith.subf %12, %15 : vector<4x16x16xf32>
    %17 = math.exp %16 : vector<4x16x16xf32>
    %cst_17 = arith.constant dense<0.000000e+00> : vector<4x16xf32>
    %18 = vector.multi_reduction <add>, %17, %cst_17 [2] : vector<4x16x16xf32> to vector<4x16xf32>
    %19 = vector.shape_cast %18 : vector<4x16xf32> to vector<4x16x1xf32>
    %20 = tpu.reciprocal %19 {approx = true} : vector<4x16x1xf32> -> vector<4x16x1xf32>
    %21 = vector.broadcast %20 : vector<4x16x1xf32> to vector<4x16x16xf32>
    %22 = arith.mulf %17, %21 : vector<4x16x16xf32>
    %23 = arith.truncf %22 : vector<4x16x16xf32> to vector<4x16x16xbf16>
    "tpu.trace_start"() <{level = 10 : i32, message = "gqk,gkd->gqd"}> : () -> ()
    %cst_18 = arith.constant dense<0.000000e+00> : vector<4x16x64xf32>
    %24 = tpu.matmul %23, %5, %cst_18 {dimension_numbers = #tpu.dot_dimension_numbers<[2], [1], [1], [2], [0, 0, 0, 1, 1, 2], [0], [0]>} : vector<4x16x16xbf16>, vector<4x16x64xbf16>, vector<4x16x64xf32> -> vector<4x16x64xf32>
    "tpu.trace_stop"() : () -> ()
    %25 = arith.truncf %24 : vector<4x16x64xf32> to vector<4x16x64xbf16>
    %c0_19 = arith.constant 0 : index
    %c0_20 = arith.constant 0 : index
    %c0_21 = arith.constant 0 : index
    %c0_22 = arith.constant 0 : index
    %26 = vector.load %arg6[%c0_19, %c0_20, %c0_21, %c0_22] : memref<1x4x16x64xbf16, #tpu.memory_space<vmem>>, vector<1x4x16x64xbf16>
    %27 = vector.shape_cast %26 : vector<1x4x16x64xbf16> to vector<4x16x64xbf16>
    %28 = vector.shape_cast %25 : vector<4x16x64xbf16> to vector<1x4x16x64xbf16>
    tpu.vector_store %arg6[%c0_19, %c0_20, %c0_21, %c0_22], %28 {strides = array<i32>} : memref<1x4x16x64xbf16, #tpu.memory_space<vmem>>, vector<1x4x16x64xbf16>,
    return
  }
  func.func @transform_0(%arg0: i32, %arg1: i32) -> (i32, i32, i32, i32) {
    %c0_i32 = arith.constant 0 : i32
    %c0_i32_0 = arith.constant 0 : i32
    %c0_i32_1 = arith.constant 0 : i32
    return %arg0, %arg1, %c0_i32, %c0_i32_0 : i32, i32, i32, i32
  }
  func.func @transform_1(%arg0: i32, %arg1: i32) -> (i32, i32, i32, i32) {
    %c0_i32 = arith.constant 0 : i32
    %c0_i32_0 = arith.constant 0 : i32
    %c0_i32_1 = arith.constant 0 : i32
    return %arg0, %arg1, %c0_i32, %c0_i32_0 : i32, i32, i32, i32
  }
  func.func @transform_2(%arg0: i32, %arg1: i32) -> (i32, i32, i32, i32) {
    %c0_i32 = arith.constant 0 : i32
    %c0_i32_0 = arith.constant 0 : i32
    %c0_i32_1 = arith.constant 0 : i32
    return %arg0, %arg1, %c0_i32, %c0_i32_0 : i32, i32, i32, i32
  }
  func.func @transform_3(%arg0: i32, %arg1: i32) -> (i32, i32, i32, i32) {
    %c0_i32 = arith.constant 0 : i32
    %c0_i32_0 = arith.constant 0 : i32
    %c0_i32_1 = arith.constant 0 : i32
    %c0_i32_2 = arith.constant 0 : i32
    return %arg0, %c0_i32, %c0_i32_0, %c0_i32_1 : i32, i32, i32, i32
  }
  func.func @transform_4(%arg0: i32, %arg1: i32) -> (i32, i32, i32, i32) {
    %c0_i32 = arith.constant 0 : i32
    %c0_i32_0 = arith.constant 0 : i32
    %c0_i32_1 = arith.constant 0 : i32
    return %arg0, %arg1, %c0_i32, %c0_i32_0 : i32, i32, i32, i32
  }
}

module attributes {stable_mosaic.version = 11 : i64} {
  func.func @_dense_ln_kernel(%arg0: i32, %arg1: i32, %arg2: memref<16x128xbf16, #tpu.memory_space<vmem>>, %arg3: memref<128x256xbf16, #tpu.memory_space<vmem>>, %arg4: memref<1x256xf32, #tpu.memory_space<vmem>>, %arg5: memref<16x256xbf16, #tpu.memory_space<vmem>>, %arg6: memref<1x256xf32, #tpu.memory_space<vmem>>, %arg7: memref<1x256xf32, #tpu.memory_space<vmem>>, %arg8: memref<16x256xbf16, #tpu.memory_space<vmem>>, %arg9: memref<16x256xf32, #tpu.memory_space<vmem>>) attributes {dimension_semantics = [#tpu.dimension_semantics<parallel>, #tpu.dimension_semantics<arbitrary>], iteration_bounds = array<i64: 2, 2>, scalar_prefetch = 0 : i64, scratch_operands = 1 : i64, tpu.core_type = #tpu.core_type<tc>, window_params = [{transform_indices = @transform_0, window_bounds = array<i64: 16, 128>}, {transform_indices = @transform_1, window_bounds = array<i64: 128, 256>}, {pipeline_mode = #tpu.pipeline_mode<synchronous>, transform_indices = @transform_2, window_bounds = array<i64: 1, 256>}, {transform_indices = @transform_3, window_bounds = array<i64: 16, 256>}, {pipeline_mode = #tpu.pipeline_mode<synchronous>, transform_indices = @transform_4, window_bounds = array<i64: 1, 256>}, {pipeline_mode = #tpu.pipeline_mode<synchronous>, transform_indices = @transform_5, window_bounds = array<i64: 1, 256>}, {transform_indices = @transform_6, window_bounds = array<i64: 16, 256>}]} {
    %c0_i32 = arith.constant 0 : i32
    %0 = arith.cmpi eq, %arg1, %c0_i32 : i32
    %1 = arith.extui %0 : i1 to i32
    %c0_i32_0 = arith.constant 0 : i32
    %2 = arith.cmpi ne, %1, %c0_i32_0 : i32
    scf.if %2 {
      %cst_9 = arith.constant 0.000000e+00 : f32
      %12 = vector.broadcast %cst_9 : f32 to vector<16x256xf32>
      %c0_10 = arith.constant 0 : index
      %c0_11 = arith.constant 0 : index
      %13 = vector.load %arg9[%c0_10, %c0_11] : memref<16x256xf32, #tpu.memory_space<vmem>>, vector<16x256xf32>
      tpu.vector_store %arg9[%c0_10, %c0_11], %12 {strides = array<i32>} : memref<16x256xf32, #tpu.memory_space<vmem>>, vector<16x256xf32>,
    } else {
    }
    %c0 = arith.constant 0 : index
    %c0_1 = arith.constant 0 : index
    %3 = vector.load %arg9[%c0, %c0_1] : memref<16x256xf32, #tpu.memory_space<vmem>>, vector<16x256xf32>
    %c0_2 = arith.constant 0 : index
    %c0_3 = arith.constant 0 : index
    %4 = vector.load %arg2[%c0_2, %c0_3] : memref<16x128xbf16, #tpu.memory_space<vmem>>, vector<16x128xbf16>
    %c0_4 = arith.constant 0 : index
    %c0_5 = arith.constant 0 : index
    %5 = vector.load %arg3[%c0_4, %c0_5] : memref<128x256xbf16, #tpu.memory_space<vmem>>, vector<128x256xbf16>
    %cst = arith.constant dense<0.000000e+00> : vector<16x256xf32>
    %6 = tpu.matmul %4, %5, %cst {dimension_numbers = #tpu.dot_dimension_numbers<[1], [0], [0], [1], [0, 0, 1, 1], [], []>} : vector<16x128xbf16>, vector<128x256xbf16>, vector<16x256xf32> -> vector<16x256xf32>
    %7 = arith.addf %3, %6 : vector<16x256xf32>
    %c0_6 = arith.constant 0 : index
    %c0_7 = arith.constant 0 : index
    %8 = vector.load %arg9[%c0_6, %c0_7] : memref<16x256xf32, #tpu.memory_space<vmem>>, vector<16x256xf32>
    tpu.vector_store %arg9[%c0_6, %c0_7], %7 {strides = array<i32>} : memref<16x256xf32, #tpu.memory_space<vmem>>, vector<16x256xf32>,
    %c1_i32 = arith.constant 1 : i32
    %9 = arith.cmpi eq, %arg1, %c1_i32 : i32
    %10 = arith.extui %9 : i1 to i32
    %c0_i32_8 = arith.constant 0 : i32
    %11 = arith.cmpi ne, %10, %c0_i32_8 : i32
    scf.if %11 {
      %c0_9 = arith.constant 0 : index
      %c0_10 = arith.constant 0 : index
      %12 = vector.load %arg9[%c0_9, %c0_10] : memref<16x256xf32, #tpu.memory_space<vmem>>, vector<16x256xf32>
      %c0_11 = arith.constant 0 : index
      %c0_12 = arith.constant 0 : index
      %13 = vector.load %arg4[%c0_11, %c0_12] : memref<1x256xf32, #tpu.memory_space<vmem>>, vector<1x256xf32>
      %14 = vector.broadcast %13 : vector<1x256xf32> to vector<16x256xf32>
      %15 = arith.addf %12, %14 : vector<16x256xf32>
      %c0_13 = arith.constant 0 : index
      %c0_14 = arith.constant 0 : index
      %16 = vector.load %arg5[%c0_13, %c0_14] : memref<16x256xbf16, #tpu.memory_space<vmem>>, vector<16x256xbf16>
      %17 = arith.extf %16 : vector<16x256xbf16> to vector<16x256xf32>
      %18 = arith.addf %15, %17 : vector<16x256xf32>
      %cst_15 = arith.constant dense<0.000000e+00> : vector<16xf32>
      %19 = vector.multi_reduction <add>, %18, %cst_15 [1] : vector<16x256xf32> to vector<16xf32>
      %20 = vector.shape_cast %19 : vector<16xf32> to vector<16x1xf32>
      %cst_16 = arith.constant 2.560000e+02 : f32
      %21 = vector.broadcast %cst_16 : f32 to vector<16x1xf32>
      %22 = arith.divf %20, %21 : vector<16x1xf32>
      %23 = vector.broadcast %22 : vector<16x1xf32> to vector<16x256xf32>
      %24 = arith.subf %18, %23 : vector<16x256xf32>
      %25 = arith.mulf %24, %24 : vector<16x256xf32>
      %cst_17 = arith.constant dense<0.000000e+00> : vector<16xf32>
      %26 = vector.multi_reduction <add>, %25, %cst_17 [1] : vector<16x256xf32> to vector<16xf32>
      %27 = vector.shape_cast %26 : vector<16xf32> to vector<16x1xf32>
      %cst_18 = arith.constant 2.560000e+02 : f32
      %28 = vector.broadcast %cst_18 : f32 to vector<16x1xf32>
      %29 = arith.divf %27, %28 : vector<16x1xf32>
      %cst_19 = arith.constant 9.99999996E-13 : f32
      %30 = vector.broadcast %cst_19 : f32 to vector<16x1xf32>
      %31 = arith.addf %29, %30 : vector<16x1xf32>
      %32 = math.rsqrt %31 : vector<16x1xf32>
      %33 = vector.broadcast %32 : vector<16x1xf32> to vector<16x256xf32>
      %34 = arith.mulf %24, %33 : vector<16x256xf32>
      %c0_20 = arith.constant 0 : index
      %c0_21 = arith.constant 0 : index
      %35 = vector.load %arg6[%c0_20, %c0_21] : memref<1x256xf32, #tpu.memory_space<vmem>>, vector<1x256xf32>
      %36 = vector.broadcast %35 : vector<1x256xf32> to vector<16x256xf32>
      %37 = arith.mulf %34, %36 : vector<16x256xf32>
      %c0_22 = arith.constant 0 : index
      %c0_23 = arith.constant 0 : index
      %38 = vector.load %arg7[%c0_22, %c0_23] : memref<1x256xf32, #tpu.memory_space<vmem>>, vector<1x256xf32>
      %39 = vector.broadcast %38 : vector<1x256xf32> to vector<16x256xf32>
      %40 = arith.addf %37, %39 : vector<16x256xf32>
      %41 = arith.truncf %40 : vector<16x256xf32> to vector<16x256xbf16>
      %c0_24 = arith.constant 0 : index
      %c0_25 = arith.constant 0 : index
      %42 = vector.load %arg8[%c0_24, %c0_25] : memref<16x256xbf16, #tpu.memory_space<vmem>>, vector<16x256xbf16>
      tpu.vector_store %arg8[%c0_24, %c0_25], %41 {strides = array<i32>} : memref<16x256xbf16, #tpu.memory_space<vmem>>, vector<16x256xbf16>,
    } else {
    }
    return
  }
  func.func @transform_0(%arg0: i32, %arg1: i32) -> (i32, i32) {
    %c0_i32 = arith.constant 0 : i32
    return %arg0, %arg1 : i32, i32
  }
  func.func @transform_1(%arg0: i32, %arg1: i32) -> (i32, i32) {
    %c0_i32 = arith.constant 0 : i32
    %c0_i32_0 = arith.constant 0 : i32
    return %arg1, %c0_i32 : i32, i32
  }
  func.func @transform_2(%arg0: i32, %arg1: i32) -> (i32, i32) {
    %c0_i32 = arith.constant 0 : i32
    %c0_i32_0 = arith.constant 0 : i32
    %c0_i32_1 = arith.constant 0 : i32
    return %c0_i32, %c0_i32_0 : i32, i32
  }
  func.func @transform_3(%arg0: i32, %arg1: i32) -> (i32, i32) {
    %c0_i32 = arith.constant 0 : i32
    %c0_i32_0 = arith.constant 0 : i32
    return %arg0, %c0_i32 : i32, i32
  }
  func.func @transform_4(%arg0: i32, %arg1: i32) -> (i32, i32) {
    %c0_i32 = arith.constant 0 : i32
    %c0_i32_0 = arith.constant 0 : i32
    %c0_i32_1 = arith.constant 0 : i32
    return %c0_i32, %c0_i32_0 : i32, i32
  }
  func.func @transform_5(%arg0: i32, %arg1: i32) -> (i32, i32) {
    %c0_i32 = arith.constant 0 : i32
    %c0_i32_0 = arith.constant 0 : i32
    %c0_i32_1 = arith.constant 0 : i32
    return %c0_i32, %c0_i32_0 : i32, i32
  }
  func.func @transform_6(%arg0: i32, %arg1: i32) -> (i32, i32) {
    %c0_i32 = arith.constant 0 : i32
    %c0_i32_0 = arith.constant 0 : i32
    return %arg0, %c0_i32 : i32, i32
  }
}

module attributes {stable_mosaic.version = 11 : i64} {
  func.func @_ffn_kernel(%arg0: i32, %arg1: memref<16x256xbf16, #tpu.memory_space<vmem>>, %arg2: memref<256x512xbf16, #tpu.memory_space<vmem>>, %arg3: memref<1x512xf32, #tpu.memory_space<vmem>>, %arg4: memref<512x256xbf16, #tpu.memory_space<vmem>>, %arg5: memref<1x256xf32, #tpu.memory_space<vmem>>, %arg6: memref<1x256xf32, #tpu.memory_space<vmem>>, %arg7: memref<1x256xf32, #tpu.memory_space<vmem>>, %arg8: memref<16x256xbf16, #tpu.memory_space<vmem>>) attributes {dimension_semantics = [#tpu.dimension_semantics<parallel>], iteration_bounds = array<i64: 2>, scalar_prefetch = 0 : i64, scratch_operands = 0 : i64, tpu.core_type = #tpu.core_type<tc>, window_params = [{transform_indices = @transform_0, window_bounds = array<i64: 16, 256>}, {pipeline_mode = #tpu.pipeline_mode<synchronous>, transform_indices = @transform_1, window_bounds = array<i64: 256, 512>}, {pipeline_mode = #tpu.pipeline_mode<synchronous>, transform_indices = @transform_2, window_bounds = array<i64: 1, 512>}, {pipeline_mode = #tpu.pipeline_mode<synchronous>, transform_indices = @transform_3, window_bounds = array<i64: 512, 256>}, {pipeline_mode = #tpu.pipeline_mode<synchronous>, transform_indices = @transform_4, window_bounds = array<i64: 1, 256>}, {pipeline_mode = #tpu.pipeline_mode<synchronous>, transform_indices = @transform_5, window_bounds = array<i64: 1, 256>}, {pipeline_mode = #tpu.pipeline_mode<synchronous>, transform_indices = @transform_6, window_bounds = array<i64: 1, 256>}, {transform_indices = @transform_7, window_bounds = array<i64: 16, 256>}]} {
    %c0 = arith.constant 0 : index
    %c0_0 = arith.constant 0 : index
    %0 = vector.load %arg1[%c0, %c0_0] : memref<16x256xbf16, #tpu.memory_space<vmem>>, vector<16x256xbf16>
    %c0_1 = arith.constant 0 : index
    %c0_2 = arith.constant 0 : index
    %1 = vector.load %arg2[%c0_1, %c0_2] : memref<256x512xbf16, #tpu.memory_space<vmem>>, vector<256x512xbf16>
    %cst = arith.constant dense<0.000000e+00> : vector<16x512xf32>
    %2 = tpu.matmul %0, %1, %cst {dimension_numbers = #tpu.dot_dimension_numbers<[1], [0], [0], [1], [0, 0, 1, 1], [], []>} : vector<16x256xbf16>, vector<256x512xbf16>, vector<16x512xf32> -> vector<16x512xf32>
    %c0_3 = arith.constant 0 : index
    %c0_4 = arith.constant 0 : index
    %3 = vector.load %arg3[%c0_3, %c0_4] : memref<1x512xf32, #tpu.memory_space<vmem>>, vector<1x512xf32>
    %4 = vector.broadcast %3 : vector<1x512xf32> to vector<16x512xf32>
    %5 = arith.addf %2, %4 : vector<16x512xf32>
    %6 = arith.mulf %5, %5 : vector<16x512xf32>
    %7 = arith.mulf %5, %6 : vector<16x512xf32>
    %cst_5 = arith.constant 4.471500e-02 : f32
    %8 = vector.broadcast %cst_5 : f32 to vector<16x512xf32>
    %9 = arith.mulf %8, %7 : vector<16x512xf32>
    %10 = arith.addf %5, %9 : vector<16x512xf32>
    %cst_6 = arith.constant 0.797884583 : f32
    %11 = vector.broadcast %cst_6 : f32 to vector<16x512xf32>
    %12 = arith.mulf %11, %10 : vector<16x512xf32>
    %13 = math.tanh %12 : vector<16x512xf32>
    %cst_7 = arith.constant 1.000000e+00 : f32
    %14 = vector.broadcast %cst_7 : f32 to vector<16x512xf32>
    %15 = arith.addf %14, %13 : vector<16x512xf32>
    %cst_8 = arith.constant 5.000000e-01 : f32
    %16 = vector.broadcast %cst_8 : f32 to vector<16x512xf32>
    %17 = arith.mulf %16, %15 : vector<16x512xf32>
    %18 = arith.mulf %5, %17 : vector<16x512xf32>
    %19 = arith.truncf %18 : vector<16x512xf32> to vector<16x512xbf16>
    %c0_9 = arith.constant 0 : index
    %c0_10 = arith.constant 0 : index
    %20 = vector.load %arg4[%c0_9, %c0_10] : memref<512x256xbf16, #tpu.memory_space<vmem>>, vector<512x256xbf16>
    %cst_11 = arith.constant dense<0.000000e+00> : vector<16x256xf32>
    %21 = tpu.matmul %19, %20, %cst_11 {dimension_numbers = #tpu.dot_dimension_numbers<[1], [0], [0], [1], [0, 0, 1, 1], [], []>} : vector<16x512xbf16>, vector<512x256xbf16>, vector<16x256xf32> -> vector<16x256xf32>
    %c0_12 = arith.constant 0 : index
    %c0_13 = arith.constant 0 : index
    %22 = vector.load %arg5[%c0_12, %c0_13] : memref<1x256xf32, #tpu.memory_space<vmem>>, vector<1x256xf32>
    %23 = vector.broadcast %22 : vector<1x256xf32> to vector<16x256xf32>
    %24 = arith.addf %21, %23 : vector<16x256xf32>
    %25 = arith.extf %0 : vector<16x256xbf16> to vector<16x256xf32>
    %26 = arith.addf %24, %25 : vector<16x256xf32>
    %cst_14 = arith.constant dense<0.000000e+00> : vector<16xf32>
    %27 = vector.multi_reduction <add>, %26, %cst_14 [1] : vector<16x256xf32> to vector<16xf32>
    %28 = vector.shape_cast %27 : vector<16xf32> to vector<16x1xf32>
    %cst_15 = arith.constant 2.560000e+02 : f32
    %29 = vector.broadcast %cst_15 : f32 to vector<16x1xf32>
    %30 = arith.divf %28, %29 : vector<16x1xf32>
    %31 = vector.broadcast %30 : vector<16x1xf32> to vector<16x256xf32>
    %32 = arith.subf %26, %31 : vector<16x256xf32>
    %33 = arith.mulf %32, %32 : vector<16x256xf32>
    %cst_16 = arith.constant dense<0.000000e+00> : vector<16xf32>
    %34 = vector.multi_reduction <add>, %33, %cst_16 [1] : vector<16x256xf32> to vector<16xf32>
    %35 = vector.shape_cast %34 : vector<16xf32> to vector<16x1xf32>
    %cst_17 = arith.constant 2.560000e+02 : f32
    %36 = vector.broadcast %cst_17 : f32 to vector<16x1xf32>
    %37 = arith.divf %35, %36 : vector<16x1xf32>
    %cst_18 = arith.constant 9.99999996E-13 : f32
    %38 = vector.broadcast %cst_18 : f32 to vector<16x1xf32>
    %39 = arith.addf %37, %38 : vector<16x1xf32>
    %40 = math.rsqrt %39 : vector<16x1xf32>
    %41 = vector.broadcast %40 : vector<16x1xf32> to vector<16x256xf32>
    %42 = arith.mulf %32, %41 : vector<16x256xf32>
    %c0_19 = arith.constant 0 : index
    %c0_20 = arith.constant 0 : index
    %43 = vector.load %arg6[%c0_19, %c0_20] : memref<1x256xf32, #tpu.memory_space<vmem>>, vector<1x256xf32>
    %44 = vector.broadcast %43 : vector<1x256xf32> to vector<16x256xf32>
    %45 = arith.mulf %42, %44 : vector<16x256xf32>
    %c0_21 = arith.constant 0 : index
    %c0_22 = arith.constant 0 : index
    %46 = vector.load %arg7[%c0_21, %c0_22] : memref<1x256xf32, #tpu.memory_space<vmem>>, vector<1x256xf32>
    %47 = vector.broadcast %46 : vector<1x256xf32> to vector<16x256xf32>
    %48 = arith.addf %45, %47 : vector<16x256xf32>
    %49 = arith.truncf %48 : vector<16x256xf32> to vector<16x256xbf16>
    %c0_23 = arith.constant 0 : index
    %c0_24 = arith.constant 0 : index
    %50 = vector.load %arg8[%c0_23, %c0_24] : memref<16x256xbf16, #tpu.memory_space<vmem>>, vector<16x256xbf16>
    tpu.vector_store %arg8[%c0_23, %c0_24], %49 {strides = array<i32>} : memref<16x256xbf16, #tpu.memory_space<vmem>>, vector<16x256xbf16>,
    return
  }
  func.func @transform_0(%arg0: i32) -> (i32, i32) {
    %c0_i32 = arith.constant 0 : i32
    %c0_i32_0 = arith.constant 0 : i32
    return %arg0, %c0_i32 : i32, i32
  }
  func.func @transform_1(%arg0: i32) -> (i32, i32) {
    %c0_i32 = arith.constant 0 : i32
    %c0_i32_0 = arith.constant 0 : i32
    %c0_i32_1 = arith.constant 0 : i32
    return %c0_i32, %c0_i32_0 : i32, i32
  }
  func.func @transform_2(%arg0: i32) -> (i32, i32) {
    %c0_i32 = arith.constant 0 : i32
    %c0_i32_0 = arith.constant 0 : i32
    %c0_i32_1 = arith.constant 0 : i32
    return %c0_i32, %c0_i32_0 : i32, i32
  }
  func.func @transform_3(%arg0: i32) -> (i32, i32) {
    %c0_i32 = arith.constant 0 : i32
    %c0_i32_0 = arith.constant 0 : i32
    %c0_i32_1 = arith.constant 0 : i32
    return %c0_i32, %c0_i32_0 : i32, i32
  }
  func.func @transform_4(%arg0: i32) -> (i32, i32) {
    %c0_i32 = arith.constant 0 : i32
    %c0_i32_0 = arith.constant 0 : i32
    %c0_i32_1 = arith.constant 0 : i32
    return %c0_i32, %c0_i32_0 : i32, i32
  }
  func.func @transform_5(%arg0: i32) -> (i32, i32) {
    %c0_i32 = arith.constant 0 : i32
    %c0_i32_0 = arith.constant 0 : i32
    %c0_i32_1 = arith.constant 0 : i32
    return %c0_i32, %c0_i32_0 : i32, i32
  }
  func.func @transform_6(%arg0: i32) -> (i32, i32) {
    %c0_i32 = arith.constant 0 : i32
    %c0_i32_0 = arith.constant 0 : i32
    %c0_i32_1 = arith.constant 0 : i32
    return %c0_i32, %c0_i32_0 : i32, i32
  }
  func.func @transform_7(%arg0: i32) -> (i32, i32) {
    %c0_i32 = arith.constant 0 : i32
    %c0_i32_0 = arith.constant 0 : i32
    return %arg0, %c0_i32 : i32, i32
  }
}

module attributes {stable_mosaic.version = 11 : i64} {
  func.func @_dense_ln_kernel(%arg0: i32, %arg1: i32, %arg2: memref<16x128xbf16, #tpu.memory_space<vmem>>, %arg3: memref<128x256xbf16, #tpu.memory_space<vmem>>, %arg4: memref<1x256xf32, #tpu.memory_space<vmem>>, %arg5: memref<1x256xf32, #tpu.memory_space<vmem>>, %arg6: memref<1x256xf32, #tpu.memory_space<vmem>>, %arg7: memref<16x256xbf16, #tpu.memory_space<vmem>>, %arg8: memref<16x256xf32, #tpu.memory_space<vmem>>) attributes {dimension_semantics = [#tpu.dimension_semantics<parallel>, #tpu.dimension_semantics<arbitrary>], iteration_bounds = array<i64: 2, 2>, scalar_prefetch = 0 : i64, scratch_operands = 1 : i64, tpu.core_type = #tpu.core_type<tc>, window_params = [{transform_indices = @transform_0, window_bounds = array<i64: 16, 128>}, {transform_indices = @transform_1, window_bounds = array<i64: 128, 256>}, {pipeline_mode = #tpu.pipeline_mode<synchronous>, transform_indices = @transform_2, window_bounds = array<i64: 1, 256>}, {pipeline_mode = #tpu.pipeline_mode<synchronous>, transform_indices = @transform_3, window_bounds = array<i64: 1, 256>}, {pipeline_mode = #tpu.pipeline_mode<synchronous>, transform_indices = @transform_4, window_bounds = array<i64: 1, 256>}, {transform_indices = @transform_5, window_bounds = array<i64: 16, 256>}]} {
    %c0_i32 = arith.constant 0 : i32
    %0 = arith.cmpi eq, %arg1, %c0_i32 : i32
    %1 = arith.extui %0 : i1 to i32
    %c0_i32_0 = arith.constant 0 : i32
    %2 = arith.cmpi ne, %1, %c0_i32_0 : i32
    scf.if %2 {
      %cst_9 = arith.constant 0.000000e+00 : f32
      %12 = vector.broadcast %cst_9 : f32 to vector<16x256xf32>
      %c0_10 = arith.constant 0 : index
      %c0_11 = arith.constant 0 : index
      %13 = vector.load %arg8[%c0_10, %c0_11] : memref<16x256xf32, #tpu.memory_space<vmem>>, vector<16x256xf32>
      tpu.vector_store %arg8[%c0_10, %c0_11], %12 {strides = array<i32>} : memref<16x256xf32, #tpu.memory_space<vmem>>, vector<16x256xf32>,
    } else {
    }
    %c0 = arith.constant 0 : index
    %c0_1 = arith.constant 0 : index
    %3 = vector.load %arg8[%c0, %c0_1] : memref<16x256xf32, #tpu.memory_space<vmem>>, vector<16x256xf32>
    %c0_2 = arith.constant 0 : index
    %c0_3 = arith.constant 0 : index
    %4 = vector.load %arg2[%c0_2, %c0_3] : memref<16x128xbf16, #tpu.memory_space<vmem>>, vector<16x128xbf16>
    %c0_4 = arith.constant 0 : index
    %c0_5 = arith.constant 0 : index
    %5 = vector.load %arg3[%c0_4, %c0_5] : memref<128x256xbf16, #tpu.memory_space<vmem>>, vector<128x256xbf16>
    %cst = arith.constant dense<0.000000e+00> : vector<16x256xf32>
    %6 = tpu.matmul %4, %5, %cst {dimension_numbers = #tpu.dot_dimension_numbers<[1], [0], [0], [1], [0, 0, 1, 1], [], []>} : vector<16x128xbf16>, vector<128x256xbf16>, vector<16x256xf32> -> vector<16x256xf32>
    %7 = arith.addf %3, %6 : vector<16x256xf32>
    %c0_6 = arith.constant 0 : index
    %c0_7 = arith.constant 0 : index
    %8 = vector.load %arg8[%c0_6, %c0_7] : memref<16x256xf32, #tpu.memory_space<vmem>>, vector<16x256xf32>
    tpu.vector_store %arg8[%c0_6, %c0_7], %7 {strides = array<i32>} : memref<16x256xf32, #tpu.memory_space<vmem>>, vector<16x256xf32>,
    %c1_i32 = arith.constant 1 : i32
    %9 = arith.cmpi eq, %arg1, %c1_i32 : i32
    %10 = arith.extui %9 : i1 to i32
    %c0_i32_8 = arith.constant 0 : i32
    %11 = arith.cmpi ne, %10, %c0_i32_8 : i32
    scf.if %11 {
      %c0_9 = arith.constant 0 : index
      %c0_10 = arith.constant 0 : index
      %12 = vector.load %arg8[%c0_9, %c0_10] : memref<16x256xf32, #tpu.memory_space<vmem>>, vector<16x256xf32>
      %c0_11 = arith.constant 0 : index
      %c0_12 = arith.constant 0 : index
      %13 = vector.load %arg4[%c0_11, %c0_12] : memref<1x256xf32, #tpu.memory_space<vmem>>, vector<1x256xf32>
      %14 = vector.broadcast %13 : vector<1x256xf32> to vector<16x256xf32>
      %15 = arith.addf %12, %14 : vector<16x256xf32>
      %16 = arith.mulf %15, %15 : vector<16x256xf32>
      %17 = arith.mulf %15, %16 : vector<16x256xf32>
      %cst_13 = arith.constant 4.471500e-02 : f32
      %18 = vector.broadcast %cst_13 : f32 to vector<16x256xf32>
      %19 = arith.mulf %18, %17 : vector<16x256xf32>
      %20 = arith.addf %15, %19 : vector<16x256xf32>
      %cst_14 = arith.constant 0.797884583 : f32
      %21 = vector.broadcast %cst_14 : f32 to vector<16x256xf32>
      %22 = arith.mulf %21, %20 : vector<16x256xf32>
      %23 = math.tanh %22 : vector<16x256xf32>
      %cst_15 = arith.constant 1.000000e+00 : f32
      %24 = vector.broadcast %cst_15 : f32 to vector<16x256xf32>
      %25 = arith.addf %24, %23 : vector<16x256xf32>
      %cst_16 = arith.constant 5.000000e-01 : f32
      %26 = vector.broadcast %cst_16 : f32 to vector<16x256xf32>
      %27 = arith.mulf %26, %25 : vector<16x256xf32>
      %28 = arith.mulf %15, %27 : vector<16x256xf32>
      %cst_17 = arith.constant dense<0.000000e+00> : vector<16xf32>
      %29 = vector.multi_reduction <add>, %28, %cst_17 [1] : vector<16x256xf32> to vector<16xf32>
      %30 = vector.shape_cast %29 : vector<16xf32> to vector<16x1xf32>
      %cst_18 = arith.constant 2.560000e+02 : f32
      %31 = vector.broadcast %cst_18 : f32 to vector<16x1xf32>
      %32 = arith.divf %30, %31 : vector<16x1xf32>
      %33 = vector.broadcast %32 : vector<16x1xf32> to vector<16x256xf32>
      %34 = arith.subf %28, %33 : vector<16x256xf32>
      %35 = arith.mulf %34, %34 : vector<16x256xf32>
      %cst_19 = arith.constant dense<0.000000e+00> : vector<16xf32>
      %36 = vector.multi_reduction <add>, %35, %cst_19 [1] : vector<16x256xf32> to vector<16xf32>
      %37 = vector.shape_cast %36 : vector<16xf32> to vector<16x1xf32>
      %cst_20 = arith.constant 2.560000e+02 : f32
      %38 = vector.broadcast %cst_20 : f32 to vector<16x1xf32>
      %39 = arith.divf %37, %38 : vector<16x1xf32>
      %cst_21 = arith.constant 9.99999996E-13 : f32
      %40 = vector.broadcast %cst_21 : f32 to vector<16x1xf32>
      %41 = arith.addf %39, %40 : vector<16x1xf32>
      %42 = math.rsqrt %41 : vector<16x1xf32>
      %43 = vector.broadcast %42 : vector<16x1xf32> to vector<16x256xf32>
      %44 = arith.mulf %34, %43 : vector<16x256xf32>
      %c0_22 = arith.constant 0 : index
      %c0_23 = arith.constant 0 : index
      %45 = vector.load %arg5[%c0_22, %c0_23] : memref<1x256xf32, #tpu.memory_space<vmem>>, vector<1x256xf32>
      %46 = vector.broadcast %45 : vector<1x256xf32> to vector<16x256xf32>
      %47 = arith.mulf %44, %46 : vector<16x256xf32>
      %c0_24 = arith.constant 0 : index
      %c0_25 = arith.constant 0 : index
      %48 = vector.load %arg6[%c0_24, %c0_25] : memref<1x256xf32, #tpu.memory_space<vmem>>, vector<1x256xf32>
      %49 = vector.broadcast %48 : vector<1x256xf32> to vector<16x256xf32>
      %50 = arith.addf %47, %49 : vector<16x256xf32>
      %51 = arith.truncf %50 : vector<16x256xf32> to vector<16x256xbf16>
      %c0_26 = arith.constant 0 : index
      %c0_27 = arith.constant 0 : index
      %52 = vector.load %arg7[%c0_26, %c0_27] : memref<16x256xbf16, #tpu.memory_space<vmem>>, vector<16x256xbf16>
      tpu.vector_store %arg7[%c0_26, %c0_27], %51 {strides = array<i32>} : memref<16x256xbf16, #tpu.memory_space<vmem>>, vector<16x256xbf16>,
    } else {
    }
    return
  }
  func.func @transform_0(%arg0: i32, %arg1: i32) -> (i32, i32) {
    %c0_i32 = arith.constant 0 : i32
    return %arg0, %arg1 : i32, i32
  }
  func.func @transform_1(%arg0: i32, %arg1: i32) -> (i32, i32) {
    %c0_i32 = arith.constant 0 : i32
    %c0_i32_0 = arith.constant 0 : i32
    return %arg1, %c0_i32 : i32, i32
  }
  func.func @transform_2(%arg0: i32, %arg1: i32) -> (i32, i32) {
    %c0_i32 = arith.constant 0 : i32
    %c0_i32_0 = arith.constant 0 : i32
    %c0_i32_1 = arith.constant 0 : i32
    return %c0_i32, %c0_i32_0 : i32, i32
  }
  func.func @transform_3(%arg0: i32, %arg1: i32) -> (i32, i32) {
    %c0_i32 = arith.constant 0 : i32
    %c0_i32_0 = arith.constant 0 : i32
    %c0_i32_1 = arith.constant 0 : i32
    return %c0_i32, %c0_i32_0 : i32, i32
  }
  func.func @transform_4(%arg0: i32, %arg1: i32) -> (i32, i32) {
    %c0_i32 = arith.constant 0 : i32
    %c0_i32_0 = arith.constant 0 : i32
    %c0_i32_1 = arith.constant 0 : i32
    return %c0_i32, %c0_i32_0 : i32, i32
  }
  func.func @transform_5(%arg0: i32, %arg1: i32) -> (i32, i32) {
    %c0_i32 = arith.constant 0 : i32
    %c0_i32_0 = arith.constant 0 : i32
    return %arg0, %c0_i32 : i32, i32
  }
}

module attributes {stable_mosaic.version = 11 : i64} {
  func.func @_decoder_ce_kernel(%arg0: i32, %arg1: i32, %arg2: memref<16x256xbf16, #tpu.memory_space<vmem>>, %arg3: memref<256x128xbf16, #tpu.memory_space<vmem>>, %arg4: memref<1x128xf32, #tpu.memory_space<vmem>>, %arg5: memref<16x1xi32, #tpu.memory_space<vmem>>, %arg6: memref<16x1xf32, #tpu.memory_space<vmem>>, %arg7: memref<16x1xf32, #tpu.memory_space<vmem>>, %arg8: memref<16x1xf32, #tpu.memory_space<vmem>>, %arg9: memref<16x1xf32, #tpu.memory_space<vmem>>) attributes {dimension_semantics = [#tpu.dimension_semantics<parallel>, #tpu.dimension_semantics<arbitrary>], iteration_bounds = array<i64: 2, 4>, scalar_prefetch = 0 : i64, scratch_operands = 3 : i64, tpu.core_type = #tpu.core_type<tc>, window_params = [{transform_indices = @transform_0, window_bounds = array<i64: 16, 256>}, {transform_indices = @transform_1, window_bounds = array<i64: 256, 128>}, {transform_indices = @transform_2, window_bounds = array<i64: 1, 128>}, {transform_indices = @transform_3, window_bounds = array<i64: 16, 1>}, {transform_indices = @transform_4, window_bounds = array<i64: 16, 1>}]} {
    %c0_i32 = arith.constant 0 : i32
    %0 = arith.cmpi eq, %arg1, %c0_i32 : i32
    %1 = arith.extui %0 : i1 to i32
    %c0_i32_0 = arith.constant 0 : i32
    %2 = arith.cmpi ne, %1, %c0_i32_0 : i32
    scf.if %2 {
      %cst_25 = arith.constant 0xFF800000 : f32
      %42 = vector.broadcast %cst_25 : f32 to vector<16x1xf32>
      %c0_26 = arith.constant 0 : index
      %c0_27 = arith.constant 0 : index
      %43 = vector.load %arg7[%c0_26, %c0_27] : memref<16x1xf32, #tpu.memory_space<vmem>>, vector<16x1xf32>
      tpu.vector_store %arg7[%c0_26, %c0_27], %42 {strides = array<i32>} : memref<16x1xf32, #tpu.memory_space<vmem>>, vector<16x1xf32>,
      %cst_28 = arith.constant 0.000000e+00 : f32
      %44 = vector.broadcast %cst_28 : f32 to vector<16x1xf32>
      %c0_29 = arith.constant 0 : index
      %c0_30 = arith.constant 0 : index
      %45 = vector.load %arg8[%c0_29, %c0_30] : memref<16x1xf32, #tpu.memory_space<vmem>>, vector<16x1xf32>
      tpu.vector_store %arg8[%c0_29, %c0_30], %44 {strides = array<i32>} : memref<16x1xf32, #tpu.memory_space<vmem>>, vector<16x1xf32>,
      %cst_31 = arith.constant 0.000000e+00 : f32
      %46 = vector.broadcast %cst_31 : f32 to vector<16x1xf32>
      %c0_32 = arith.constant 0 : index
      %c0_33 = arith.constant 0 : index
      %47 = vector.load %arg9[%c0_32, %c0_33] : memref<16x1xf32, #tpu.memory_space<vmem>>, vector<16x1xf32>
      tpu.vector_store %arg9[%c0_32, %c0_33], %46 {strides = array<i32>} : memref<16x1xf32, #tpu.memory_space<vmem>>, vector<16x1xf32>,
    } else {
    }
    %c0 = arith.constant 0 : index
    %c0_1 = arith.constant 0 : index
    %3 = vector.load %arg2[%c0, %c0_1] : memref<16x256xbf16, #tpu.memory_space<vmem>>, vector<16x256xbf16>
    %c0_2 = arith.constant 0 : index
    %c0_3 = arith.constant 0 : index
    %4 = vector.load %arg3[%c0_2, %c0_3] : memref<256x128xbf16, #tpu.memory_space<vmem>>, vector<256x128xbf16>
    %cst = arith.constant dense<0.000000e+00> : vector<16x128xf32>
    %5 = tpu.matmul %3, %4, %cst {dimension_numbers = #tpu.dot_dimension_numbers<[1], [0], [0], [1], [0, 0, 1, 1], [], []>} : vector<16x256xbf16>, vector<256x128xbf16>, vector<16x128xf32> -> vector<16x128xf32>
    %c0_4 = arith.constant 0 : index
    %c0_5 = arith.constant 0 : index
    %6 = vector.load %arg4[%c0_4, %c0_5] : memref<1x128xf32, #tpu.memory_space<vmem>>, vector<1x128xf32>
    %7 = vector.broadcast %6 : vector<1x128xf32> to vector<16x128xf32>
    %8 = arith.addf %5, %7 : vector<16x128xf32>
    %c0_6 = arith.constant 0 : index
    %c0_7 = arith.constant 0 : index
    %9 = vector.load %arg5[%c0_6, %c0_7] : memref<16x1xi32, #tpu.memory_space<vmem>>, vector<16x1xi32>
    %10 = tpu.iota {dimensions = array<i32: 1>} : vector<16x128xi32>
    %c128_i32 = arith.constant 128 : i32
    %11 = arith.muli %arg1, %c128_i32 : i32
    %12 = vector.broadcast %11 : i32 to vector<16x128xi32>
    %13 = arith.addi %10, %12 : vector<16x128xi32>
    %c0_8 = arith.constant 0 : index
    %c0_9 = arith.constant 0 : index
    %14 = vector.load %arg9[%c0_8, %c0_9] : memref<16x1xf32, #tpu.memory_space<vmem>>, vector<16x1xf32>
    %15 = vector.broadcast %9 : vector<16x1xi32> to vector<16x128xi32>
    %16 = arith.cmpi eq, %13, %15 : vector<16x128xi32>
    %cst_10 = arith.constant 0.000000e+00 : f32
    %17 = vector.broadcast %cst_10 : f32 to vector<16x128xf32>
    %18 = arith.select %16, %8, %17 : vector<16x128xi1>, vector<16x128xf32>
    %cst_11 = arith.constant dense<0.000000e+00> : vector<16xf32>
    %19 = vector.multi_reduction <add>, %18, %cst_11 [1] : vector<16x128xf32> to vector<16xf32>
    %20 = vector.shape_cast %19 : vector<16xf32> to vector<16x1xf32>
    %21 = arith.addf %14, %20 : vector<16x1xf32>
    %c0_12 = arith.constant 0 : index
    %c0_13 = arith.constant 0 : index
    %22 = vector.load %arg9[%c0_12, %c0_13] : memref<16x1xf32, #tpu.memory_space<vmem>>, vector<16x1xf32>
    tpu.vector_store %arg9[%c0_12, %c0_13], %21 {strides = array<i32>} : memref<16x1xf32, #tpu.memory_space<vmem>>, vector<16x1xf32>,
    %c0_14 = arith.constant 0 : index
    %c0_15 = arith.constant 0 : index
    %23 = vector.load %arg7[%c0_14, %c0_15] : memref<16x1xf32, #tpu.memory_space<vmem>>, vector<16x1xf32>
    %cst_16 = arith.constant dense<0xFF800000> : vector<16xf32>
    %24 = vector.multi_reduction <maximumf>, %8, %cst_16 [1] : vector<16x128xf32> to vector<16xf32>
    %25 = vector.shape_cast %24 : vector<16xf32> to vector<16x1xf32>
    %26 = arith.maximumf %23, %25 : vector<16x1xf32>
    %c0_17 = arith.constant 0 : index
    %c0_18 = arith.constant 0 : index
    %27 = vector.load %arg8[%c0_17, %c0_18] : memref<16x1xf32, #tpu.memory_space<vmem>>, vector<16x1xf32>
    %28 = arith.subf %23, %26 : vector<16x1xf32>
    %29 = math.exp %28 : vector<16x1xf32>
    %30 = arith.mulf %27, %29 : vector<16x1xf32>
    %31 = vector.broadcast %26 : vector<16x1xf32> to vector<16x128xf32>
    %32 = arith.subf %8, %31 : vector<16x128xf32>
    %33 = math.exp %32 : vector<16x128xf32>
    %cst_19 = arith.constant dense<0.000000e+00> : vector<16xf32>
    %34 = vector.multi_reduction <add>, %33, %cst_19 [1] : vector<16x128xf32> to vector<16xf32>
    %35 = vector.shape_cast %34 : vector<16xf32> to vector<16x1xf32>
    %36 = arith.addf %30, %35 : vector<16x1xf32>
    %c0_20 = arith.constant 0 : index
    %c0_21 = arith.constant 0 : index
    %37 = vector.load %arg8[%c0_20, %c0_21] : memref<16x1xf32, #tpu.memory_space<vmem>>, vector<16x1xf32>
    tpu.vector_store %arg8[%c0_20, %c0_21], %36 {strides = array<i32>} : memref<16x1xf32, #tpu.memory_space<vmem>>, vector<16x1xf32>,
    %c0_22 = arith.constant 0 : index
    %c0_23 = arith.constant 0 : index
    %38 = vector.load %arg7[%c0_22, %c0_23] : memref<16x1xf32, #tpu.memory_space<vmem>>, vector<16x1xf32>
    tpu.vector_store %arg7[%c0_22, %c0_23], %26 {strides = array<i32>} : memref<16x1xf32, #tpu.memory_space<vmem>>, vector<16x1xf32>,
    %c3_i32 = arith.constant 3 : i32
    %39 = arith.cmpi eq, %arg1, %c3_i32 : i32
    %40 = arith.extui %39 : i1 to i32
    %c0_i32_24 = arith.constant 0 : i32
    %41 = arith.cmpi ne, %40, %c0_i32_24 : i32
    scf.if %41 {
      %c0_25 = arith.constant 0 : index
      %c0_26 = arith.constant 0 : index
      %42 = vector.load %arg7[%c0_25, %c0_26] : memref<16x1xf32, #tpu.memory_space<vmem>>, vector<16x1xf32>
      %c0_27 = arith.constant 0 : index
      %c0_28 = arith.constant 0 : index
      %43 = vector.load %arg8[%c0_27, %c0_28] : memref<16x1xf32, #tpu.memory_space<vmem>>, vector<16x1xf32>
      %44 = math.log %43 : vector<16x1xf32>
      %45 = arith.addf %42, %44 : vector<16x1xf32>
      %c0_29 = arith.constant 0 : index
      %c0_30 = arith.constant 0 : index
      %46 = vector.load %arg9[%c0_29, %c0_30] : memref<16x1xf32, #tpu.memory_space<vmem>>, vector<16x1xf32>
      %47 = arith.subf %45, %46 : vector<16x1xf32>
      %c0_31 = arith.constant 0 : index
      %c0_32 = arith.constant 0 : index
      %48 = vector.load %arg6[%c0_31, %c0_32] : memref<16x1xf32, #tpu.memory_space<vmem>>, vector<16x1xf32>
      tpu.vector_store %arg6[%c0_31, %c0_32], %47 {strides = array<i32>} : memref<16x1xf32, #tpu.memory_space<vmem>>, vector<16x1xf32>,
    } else {
    }
    return
  }
  func.func @transform_0(%arg0: i32, %arg1: i32) -> (i32, i32) {
    %c0_i32 = arith.constant 0 : i32
    %c0_i32_0 = arith.constant 0 : i32
    return %arg0, %c0_i32 : i32, i32
  }
  func.func @transform_1(%arg0: i32, %arg1: i32) -> (i32, i32) {
    %c0_i32 = arith.constant 0 : i32
    %c0_i32_0 = arith.constant 0 : i32
    return %c0_i32, %arg1 : i32, i32
  }
  func.func @transform_2(%arg0: i32, %arg1: i32) -> (i32, i32) {
    %c0_i32 = arith.constant 0 : i32
    %c0_i32_0 = arith.constant 0 : i32
    return %c0_i32, %arg1 : i32, i32
  }
  func.func @transform_3(%arg0: i32, %arg1: i32) -> (i32, i32) {
    %c0_i32 = arith.constant 0 : i32
    %c0_i32_0 = arith.constant 0 : i32
    return %arg0, %c0_i32 : i32, i32
  }
  func.func @transform_4(%arg0: i32, %arg1: i32) -> (i32, i32) {
    %c0_i32 = arith.constant 0 : i32
    %c0_i32_0 = arith.constant 0 : i32
    return %arg0, %c0_i32 : i32, i32
  }
}

</mosaic_0001>

<bundles_post_ra>
// kernel: _lambda_.11
= control target key start
LH: loop header
LB: loop body
LE: loop exit
PB: predicated region body
PF: predicated region fallthrough
CT: control target
= control target key end

     0   :  { %s379_s12 = smov 0   ;;  %s406_s0 = inlined_call_operand.vmem [shape: f32[32,256], index: 0, kind: input, shape index: {}]   ;;  %s407_s1 = inlined_call_operand.vmem [shape: f32[1,256], index: 1, kind: input, shape index: {}]   ;;  %s408_s2 = inlined_call_operand.vmem [shape: f32[1,256], index: 2, kind: input, shape index: {}]   ;;  %s409_s3 = inlined_call_operand.vmem [shape: bf16[32,256], index: 3, kind: output, shape index: {}]  }
   0x1 LB: > { %s320_s13 = sadd.s32 4294967295, %s357_s12   ;;  %p324_p0 = scmp.ge.s32.totalorder %s357_s12, 1  ;;  %s357_s12 = sphi %s379_s12, %s13_s12  }
   0x2   : > { %p139_p1 = scmp.lt.s32.totalorder %s357_s12, 3 }
   0x4   : > { %p140_p2 = pnand %p324_p0, %p139_p1 }
   0x5   : > { %s325_s14 = sshll.u32 (!%p140_p2), %s320_s13, 1  ;;  %v218_v22 = vlaneseq (!%p140_p2)  ;;  %v216_v30 = vld [vmem:[%s407_s1] sm:$0x3] (!%p140_p2) }
   0x6   : > { %143 = sbr.rel (%p140_p2) target bundleno = 339 (0x153), region = 32  ;;  %p166_p3 = scmp.lt.s32.totalorder (!%p140_p2), %s325_s14, 3  ;;  %v232_v31 = vld [vmem:[%s408_s2] sm:$0x3] (!%p140_p2) }
   0x7   : > { %v219_v26 = vshrl.u32 (!%p140_p2), %v218_v22, 7 }
   0x9   : > { %v220_v28 = vsub.s32 (!%p140_p2), 0, %v219_v26  ;;  %v224_v29 = vsub.s32 (!%p140_p2), 1, %v219_v26 }
   0xb   : > { %v221_v32 = vrot.slane (!%p140_p2), %v216_v30, %v220_v28  ;;  %v225_v33 = vrot.slane (!%p140_p2), %v216_v30, %v224_v29  ;;  %v237_v35 = vrot.slane (!%p140_p2), %v232_v31, %v220_v28  ;;  %v241_v36 = vrot.slane (!%p140_p2), %v232_v31, %v224_v29 }
   0xd   : > { %s411_s14 = smov (!%p166_p3, %s325_s14), 3 }
   0xe   : > { %s335_s15 = sshll.u32 %s411_s14, 4  ;;  %s336_s23 = sshll.u32 %s411_s14, 3 }
   0xf   : > { %s170_s18 = scalar_lea.vmem %s406_s0, %s335_s15  ;;  %s177_s26 = scalar_lea.vmem %s409_s3, %s336_s23 }
  0x10   : > { %v179_v0 = vld [vmem:[%s170_s18] sm:$0xff]  ;;  %v180_v1 = vld [vmem:[%s170_s18 + $0x8] sm:$0xff]  ;;  %v181_v2 = vld [vmem:[%s170_s18 + $0x10] sm:$0xff] }
  0x11   : > { %v183_v3 = vadd.f32 %v180_v1, %v179_v0  ;;  %v182_v4 = vld [vmem:[%s170_s18 + $0x18] sm:$0xff] }
  0x12   : > { %v186_v5 = vadd.f32 %v182_v4, %v181_v2 }
  0x13   : > { %184 = vadd.xlane.f32.xlu0 %v183_v3 }
  0x17   : > { %187 = vadd.xlane.f32.xlu0 %v186_v5 }
  0xa0   : > { %v185_v6 = vpop.xlane.xlu0 %184 }
  0xa1   : > { %v190_v7 = vmul.f32 0.00390625, %v185_v6 }
  0xa3   : > { %v192_v8 = vsub.f32 %v179_v0, %v190_v7  ;;  %v193_v9 = vsub.f32 %v180_v1, %v190_v7 }
  0xa4   : > { %v188_v10 = vpop.xlane.xlu0 %187 }
  0xa5   : > { %v191_v11 = vmul.f32 0.00390625, %v188_v10  ;;  %v196_v12 = vmul.f32 %v192_v8, %v192_v8  ;;  %v197_v13 = vmul.f32 %v193_v9, %v193_v9 }
  0xa7   : > { %v194_v14 = vsub.f32 %v181_v2, %v191_v11  ;;  %v195_v15 = vsub.f32 %v182_v4, %v191_v11  ;;  %v200_v16 = vadd.f32 %v197_v13, %v196_v12 }
  0xa9   : > { %201 = vadd.xlane.f32.xlu1 %v200_v16  ;;  %v198_v17 = vmul.f32 %v194_v14, %v194_v14  ;;  %v199_v18 = vmul.f32 %v195_v15, %v195_v15 }
  0xab   : > { %v203_v19 = vadd.f32 %v199_v18, %v198_v17 }
  0xad   : > { %204 = vadd.xlane.f32.xlu1 %v203_v19 }
 0x136   : > { %v202_v20 = vpop.xlane.xlu1 %201 }
 0x137   : > { %v206_v21 = vmul.f32 0.00390625, %v202_v20 }
 0x139   : > { %v208_v23 = vadd.f32 1e-12, %v206_v21 }
 0x13a   : > { %v205_v24 = vpop.xlane.xlu1 %204 }
 0x13b   : > { %347 = vrsqrt.f32 %v208_v23  ;;  %v207_v25 = vmul.f32 0.00390625, %v205_v24 }
 0x13d   : > { %v209_v27 = vadd.f32 1e-12, %v207_v25 }
 0x13f   : > { %349 = vrsqrt.f32 %v209_v27 }
 0x145   : > { %v348_v34 = vpop.eup %347 }
 0x146   : > { %v212_v37 = vmul.f32 %v348_v34, %v192_v8  ;;  %v213_v38 = vmul.f32 %v348_v34, %v193_v9 }
 0x148   : > { %v228_v39 = vmul.f32 %v221_v32, %v212_v37  ;;  %v229_v40 = vmul.f32 %v225_v33, %v213_v38 }
 0x149   : > { %v350_v41 = vpop.eup %349 }
 0x14a   : > { %v244_v42 = vadd.f32 %v237_v35, %v228_v39  ;;  %v245_v43 = vadd.f32 %v241_v36, %v229_v40  ;;  %v214_v44 = vmul.f32 %v350_v41, %v194_v14  ;;  %v215_v45 = vmul.f32 %v350_v41, %v195_v15 }
 0x14c   : > { %v337_v46 = vpack.c.bf16 %v245_v43, %v244_v42  ;;  %v230_v47 = vmul.f32 %v221_v32, %v214_v44  ;;  %v231_v48 = vmul.f32 %v225_v33, %v215_v45 }
 0x14e   : > { %260 = vst [vmem:[%s177_s26] sm:$0xff] %v337_v46  ;;  %v246_v49 = vadd.f32 %v237_v35, %v230_v47  ;;  %v247_v50 = vadd.f32 %v241_v36, %v231_v48 }
 0x150   : > { %v338_v51 = vpack.c.bf16 %v247_v50, %v246_v49 }
 0x152   : > { %261 = vst [vmem:[%s177_s26 + $0x8] sm:$0xff] %v338_v51 }
 0x153 PF: > { %s13_s12 = sadd.s32 1, %s357_s12  }
 0x154   : > { %p10_p4 = scmp.ge.s32.totalorder %s13_s12, 4  }
 0x156   :  { %12 = sbr.rel (!%p10_p4) target bundleno = 1 (0x1), region = 62 }

// kernel: _lambda_.12
= control target key start
LH: loop header
LB: loop body
LE: loop exit
PB: predicated region body
PF: predicated region fallthrough
CT: control target
= control target key end

     0   :  { %s1253_s0 = inlined_call_operand.vmem [shape: bf16[32,256], index: 0, kind: input, shape index: {}]   ;;  %s1254_s1 = inlined_call_operand.vmem [shape: bf16[256,768], index: 1, kind: input, shape index: {}]   ;;  %s1255_s2 = inlined_call_operand.vmem [shape: f32[1,768], index: 2, kind: input, shape index: {}]   ;;  %s1256_s3 = inlined_call_operand.vmem [shape: bf16[32,768], index: 3, kind: output, shape index: {}]  }
   0x1   :  { %1261 = sst [smem:[#allocation11_spill]] %s1256_s3 }
   0x2   :  { %s1010_s12 = smov 0   ;;  %s1012_s13 = smov 0  }
   0x3   :  { %s1014_s14 = smov 0   ;;  %s1016_s15 = smov 0  }
   0x4   :  { %s1018_s16 = smov 0   ;;  %s1020_s17 = smov 0  }
   0x5   :  { %s1022_s18 = smov 0   ;;  %s1024_s19 = smov 0  }
   0x6   :  { %s1026_s20 = smov 0   ;;  %s1028_s21 = smov 0  }
   0x7   :  { %s1030_s22 = smov 0   ;;  %s1032_s23 = smov 0  }
   0x8   :  { %s1034_s24 = smov 0  }
   0x9 LB: > { %1262 = sst [smem:[#allocation6_spill]] %s969_s20  ;;  %s25_s26 = sadd.s32 1, %s973_s21  ;;  %s985_s24 = sphi %s1034_s24, %s13_s24   ;;  %s981_s23 = sphi %s1032_s23, %s1277_s23   ;;  %s977_s22 = sphi %s1030_s22, %s1289_s22   ;;  %s973_s21 = sphi %s1028_s21, %s1288_s21   ;;  %s969_s20 = sphi %s1026_s20, %s1287_s20   ;;  %s965_s19 = sphi %s1024_s19, %s1286_s19   ;;  %s961_s18 = sphi %s1022_s18, %s1285_s18   ;;  %s957_s17 = sphi %s1020_s17, %s1284_s17   ;;  %s953_s16 = sphi %s1018_s16, %s1283_s16   ;;  %s949_s15 = sphi %s1016_s15, %s1282_s15   ;;  %s945_s14 = sphi %s1014_s14, %s1281_s14   ;;  %s941_s13 = sphi %s1012_s13, %s1280_s13   ;;  %s937_s12 = sphi %s1010_s12, %s1279_s12  }
   0xa   : > { %1263 = sst [smem:[#allocation7_spill]] %s981_s23  ;;  %p26_p0 = scmp.ge.s32.totalorder %s25_s26, 2 }
   0xb   : > { %s28_s27 = sadd.s32 1, %s977_s22  ;;  %s32_s28 = sadd.s32 1, %s981_s23 }
   0xc   : > { %s41_s29 = sadd.s32 1, %s957_s17  ;;  %s1291_s26 = smov (%p26_p0, %s25_s26), 0 }
   0xd   : > { %1264 = sst [smem:[#allocation8_spill]] %s1291_s26  ;;  %s1293_s27 = smov (!%p26_p0, %s28_s27), %s977_s22 }
   0xe   : > { %s37_s30 = ssub.s32 %s973_s21, %s1291_s26  ;;  %p48_p1 = scmp.ne.s32.totalorder %s957_s17, %s953_s16 }
   0xf   : > { %p30_p2 = scmp.ge.s32.totalorder %s1293_s27, 6  ;;  %p49_p3 = scmp.eq.s32.totalorder %s985_s24, 0 }
  0x10   : > { %s69_s4 = sadd.s32 1, %s949_s15  ;;  %p76_p4 = scmp.ne.s32.totalorder %s949_s15, %s945_s14 }
  0x11   : > { %s1295_s27 = smov (%p30_p2, %s1293_s27), 0  ;;  %s1297_s28 = smov (!%p30_p2, %s32_s28), %s981_s23 }
  0x12   : > { %1265 = sst [smem:[#allocation9_spill]] %s1295_s27  ;;  %p1094_p5 = por %p49_p3, %p48_p1 }
  0x13   : > { %s65_s6 = ssub.s32 %s977_s22, %s1295_s27  ;;  %p34_p6 = scmp.ge.s32.totalorder %s1297_s28, 2 }
  0x14   : > { %s66_s7 = sor.u32 %s65_s6, %s37_s30  ;;  %p1100_p8 = por %p76_p4, %p49_p3 }
  0x15   : > { %p67_p7 = scmp.eq.s32.totalorder %s66_s7, 0  ;;  %s1299_s28 = smov (%p34_p6, %s1297_s28), 0 }
  0x16   : > { %1268 = sst [smem:[#allocation10_spill]] %s1299_s28  ;;  %s36_s10 = ssub.s32 %s981_s23, %s1299_s28 }
  0x17   : > { %s1107_s9 = scalar_select %p67_p7, %s949_s15, %s69_s4  }
  0x18   : > { %s123_s11 = sadd.s32 1, %s941_s13  ;;  %s38_s25 = sor.u32 %s37_s30, %s36_s10 }
  0x19   : > { %s120_s26 = sor.u32 %s65_s6, %s36_s10  ;;  %p39_p9 = scmp.eq.s32.totalorder %s38_s25, 0 }
  0x1a   : > { %p121_p10 = scmp.eq.s32.totalorder %s120_s26, 0  ;;  %p133_p11 = scmp.ne.s32.totalorder %s941_s13, %s937_s12 }
  0x1b   : > { %s1269_s27 = sadd.s32 4294967295, %s985_s24   ;;  %p695_p0 = scmp.ge.s32.totalorder %s985_s24, 24 }
  0x1c   : > { %p134_p12 = scmp.eq.s32.totalorder %s1269_s27, 23 }
  0x1d   : > { %s1117_s3 = scalar_select %p39_p9, %s957_s17, %s41_s29  }
  0x1e   : > { %s1120_s7 = scalar_select %p121_p10, %s941_s13, %s123_s11  }
  0x1f   : > { %p1122_p13 = por %p134_p12, %p133_p11  ;;  %156 = sbr.rel (%p695_p0) target bundleno = 62 (0x3e), region = 16 }
  0x26   : > { %159 = sbr.rel (!%p1094_p5) target bundleno = 45 (0x2d), region = 20  ;;  %s161_s25 = sand.u32 (%p1094_p5), 1, %s957_s17  }
  0x27   : > { %s728_s26 = sshll.u32 (%p1094_p5), %s981_s23, 2  ;;  %s696_s27 = sshll.u32 (%p1094_p5), %s161_s25, 3 }
  0x28   : > { %s166_s29 = sadd.s32 (%p1094_p5), %s973_s21, %s728_s26  ;;  %s163_s11 = scalar_lea.vmem (%p1094_p5), [#allocation3], %s696_s27 }
  0x29   : > { %s699_s30 = sshll.u32 (%p1094_p5), %s166_s29, 2 }
  0x2a   : > { %s168_s10 = scalar_lea.vmem (%p1094_p5), %s1253_s0, %s699_s30 }
  0x2b   : > { %v184_v0 = vld [vmem:[%s168_s10] sm:$0xf] (%p1094_p5)  ;;  %v186_v1 = vld [vmem:[%s168_s10 + $0x8] sm:$0xf] (%p1094_p5) }
  0x2c   : > { %185 = vst [vmem:[%s163_s11] sm:$0xf] (%p1094_p5), %v184_v0  ;;  %187 = vst [vmem:[%s163_s11 + $0x4] sm:$0xf] (%p1094_p5), %v186_v1 }
  0x2d PF: > { %214 = sbr.rel (!%p1100_p8) target bundleno = 62 (0x3e), region = 61  ;;  %s216_s5 = sand.u32 (%p1100_p8), 1, %s949_s15  }
  0x2e   : > { %s765_s25 = smul.u32 (%p1100_p8), 96, %s973_s21  ;;  %s700_s26 = sshll.u32 (%p1100_p8), %s216_s5, 6 }
  0x2f   : > { %s218_s8 = scalar_lea.vmem (%p1100_p8), [#allocation4], %s700_s26 }
  0x30   : > { %s221_s29 = sadd.s32 (%p1100_p8), %s977_s22, %s765_s25 }
  0x31   : > { %s703_s28 = sshll.u32 (%p1100_p8), %s221_s29, 2 }
  0x32   : > { %s1143_s30 = scalar_lea.vmem (%p1100_p8), %s1254_s1, %s703_s28 }
  0x33   : > { %v239_v2 = vld [vmem:[%s1143_s30] sm:$0xf] (%p1100_p8)  ;;  %v241_v3 = vld [vmem:[%s1143_s30 + $0x18] sm:$0xf] (%p1100_p8)  ;;  %v243_v4 = vld [vmem:[%s1143_s30 + $0x30] sm:$0xf] (%p1100_p8) }
  0x34   : > { %240 = vst [vmem:[%s218_s8] sm:$0xf] %v239_v2  ;;  %242 = vst [vmem:[%s218_s8 + $0x4] sm:$0xf] %v241_v3  ;;  %v245_v5 = vld [vmem:[%s1143_s30 + $0x48] sm:$0xf] }
  0x35   : > { %244 = vst [vmem:[%s218_s8 + $0x8] sm:$0xf] %v243_v4  ;;  %v247_v6 = vld [vmem:[%s1143_s30 + $0x60] sm:$0xf]  ;;  %v249_v7 = vld [vmem:[%s1143_s30 + $0x78] sm:$0xf] }
  0x36   : > { %246 = vst [vmem:[%s218_s8 + $0xc] sm:$0xf] %v245_v5  ;;  %248 = vst [vmem:[%s218_s8 + $0x10] sm:$0xf] %v247_v6  ;;  %v251_v8 = vld [vmem:[%s1143_s30 + $0x90] sm:$0xf] }
  0x37   : > { %250 = vst [vmem:[%s218_s8 + $0x14] sm:$0xf] %v249_v7  ;;  %v253_v9 = vld [vmem:[%s1143_s30 + $0xa8] sm:$0xf]  ;;  %v255_v10 = vld [vmem:[%s1143_s30 + $0xc0] sm:$0xf] }
  0x38   : > { %252 = vst [vmem:[%s218_s8 + $0x18] sm:$0xf] %v251_v8  ;;  %254 = vst [vmem:[%s218_s8 + $0x1c] sm:$0xf] %v253_v9  ;;  %v257_v11 = vld [vmem:[%s1143_s30 + $0xd8] sm:$0xf] }
  0x39   : > { %256 = vst [vmem:[%s218_s8 + $0x20] sm:$0xf] %v255_v10  ;;  %v259_v12 = vld [vmem:[%s1143_s30 + $0xf0] sm:$0xf]  ;;  %v261_v13 = vld [vmem:[%s1143_s30 + $0x108] sm:$0xf] }
  0x3a   : > { %258 = vst [vmem:[%s218_s8 + $0x24] sm:$0xf] %v257_v11  ;;  %260 = vst [vmem:[%s218_s8 + $0x28] sm:$0xf] %v259_v12  ;;  %v263_v14 = vld [vmem:[%s1143_s30 + $0x120] sm:$0xf] }
  0x3b   : > { %262 = vst [vmem:[%s218_s8 + $0x2c] sm:$0xf] %v261_v13  ;;  %v265_v15 = vld [vmem:[%s1143_s30 + $0x138] sm:$0xf]  ;;  %v267_v16 = vld [vmem:[%s1143_s30 + $0x150] sm:$0xf] }
  0x3c   : > { %264 = vst [vmem:[%s218_s8 + $0x30] sm:$0xf] %v263_v14  ;;  %266 = vst [vmem:[%s218_s8 + $0x34] sm:$0xf] %v265_v15  ;;  %v269_v17 = vld [vmem:[%s1143_s30 + $0x168] sm:$0xf] }
  0x3d   : > { %268 = vst [vmem:[%s218_s8 + $0x38] sm:$0xf] %v267_v16  ;;  %270 = vst [vmem:[%s218_s8 + $0x3c] sm:$0xf] %v269_v17 }
  0x3e PF: > { %p704_p1 = scmp.ge.s32.totalorder %s985_s24, 1  ;;  %p330_p2 = scmp.lt.s32.totalorder %s985_s24, 25 }
  0x40   : > { %p331_p3 = pnand %p704_p1, %p330_p2 }
  0x41   : > { %s337_s23 = sand.u32 (!%p331_p3), 1, %s953_s16   ;;  %s344_s28 = sand.u32 (!%p331_p3), 1, %s945_s14  }
  0x42   : > { %334 = sbr.rel (%p331_p3) target bundleno = 355 (0x163), region = 106  ;;  %s1165_s27 = sshll.u32 (!%p331_p3), %s337_s23, 3 }
  0x43   : > { %s706_s6 = sshll.u32 (!%p331_p3), %s344_s28, 6  ;;  %s370_s10 = sand.u32 (!%p331_p3), 1, %s937_s12  }
  0x44   : > { %p375_p4 = scmp.lt.s32.totalorder (!%p331_p3), %s965_s19, 5  ;;  %s707_s11 = sshll.u32 (!%p331_p3), %s370_s10, 3 }
  0x45   : > { %s339_s4 = scalar_lea.vmem (!%p331_p3), [#allocation3], %s1165_s27  ;;  %s1177_s30 = scalar_lea.vmem (!%p331_p3), [#allocation4], %s706_s6 }
  0x46   : > { %s1179_s8 = scalar_lea.vmem (!%p331_p3), [#allocation5], %s707_s11  ;;  %p708_p5 = scmp.ne.s32.totalorder (!%p331_p3), %s961_s18, 0 }
  0x49   : > { %s1170_s5 = scalar_select %p375_p4, %s965_s19, 5 }
  0x4a   : > { %383 = sbr.rel (%p708_p5) target bundleno = 81 (0x51), region = 118  ;;  %v987_v18 = vmov (!%p708_p5), 0.0  }
  0x4b   : > { %s377_s29 = scalar_lea.vmem %s1255_s2, %s1170_s5  ;;  %384 = vst [vmem:[#allocation2] sm:$0xff] (!%p708_p5), %v987_v18  ;;  %385 = vst [vmem:[#allocation2 + $0x8] sm:$0xff] (!%p708_p5), %v987_v18 }
  0x51 PF: > { %v874_v19 = vld [vmem:[%s1177_s30] sm:$0xff]   ;;  %v988_v20 = vmov 0.0   ;;  %v875_v21 = vld [vmem:[%s1177_s30 + $0x8] sm:$0xff]   ;;  %vm989_vm0 = vmmov 0   ;;  %v876_v22 = vld [vmem:[%s1177_s30 + $0x10] sm:$0xff]   ;;  %p718_p6 = scmp.ne.s32.totalorder %s961_s18, 1 }
  0x52   : > { %745 = vmatprep.subr.bf16.mxu0 %v988_v20  ;;  %761 = vmatprep.mubr.msk.bf16.mxu0 %vm989_vm0, %v988_v20  ;;  %v877_v23 = vld [vmem:[%s1177_s30 + $0x18] sm:$0xff]   ;;  %v878_v24 = vld [vmem:[%s1177_s30 + $0x20] sm:$0xff]   ;;  %v879_v25 = vld [vmem:[%s1177_s30 + $0x28] sm:$0xff]  }
  0x53   : > { %746 = vmatpush3.bf16.msra.mxu0 %v874_v19  ;;  %v880_v26 = vld [vmem:[%s1177_s30 + $0x30] sm:$0xff]   ;;  %v881_v27 = vld [vmem:[%s1177_s30 + $0x38] sm:$0xff]   ;;  %v386_v29 = vld [vmem:[#allocation2] sm:$0xff] }
  0x54   : > { %747 = vmatprep.subr.bf16.mxu0 %v988_v20  ;;  %v882_v28 = vld [vmem:[%s339_s4] sm:$0xff]   ;;  %v387_v31 = vld [vmem:[#allocation2 + $0x8] sm:$0xff]  ;;  %v719_v39 = vld [vmem:[%s377_s29] ss:$0 sm:$0xff] (!%p718_p6) }
  0x57   : > { %748 = vmatpush3.bf16.msra.mxu0 %v875_v21 }
  0x58   : > { %749 = vmatprep.subr.bf16.mxu0 %v988_v20 }
  0x5b   : > { %750 = vmatpush3.bf16.msra.mxu0 %v876_v22 }
  0x5c   : > { %751 = vmatprep.subr.bf16.mxu0 %v988_v20 }
  0x5f   : > { %752 = vmatpush3.bf16.msra.mxu0 %v877_v23 }
  0x60   : > { %753 = vmatprep.subr.bf16.mxu0 %v988_v20 }
  0x63   : > { %754 = vmatpush3.bf16.msra.mxu0 %v878_v24 }
  0x64   : > { %755 = vmatprep.subr.bf16.mxu0 %v988_v20 }
  0x67   : > { %756 = vmatpush3.bf16.msra.mxu0 %v879_v25 }
  0x68   : > { %757 = vmatprep.subr.bf16.mxu0 %v988_v20 }
  0x6b   : > { %758 = vmatpush3.bf16.msra.mxu0 %v880_v26 }
  0x6c   : > { %759 = vmatprep.subr.bf16.mxu0 %v988_v20 }
  0x6f   : > { %760 = vmatpush3.bf16.msra.mxu0 %v881_v27 }
  0x72   : > { %762 = vmatmul.mubr.bf16.vlgmr.msra.gmra.mrb[0].mxu0 %v882_v28 }
 0x144   : > { %508 = sbr.rel (%p718_p6) target bundleno = 343 (0x157), region = 122 }
 0x145   : > { %v494_v30 = vpop.f32.mrb[0].mxu0 }
 0x146   : > { %v501_v32 = vadd.f32 %v494_v30, %v386_v29  ;;  %v763_v33 = vpop.f32.mrb[1].mxu0 }
 0x147   : > { %v497_v34 = vpop.f32.mrb[2].mxu0 }
 0x148   : > { %503 = vst [vmem:[#allocation2] sm:$0xff] %v501_v32  ;;  %v502_v35 = vadd.f32 %v497_v34, %v387_v31  ;;  %v764_v36 = vpop.f32.mrb[3].mxu0 }
 0x14a   : > { %504 = vst [vmem:[#allocation2 + $0x8] sm:$0xff] %v502_v35 }
 0x14f   : > { %v509_v37 = vld [vmem:[#allocation2] sm:$0xff] }
 0x150   : > { %v518_v40 = vadd.f32 %v719_v39, %v509_v37 }
 0x151   : > { %v510_v38 = vld [vmem:[#allocation2 + $0x8] sm:$0xff] }
 0x152   : > { %v519_v41 = vadd.f32 %v719_v39, %v510_v38 }
 0x154   : > { %v734_v42 = vpack.c.bf16 %v519_v41, %v518_v40 }
 0x156   : > { %735 = vst [vmem:[%s1179_s8] sm:$0xff] %v734_v42  }
 0x157 PF: > { %536 = sbr.rel (!%p1122_p13) target bundleno = 355 (0x163), region = 126  ;;  %s1271_s16 = sld [smem:[#allocation6_spill]] (%p1122_p13) }
 0x158   : > { %s1272_s10 = sld [smem:[#allocation11_spill]] (%p1122_p13) }
 0x15d   : > { %s766_s18 = smul.u32 (%p1122_p13), 12, %s1271_s16  ;;  %v557_v43 = vld [vmem:[%s1179_s8] sm:$0xf] (%p1122_p13)  ;;  %v559_v44 = vld [vmem:[%s1179_s8 + $0x4] sm:$0xf] (%p1122_p13) }
 0x15f   : > { %s539_s23 = sadd.s32 %s965_s19, %s766_s18 }
 0x160   : > { %s725_s28 = sshll.u32 %s539_s23, 2 }
 0x161   : > { %s541_s11 = scalar_lea.vmem %s1272_s10, %s725_s28 }
 0x162   : > { %558 = vst [vmem:[%s541_s11] sm:$0xf] %v557_v43  ;;  %560 = vst [vmem:[%s541_s11 + $0x18] sm:$0xf] %v559_v44 }
 0x163 PF: > { %s13_s24 = sadd.s32 1, %s985_s24   ;;  %s1274_s5 = sld [smem:[#allocation7_spill]] }
 0x164   : > { %p1209_p7 = scmp.ge.s32.totalorder %s13_s24, 26   ;;  %s1275_s25 = sld [smem:[#allocation8_spill]] }
 0x165   : > { %s1276_s26 = sld [smem:[#allocation9_spill]]  ;;  %s1277_s23 = sld [smem:[#allocation10_spill]] }
 0x166   : > { %s1279_s12 = smov %s941_s13  ;;  %s1280_s13 = smov %s1120_s7 }
 0x167   : > { %s1281_s14 = smov %s949_s15  ;;  %s1282_s15 = smov %s1107_s9 }
 0x168   : > { %s1283_s16 = smov %s957_s17  ;;  %s1284_s17 = smov %s1117_s3 }
 0x169   : > { %s1285_s18 = smov %s973_s21  ;;  %s1286_s19 = smov %s977_s22 }
 0x16a   : > { %s1287_s20 = smov %s1274_s5  ;;  %s1288_s21 = smov %s1275_s25 }
 0x16b   : > { %s1289_s22 = smov %s1276_s26  ;;  %12 = sbr.rel (!%p1209_p7) target bundleno = 9 (0x9), region = 209 }

// kernel: _lambda_.13
= control target key start
LH: loop header
LB: loop body
LE: loop exit
PB: predicated region body
PF: predicated region fallthrough
CT: control target
= control target key end

     0   :  { %s1333_s15 = smov 0   ;;  %s1335_s16 = smov 0   ;;  %s1461_s0 = inlined_call_operand.vmem [shape: bf16[2,4,16,64], index: 0, kind: input, shape index: {}]   ;;  %s1462_s1 = inlined_call_operand.vmem [shape: bf16[2,4,16,64], index: 1, kind: input, shape index: {}]   ;;  %s1463_s2 = inlined_call_operand.vmem [shape: bf16[2,4,16,64], index: 2, kind: input, shape index: {}]   ;;  %s1464_s3 = inlined_call_operand.vmem [shape: f32[2,1,1,16], index: 3, kind: input, shape index: {}]   ;;  %s1465_s4 = inlined_call_operand.vmem [shape: bf16[2,4,16,64], index: 4, kind: output, shape index: {}]  }
   0x1   :  { %s1337_s17 = smov 0  }
   0x2 LB: > { %s26_s18 = sadd.s32 1, %s1300_s16  ;;  %p1096_p0 = scmp.ge.s32.totalorder %s1304_s17, 1  ;;  %s1304_s17 = sphi %s1337_s17, %s14_s17   ;;  %s1300_s16 = sphi %s1335_s16, %s1467_s16   ;;  %s1296_s15 = sphi %s1333_s15, %s1466_s15  }
   0x3   : > { %p28_p1 = scmp.ge.s32.totalorder %s26_s18, 2  ;;  %p228_p2 = scmp.lt.s32.totalorder %s1304_s17, 3 }
   0x5   : > { %s1469_s18 = smov (%p28_p1, %s26_s18), 0  ;;  %p229_p3 = pnand %p1096_p0, %p228_p2 }
   0x6   : > { %p288_p4 = scmp.lt.s32.totalorder (!%p229_p3), %s1296_s15, 1  ;;  %v1306_v0 = vmov (!%p229_p3), 0.0   ;;  %vm1307_vm0 = vmmov (!%p229_p3), 0   ;;  %vm370_vm1 = vcmask (!%p229_p3), 523264   ;;  %vm611_vm2 = vcmask (!%p229_p3), 130048  }
   0x7   : > { %232 = sbr.rel (%p229_p3) target bundleno = 791 (0x317), region = 36  ;;  %1164 = vmatprep.subr.bf16.mxu0 (!%p229_p3), %v1306_v0  ;;  %1170 = vmatprep.subr.bf16.mxu1 (!%p229_p3), %v1306_v0  ;;  %vm936_vm3 = vcmask (!%p229_p3), 519168  }
   0x8   : > { %1166 = vmatprep.mubr.msk.bf16.mxu0 (!%p229_p3), %vm1307_vm0, %v1306_v0  ;;  %1172 = vmatprep.mubr.msk.bf16.mxu1 (!%p229_p3), %vm1307_vm0, %v1306_v0 }
   0xe   : > { %s1471_s15 = smov (!%p288_p4, %s1296_s15), 1 }
   0xf   : > { %s1360_s19 = sshll.u32 %s1471_s15, 5  ;;  %s322_s28 = scalar_lea.vmem %s1464_s3, %s1471_s15 }
  0x10   : > { %s307_s22 = scalar_lea.vmem %s1462_s1, %s1360_s19  ;;  %s296_s25 = scalar_lea.vmem %s1461_s0, %s1360_s19  ;;  %v1117_v14 = vld [vmem:[%s322_s28] ss:$0 sm:$0xff] }
  0x11   : > { %v1238_v1 = vld [vmem:[%s307_s22] sm:$0xff]   ;;  %v1239_v2 = vld [vmem:[%s307_s22 + $0x8] sm:$0xff]   ;;  %v1242_v5 = vld [vmem:[%s307_s22 + $0x10] sm:$0xff]   ;;  %s1414_s5 = scalar_lea.vmem %s1463_s2, %s1360_s19  ;;  %s1434_s8 = scalar_lea.vmem %s1465_s4, %s1360_s19 }
  0x12   : > { %v375_v3 = vsel %vm370_vm1, %v1238_v1, 0  ;;  %v432_v4 = vsel %vm370_vm1, %v1239_v2, 0  ;;  %v1243_v6 = vld [vmem:[%s307_s22 + $0x18] sm:$0xff]   ;;  %v1240_v7 = vld [vmem:[%s296_s25] sm:$0xff]   ;;  %v1241_v8 = vld [vmem:[%s296_s25 + $0x8] sm:$0xff]   ;;  %v489_v9 = vsel %vm370_vm1, %v1242_v5, 0 }
  0x13   : > { %1165 = vmatpush3.bf16.xpose.msra.mxu0 %v375_v3  ;;  %1171 = vmatpush3.bf16.xpose.msra.mxu1 %v432_v4  ;;  %v546_v10 = vsel %vm370_vm1, %v1243_v6, 0  ;;  %v1244_v11 = vld [vmem:[%s296_s25 + $0x10] sm:$0xff]   ;;  %v1245_v12 = vld [vmem:[%s296_s25 + $0x18] sm:$0xff]  }
  0x14   : > { %1176 = vmatprep.subr.bf16.mxu0 %v1306_v0  ;;  %1182 = vmatprep.subr.bf16.mxu1 %v1306_v0 }
  0x1a   : > { %1167 = vmatmul.mubr.msk.bf16.vlgmr.msra.gmra.mrb[0].mxu0 %vm370_vm1, %v1240_v7  ;;  %1173 = vmatmul.mubr.msk.bf16.vlgmr.msra.gmra.mrb[0].mxu1 %vm370_vm1, %v1241_v8 }
  0x1b   : > { %1177 = vmatpush3.bf16.xpose.msra.mxu0 %v489_v9  ;;  %1183 = vmatpush3.bf16.xpose.msra.mxu1 %v546_v10 }
  0x1c   : > { %1178 = vmatprep.mubr.msk.bf16.mxu0 %vm1307_vm0, %v1306_v0  ;;  %1184 = vmatprep.mubr.msk.bf16.mxu1 %vm1307_vm0, %v1306_v0 }
  0x1d   : > { %1188 = vmatprep.subr.bf16.mxu0 %v1306_v0  ;;  %1194 = vmatprep.subr.bf16.mxu1 %v1306_v0 }
  0x22   : > { %1179 = vmatmul.mubr.msk.bf16.vlgmr.msra.gmra.mrb[4].mxu0 %vm370_vm1, %v1244_v11  ;;  %1185 = vmatmul.mubr.msk.bf16.vlgmr.msra.gmra.mrb[4].mxu1 %vm370_vm1, %v1245_v12 }
  0x23   : > { %1190 = vmatprep.mubr.msk.bf16.mxu0 %vm1307_vm0, %v1306_v0  ;;  %1196 = vmatprep.mubr.msk.bf16.mxu1 %vm1307_vm0, %v1306_v0 }
  0xed   : > { %v411_v13 = vpop.f32.mrb[0].mxu0  ;;  %v468_v16 = vpop.f32.mrb[0].mxu1 }
  0xee   : > { %v589_v15 = vmul.f32 0.125, %v411_v13  ;;  %v1168_v17 = vpop.f32.mrb[1].mxu0  ;;  %v591_v18 = vmul.f32 0.125, %v468_v16  ;;  %v1174_v20 = vpop.f32.mrb[1].mxu1 }
  0xef   : > { %v414_v19 = vpop.f32.mrb[2].mxu0  ;;  %v471_v23 = vpop.f32.mrb[2].mxu1 }
  0xf0   : > { %v590_v21 = vmul.f32 0.125, %v414_v19  ;;  %v1169_v22 = vpop.f32.mrb[3].mxu0  ;;  %v603_v24 = vadd.f32 %v1117_v14, %v589_v15  ;;  %v592_v25 = vmul.f32 0.125, %v471_v23  ;;  %v1175_v26 = vpop.f32.mrb[3].mxu1  ;;  %v605_v27 = vadd.f32 %v1117_v14, %v591_v18 }
  0xf2   : > { %v612_v28 = vsel %vm611_vm2, %v603_v24, -inf  ;;  %v604_v29 = vadd.f32 %v1117_v14, %v590_v21  ;;  %v618_v30 = vsel %vm611_vm2, %v605_v27, -inf  ;;  %v606_v31 = vadd.f32 %v1117_v14, %v592_v25 }
  0xf3   : > { %613 = vmax.xlane.f32.xlu0 %v612_v28  ;;  %619 = vmax.xlane.f32.xlu1 %v618_v30 }
  0xf4   : > { %v621_v33 = vsel %vm611_vm2, %v606_v31, -inf  ;;  %v615_v36 = vsel %vm611_vm2, %v604_v29, -inf }
  0xf5   : > { %v525_v32 = vpop.f32.mrb[4].mxu0  ;;  %v582_v37 = vpop.f32.mrb[4].mxu1 }
  0xf6   : > { %v593_v34 = vmul.f32 0.125, %v525_v32  ;;  %v1180_v35 = vpop.f32.mrb[5].mxu0  ;;  %v595_v39 = vmul.f32 0.125, %v582_v37  ;;  %v1186_v40 = vpop.f32.mrb[5].mxu1  ;;  %v1247_v32 = vld [vmem:[%s1414_s5 + $0x8] sm:$0xff]  }
  0xf7   : > { %616 = vmax.xlane.f32.xlu0 %v615_v36  ;;  %v528_v38 = vpop.f32.mrb[6].mxu0  ;;  %622 = vmax.xlane.f32.xlu1 %v621_v33  ;;  %v585_v43 = vpop.f32.mrb[6].mxu1 }
  0xf8   : > { %v594_v41 = vmul.f32 0.125, %v528_v38  ;;  %v1181_v42 = vpop.f32.mrb[7].mxu0  ;;  %v607_v44 = vadd.f32 %v1117_v14, %v593_v34  ;;  %v596_v45 = vmul.f32 0.125, %v585_v43  ;;  %v1187_v46 = vpop.f32.mrb[7].mxu1  ;;  %v609_v47 = vadd.f32 %v1117_v14, %v595_v39  ;;  %1195 = vmatpush3.bf16.msra.mxu1 %v1247_v32 }
  0xf9   : > { %1206 = vmatprep.subr.bf16.mxu1 %v1306_v0  ;;  %v1248_v46 = vld [vmem:[%s1414_s5 + $0x10] sm:$0xff]  }
  0xfa   : > { %v624_v48 = vsel %vm611_vm2, %v607_v44, -inf  ;;  %v608_v49 = vadd.f32 %v1117_v14, %v594_v41  ;;  %v610_v50 = vadd.f32 %v1117_v14, %v596_v45  ;;  %v630_v52 = vsel %vm611_vm2, %v609_v47, -inf }
  0xfb   : > { %625 = vmax.xlane.f32.xlu0 %v624_v48 }
  0xfc   : > { %v627_v51 = vsel %vm611_vm2, %v608_v49, -inf  ;;  %v633_v53 = vsel %vm611_vm2, %v610_v50, -inf }
  0xfd   : > { %628 = vmax.xlane.f32.xlu1 %v627_v51 }
  0xff   : > { %631 = vmax.xlane.f32.xlu0 %v630_v52  ;;  %v1249_v52 = vld [vmem:[%s1414_s5 + $0x18] sm:$0xff]  }
 0x101   : > { %634 = vmax.xlane.f32.xlu1 %v633_v53 }
 0x180   : > { %v614_v54 = vpop.xlane.xlu0 %613  ;;  %v620_v55 = vpop.xlane.xlu1 %619 }
 0x181   : > { %v636_v56 = vsub.f32 %v603_v24, %v614_v54  ;;  %v638_v57 = vsub.f32 %v605_v27, %v620_v55 }
 0x183   : > { %v644_v58 = vmul.f32 1.442695, %v636_v56  ;;  %v648_v59 = vmul.f32 1.442695, %v638_v57 }
 0x184   : > { %v617_v60 = vpop.xlane.xlu0 %616  ;;  %v623_v61 = vpop.xlane.xlu1 %622 }
 0x185   : > { %1250 = vpow2.f32 %v644_v58  ;;  %v637_v62 = vsub.f32 %v604_v29, %v617_v60  ;;  %v639_v63 = vsub.f32 %v606_v31, %v623_v61  ;;  %v1246_v31 = vld [vmem:[%s1414_s5] sm:$0xff]  }
 0x186   : > { %1252 = vpow2.f32 %v648_v59  ;;  %1189 = vmatpush3.bf16.msra.mxu0 %v1246_v31 }
 0x187   : > { %v646_v1 = vmul.f32 1.442695, %v637_v62  ;;  %v650_v2 = vmul.f32 1.442695, %v639_v63  ;;  %1200 = vmatprep.subr.bf16.mxu0 %v1306_v0 }
 0x188   : > { %v626_v3 = vpop.xlane.xlu0 %625 }
 0x189   : > { %1254 = vpow2.f32 %v646_v1  ;;  %v640_v4 = vsub.f32 %v607_v44, %v626_v3 }
 0x18a   : > { %v629_v5 = vpop.xlane.xlu1 %628  ;;  %1256 = vpow2.f32 %v650_v2 }
 0x18b   : > { %v652_v6 = vmul.f32 1.442695, %v640_v4  ;;  %v641_v7 = vsub.f32 %v608_v49, %v629_v5 }
 0x18c   : > { %v632_v8 = vpop.xlane.xlu0 %631 }
 0x18d   : > { %1258 = vpow2.f32 %v652_v6  ;;  %v654_v9 = vmul.f32 1.442695, %v641_v7  ;;  %v642_v10 = vsub.f32 %v609_v47, %v632_v8 }
 0x18e   : > { %v635_v11 = vpop.xlane.xlu1 %634 }
 0x18f   : > { %v1251_v12 = vpop.eup %1250  ;;  %1260 = vpow2.f32 %v654_v9  ;;  %v656_v13 = vmul.f32 1.442695, %v642_v10  ;;  %v643_v14 = vsub.f32 %v610_v50, %v635_v11 }
 0x190   : > { %v660_v15 = vsel %vm611_vm2, %v1251_v12, 0.0  ;;  %v1253_v16 = vpop.eup %1252 }
 0x191   : > { %1262 = vpow2.f32 %v656_v13  ;;  %v658_v17 = vmul.f32 1.442695, %v643_v14  ;;  %661 = vadd.xlane.f32.xlu0 %v660_v15  ;;  %v666_v19 = vsel %vm611_vm2, %v1253_v16, 0.0 }
 0x193   : > { %v1255_v18 = vpop.eup %1254  ;;  %1264 = vpow2.f32 %v658_v17 }
 0x194   : > { %v663_v20 = vsel %vm611_vm2, %v1255_v18, 0.0  ;;  %v1257_v21 = vpop.eup %1256 }
 0x195   : > { %667 = vadd.xlane.f32.xlu0 %v666_v19  ;;  %664 = vadd.xlane.f32.xlu1 %v663_v20  ;;  %v669_v24 = vsel %vm611_vm2, %v1257_v21, 0.0 }
 0x197   : > { %v1259_v22 = vpop.eup %1258 }
 0x198   : > { %v672_v23 = vsel %vm611_vm2, %v1259_v22, 0.0 }
 0x199   : > { %v1261_v25 = vpop.eup %1260  ;;  %673 = vadd.xlane.f32.xlu0 %v672_v23  ;;  %670 = vadd.xlane.f32.xlu1 %v669_v24 }
 0x19a   : > { %v675_v28 = vsel %vm611_vm2, %v1261_v25, 0.0 }
 0x19b   : > { %v1263_v26 = vpop.eup %1262 }
 0x19c   : > { %v678_v27 = vsel %vm611_vm2, %v1263_v26, 0.0 }
 0x19d   : > { %v1265_v29 = vpop.eup %1264  ;;  %679 = vadd.xlane.f32.xlu0 %v678_v27  ;;  %676 = vadd.xlane.f32.xlu1 %v675_v28 }
 0x19e   : > { %v681_v30 = vsel %vm611_vm2, %v1265_v29, 0.0 }
 0x1a1   : > { %682 = vadd.xlane.f32.xlu1 %v681_v30 }
 0x21e   : > { %v662_v33 = vpop.xlane.xlu0 %661 }
 0x21f   : > { %1266 = vrcp.f32 %v662_v33 }
 0x222   : > { %v668_v34 = vpop.xlane.xlu0 %667  ;;  %v665_v35 = vpop.xlane.xlu1 %664 }
 0x223   : > { %1268 = vrcp.f32 %v665_v35 }
 0x224   : > { %1270 = vrcp.f32 %v668_v34 }
 0x226   : > { %v674_v36 = vpop.xlane.xlu0 %673  ;;  %v671_v37 = vpop.xlane.xlu1 %670 }
 0x227   : > { %1272 = vrcp.f32 %v671_v37 }
 0x228   : > { %1274 = vrcp.f32 %v674_v36 }
 0x229   : > { %v1267_v40 = vpop.eup %1266 }
 0x22a   : > { %v680_v38 = vpop.xlane.xlu0 %679  ;;  %v677_v39 = vpop.xlane.xlu1 %676  ;;  %v692_v43 = vmul.f32 %v1267_v40, %v1251_v12 }
 0x22b   : > { %1276 = vrcp.f32 %v677_v39 }
 0x22c   : > { %1278 = vrcp.f32 %v680_v38 }
 0x22d   : > { %v1269_v41 = vpop.eup %1268 }
 0x22e   : > { %v683_v42 = vpop.xlane.xlu1 %682  ;;  %v693_v44 = vmul.f32 %v1269_v41, %v1255_v18  ;;  %v1271_v45 = vpop.eup %1270 }
 0x22f   : > { %1280 = vrcp.f32 %v683_v42  ;;  %v694_v49 = vmul.f32 %v1271_v45, %v1253_v16 }
 0x230   : > { %v700_v47 = vpack.c.bf16 %v693_v44, %v692_v43 }
 0x231   : > { %v1273_v48 = vpop.eup %1272 }
 0x232   : > { %v695_v50 = vmul.f32 %v1273_v48, %v1257_v21  ;;  %1191 = vmatmul.mubr.msk.bf16.vlgmr.msra.gmra.mrb[8].mxu0 %vm611_vm2, %v700_v47  ;;  %v1275_v51 = vpop.eup %1274 }
 0x233   : > { %1201 = vmatpush3.bf16.msra.mxu0 %v1248_v46  ;;  %1202 = vmatprep.mubr.msk.bf16.mxu0 %vm1307_vm0, %v1306_v0  ;;  %v696_v56 = vmul.f32 %v1275_v51, %v1259_v22 }
 0x234   : > { %v701_v53 = vpack.c.bf16 %v695_v50, %v694_v49 }
 0x235   : > { %v1277_v54 = vpop.eup %1276 }
 0x236   : > { %v1279_v55 = vpop.eup %1278  ;;  %v697_v57 = vmul.f32 %v1277_v54, %v1261_v25  ;;  %1197 = vmatmul.mubr.msk.bf16.vlgmr.msra.gmra.mrb[8].mxu1 %vm611_vm2, %v701_v53 }
 0x237   : > { %1207 = vmatpush3.bf16.msra.mxu1 %v1249_v52  ;;  %1208 = vmatprep.mubr.msk.bf16.mxu1 %vm1307_vm0, %v1306_v0  ;;  %v698_v60 = vmul.f32 %v1279_v55, %v1263_v26 }
 0x238   : > { %v702_v59 = vpack.c.bf16 %v697_v57, %v696_v56 }
 0x239   : > { %v1281_v58 = vpop.eup %1280 }
 0x23a   : > { %v699_v61 = vmul.f32 %v1281_v58, %v1265_v29  ;;  %1203 = vmatmul.mubr.msk.bf16.vlgmr.msra.gmra.mrb[12].mxu0 %vm611_vm2, %v702_v59 }
 0x23c   : > { %v703_v62 = vpack.c.bf16 %v699_v61, %v698_v60 }
 0x23e   : > { %1209 = vmatmul.mubr.msk.bf16.vlgmr.msra.gmra.mrb[12].mxu1 %vm611_vm2, %v703_v62 }
 0x305   : > { %v747_v63 = vpop.f32.mrb[8].mxu0 }
 0x306   : > { %v1140_v0 = vpack.c.bf16 %v747_v63, %v747_v63  ;;  %v1192_v1 = vpop.f32.mrb[9].mxu0 }
 0x307   : > { %v750_v2 = vpop.f32.mrb[10].mxu0 }
 0x308   : > { %937 = vst.msk [vmem:[%s1434_s8] sm:$0xf] %vm936_vm3, %v1140_v0  ;;  %v1141_v3 = vpack.c.bf16 %v750_v2, %v750_v2  ;;  %v1193_v4 = vpop.f32.mrb[11].mxu0 }
 0x309   : > { %v797_v5 = vpop.f32.mrb[8].mxu1 }
 0x30a   : > { %938 = vst.msk [vmem:[%s1434_s8 + $0x4] sm:$0xf] %vm936_vm3, %v1141_v3  ;;  %v1142_v6 = vpack.c.bf16 %v797_v5, %v797_v5  ;;  %v1198_v7 = vpop.f32.mrb[9].mxu1 }
 0x30b   : > { %v800_v8 = vpop.f32.mrb[10].mxu1 }
 0x30c   : > { %939 = vst.msk [vmem:[%s1434_s8 + $0x8] sm:$0xf] %vm936_vm3, %v1142_v6  ;;  %v1143_v9 = vpack.c.bf16 %v800_v8, %v800_v8  ;;  %v1199_v10 = vpop.f32.mrb[11].mxu1 }
 0x30d   : > { %v847_v11 = vpop.f32.mrb[12].mxu0 }
 0x30e   : > { %940 = vst.msk [vmem:[%s1434_s8 + $0xc] sm:$0xf] %vm936_vm3, %v1143_v9  ;;  %v1144_v12 = vpack.c.bf16 %v847_v11, %v847_v11  ;;  %v1204_v13 = vpop.f32.mrb[13].mxu0 }
 0x30f   : > { %v850_v14 = vpop.f32.mrb[14].mxu0 }
 0x310   : > { %941 = vst.msk [vmem:[%s1434_s8 + $0x10] sm:$0xf] %vm936_vm3, %v1144_v12  ;;  %v1145_v15 = vpack.c.bf16 %v850_v14, %v850_v14  ;;  %v1205_v16 = vpop.f32.mrb[15].mxu0 }
 0x311   : > { %v897_v17 = vpop.f32.mrb[12].mxu1 }
 0x312   : > { %942 = vst.msk [vmem:[%s1434_s8 + $0x14] sm:$0xf] %vm936_vm3, %v1145_v15  ;;  %v1146_v18 = vpack.c.bf16 %v897_v17, %v897_v17  ;;  %v1210_v19 = vpop.f32.mrb[13].mxu1 }
 0x313   : > { %v900_v20 = vpop.f32.mrb[14].mxu1 }
 0x314   : > { %943 = vst.msk [vmem:[%s1434_s8 + $0x18] sm:$0xf] %vm936_vm3, %v1146_v18  ;;  %v1147_v21 = vpack.c.bf16 %v900_v20, %v900_v20  ;;  %v1211_v22 = vpop.f32.mrb[15].mxu1 }
 0x316   : > { %944 = vst.msk [vmem:[%s1434_s8 + $0x1c] sm:$0xf] %vm936_vm3, %v1147_v21 }
 0x317 PF: > { %s14_s17 = sadd.s32 1, %s1304_s17   ;;  %s1466_s15 = smov %s1300_s16 }
 0x318   : > { %p11_p5 = scmp.ge.s32.totalorder %s14_s17, 4   ;;  %s1467_s16 = smov %s1469_s18 }
 0x31a   :  { %13 = sbr.rel (!%p11_p5) target bundleno = 2 (0x2), region = 75 }

// kernel: _lambda_.14
= control target key start
LH: loop header
LB: loop body
LE: loop exit
PB: predicated region body
PF: predicated region fallthrough
CT: control target
= control target key end

     0   :  { %s979_s21 = smov 0   ;;  %s981_s22 = smov 0   ;;  %s1116_s0 = inlined_call_operand.vmem [shape: bf16[32,256], index: 0, kind: input, shape index: {}]   ;;  %s1117_s1 = inlined_call_operand.vmem [shape: bf16[256,256], index: 1, kind: input, shape index: {}]   ;;  %s1118_s2 = inlined_call_operand.vmem [shape: f32[1,256], index: 2, kind: input, shape index: {}]   ;;  %s1119_s3 = inlined_call_operand.vmem [shape: bf16[32,256], index: 3, kind: input, shape index: {}]   ;;  %s1120_s4 = inlined_call_operand.vmem [shape: f32[1,256], index: 4, kind: input, shape index: {}]   ;;  %s1121_s5 = inlined_call_operand.vmem [shape: f32[1,256], index: 5, kind: input, shape index: {}]   ;;  %s1122_s6 = inlined_call_operand.vmem [shape: bf16[32,256], index: 6, kind: output, shape index: {}]  }
   0x1   :  { %s983_s23 = smov 0   ;;  %s985_s24 = smov 0  }
   0x2   :  { %s987_s25 = smov 0   ;;  %s989_s26 = smov 0  }
   0x3   :  { %s991_s27 = smov 0  }
   0x4 LB: > { %s25_s28 = sadd.s32 1, %s932_s25  ;;  %s28_s29 = sadd.s32 1, %s936_s26  ;;  %s940_s27 = sphi %s991_s27, %s16_s27   ;;  %s936_s26 = sphi %s989_s26, %s1128_s26   ;;  %s932_s25 = sphi %s987_s25, %s1127_s25   ;;  %s928_s24 = sphi %s985_s24, %s1126_s24   ;;  %s924_s23 = sphi %s983_s23, %s1125_s23   ;;  %s920_s22 = sphi %s981_s22, %s1124_s22   ;;  %s916_s21 = sphi %s979_s21, %s1123_s21  }
   0x5   : > { %p26_p0 = scmp.ge.s32.totalorder %s25_s28, 2  ;;  %p44_p1 = scmp.ne.s32.totalorder %s920_s22, %s916_s21 }
   0x6   : > { %p45_p2 = scmp.eq.s32.totalorder %s940_s27, 0  ;;  %s37_s9 = sadd.s32 1, %s920_s22 }
   0x7   : > { %s1130_s28 = smov (%p26_p0, %s25_s28), 0  ;;  %s1132_s29 = smov (!%p26_p0, %s28_s29), %s936_s26 }
   0x8   : > { %p46_p3 = por %p45_p2, %p44_p1  ;;  %p30_p4 = scmp.ge.s32.totalorder %s1132_s29, 2 }
   0x9   : > { %s33_s30 = ssub.s32 %s932_s25, %s1130_s28  ;;  %p754_p6 = scmp.ge.s32.totalorder %s940_s27, 4 }
   0xa   : > { %s1134_s29 = smov (%p30_p4, %s1132_s29), 0 }
   0xb   : > { %s32_s7 = ssub.s32 %s936_s26, %s1134_s29  ;;  %220 = sbr.rel (%p754_p6) target bundleno = 25 (0x19), region = 28 }
   0xc   : > { %s34_s8 = sor.u32 %s33_s30, %s32_s7 }
   0xd   : > { %p35_p5 = scmp.eq.s32.totalorder %s34_s8, 0 }
   0xf   : > { %s1030_s10 = scalar_select %p35_p5, %s920_s22, %s37_s9  }
  0x12   : > { %223 = sbr.rel (!%p46_p3) target bundleno = 25 (0x19), region = 32  ;;  %s225_s11 = sand.u32 (%p46_p3), 1, %s920_s22  }
  0x13   : > { %s793_s12 = sshll.u32 (%p46_p3), %s936_s26, 2  ;;  %s755_s13 = sshll.u32 (%p46_p3), %s225_s11, 3 }
  0x14   : > { %s230_s14 = sadd.s32 (%p46_p3), %s932_s25, %s793_s12  ;;  %s227_s19 = scalar_lea.vmem (%p46_p3), [#allocation3], %s755_s13 }
  0x15   : > { %s758_s15 = sshll.u32 (%p46_p3), %s230_s14, 2 }
  0x16   : > { %s232_s18 = scalar_lea.vmem (%p46_p3), %s1116_s0, %s758_s15 }
  0x17   : > { %v248_v0 = vld [vmem:[%s232_s18] sm:$0xf] (%p46_p3)  ;;  %v250_v1 = vld [vmem:[%s232_s18 + $0x8] sm:$0xf] (%p46_p3) }
  0x18   : > { %249 = vst [vmem:[%s227_s19] sm:$0xf] (%p46_p3), %v248_v0  ;;  %251 = vst [vmem:[%s227_s19 + $0x4] sm:$0xf] (%p46_p3), %v250_v1 }
  0x19 PF: > { %p759_p7 = scmp.ge.s32.totalorder %s940_s27, 1  ;;  %p297_p8 = scmp.lt.s32.totalorder %s940_s27, 5 }
  0x1b   : > { %p298_p9 = pnand %p759_p7, %p297_p8 }
  0x1c   : > { %s304_s20 = sand.u32 (!%p298_p9), 1, %s916_s21   ;;  %s761_s30 = sshll.u32 (!%p298_p9), %s924_s23, 4 }
  0x1d   : > { %301 = sbr.rel (%p298_p9) target bundleno = 628 (0x274), region = 81  ;;  %s1043_s7 = sshll.u32 (!%p298_p9), %s304_s20, 3 }
  0x1e   : > { %p348_p10 = scmp.lt.s32.totalorder (!%p298_p9), %s761_s30, 31  ;;  %s764_s8 = sshll.u32 (!%p298_p9), %s928_s24, 1 }
  0x1f   : > { %p355_p11 = scmp.lt.s32.totalorder (!%p298_p9), %s764_s8, 3  ;;  %s306_s24 = scalar_lea.vmem (!%p298_p9), [#allocation3], %s1043_s7 }
  0x20   : > { %p770_p12 = scmp.ne.s32.totalorder (!%p298_p9), %s924_s23, 0 }
  0x24   : > { %s1136_s30 = smov (!%p348_p10, %s761_s30), 31  ;;  %s1138_s8 = smov (!%p355_p11, %s764_s8), 3 }
  0x25   : > { %s794_s9 = sshll.u32 %s1136_s30, 3  ;;  %s795_s14 = sshll.u32 %s1138_s8, 3  ;;  %v942_v2 = vmov (!%p770_p12), 0.0  }
  0x26   : > { %s1049_s13 = scalar_lea.vmem %s1117_s1, %s794_s9  ;;  %s1054_s21 = scalar_lea.vmem %s1119_s3, %s795_s14  ;;  %373 = vst [vmem:[#allocation2] sm:$0xff] (!%p770_p12), %v942_v2  ;;  %374 = vst [vmem:[#allocation2 + $0x8] sm:$0xff] (!%p770_p12), %v942_v2 }
  0x27   : > { %s1059_s19 = scalar_lea.vmem %s1122_s6, %s795_s14  ;;  %372 = sbr.rel (%p770_p12) target bundleno = 46 (0x2e), region = 89  ;;  %375 = vst [vmem:[#allocation2 + $0x10] sm:$0xff] (!%p770_p12), %v942_v2  ;;  %376 = vst [vmem:[#allocation2 + $0x18] sm:$0xff] (!%p770_p12), %v942_v2 }
  0x2e PF: > { %v857_v3 = vld [vmem:[%s1049_s13 + $0x4] ss:$8 sps:$4 sm:$0xff]   ;;  %v859_v4 = vld [vmem:[%s1049_s13] ss:$8 sps:$4 sm:$0xff]   ;;  %v943_v5 = vmov 0   ;;  %v379_v24 = vld [vmem:[#allocation2 + $0x10] sm:$0xff] }
  0x2f   : > { %517 = vmatprep.mubr.bf16.mxu0 %v943_v5  ;;  %485 = vmatprep.subr.bf16.mxu0 %v857_v3  ;;  %v860_v6 = vld [vmem:[%s1049_s13 + $0x14] ss:$8 sps:$4 sm:$0xff]   ;;  %v862_v7 = vld [vmem:[%s1049_s13 + $0x10] ss:$8 sps:$4 sm:$0xff]   ;;  %v863_v8 = vld [vmem:[%s1049_s13 + $0x24] ss:$8 sps:$4 sm:$0xff]  }
  0x30   : > { %486 = vmatpush1.bf16.msra.mxu0 %v859_v4  ;;  %v865_v9 = vld [vmem:[%s1049_s13 + $0x20] ss:$8 sps:$4 sm:$0xff]   ;;  %v866_v10 = vld [vmem:[%s1049_s13 + $0x34] ss:$8 sps:$4 sm:$0xff]   ;;  %v868_v11 = vld [vmem:[%s1049_s13 + $0x30] ss:$8 sps:$4 sm:$0xff]  }
  0x31   : > { %487 = vmatprep.subr.bf16.mxu0 %v860_v6  ;;  %v869_v12 = vld [vmem:[%s1049_s13 + $0x44] ss:$8 sps:$4 sm:$0xff]   ;;  %v871_v13 = vld [vmem:[%s1049_s13 + $0x40] ss:$8 sps:$4 sm:$0xff]   ;;  %v872_v14 = vld [vmem:[%s1049_s13 + $0x54] ss:$8 sps:$4 sm:$0xff]  }
  0x32   : > { %v874_v15 = vld [vmem:[%s1049_s13 + $0x50] ss:$8 sps:$4 sm:$0xff]   ;;  %v875_v16 = vld [vmem:[%s1049_s13 + $0x64] ss:$8 sps:$4 sm:$0xff]   ;;  %v877_v17 = vld [vmem:[%s1049_s13 + $0x60] ss:$8 sps:$4 sm:$0xff]  }
  0x33   : > { %v878_v18 = vld [vmem:[%s1049_s13 + $0x74] ss:$8 sps:$4 sm:$0xff]   ;;  %v880_v19 = vld [vmem:[%s1049_s13 + $0x70] ss:$8 sps:$4 sm:$0xff]   ;;  %v881_v20 = vld [vmem:[%s306_s24] sm:$0xff]   ;;  %p788_p13 = scmp.ne.s32.totalorder %s924_s23, 1 }
  0x34   : > { %488 = vmatpush1.bf16.msra.mxu0 %v862_v7  ;;  %v377_v21 = vld [vmem:[#allocation2] sm:$0xff]  ;;  %v378_v22 = vld [vmem:[#allocation2 + $0x8] sm:$0xff]  ;;  %v380_v27 = vld [vmem:[#allocation2 + $0x18] sm:$0xff]  ;;  %v546_v33 = vlaneseq (!%p788_p13) }
  0x35   : > { %489 = vmatprep.subr.bf16.mxu0 %v863_v8  ;;  %v560_v35 = vld [vmem:[%s1054_s21] sm:$0xff] (!%p788_p13)  ;;  %v561_v37 = vld [vmem:[%s1054_s21 + $0x8] sm:$0xff] (!%p788_p13) }
  0x36   : > { %v547_v34 = vshrl.u32 (!%p788_p13), %v546_v33, 7  ;;  %v544_v36 = vld [vmem:[%s1118_s2] sm:$0x3] (!%p788_p13)  ;;  %v562_v42 = vunpack.c.l.bf16 (!%p788_p13), %v560_v35  ;;  %v563_v43 = vunpack.c.h.bf16 (!%p788_p13), %v560_v35  ;;  %v564_v48 = vunpack.c.l.bf16 (!%p788_p13), %v561_v37 }
  0x37   : > { %v565_v49 = vunpack.c.h.bf16 (!%p788_p13), %v561_v37 }
  0x38   : > { %490 = vmatpush1.bf16.msra.mxu0 %v865_v9  ;;  %v548_v39 = vsub.s32 (!%p788_p13), 0, %v547_v34  ;;  %v552_v40 = vsub.s32 (!%p788_p13), 1, %v547_v34 }
  0x39   : > { %491 = vmatprep.subr.bf16.mxu0 %v866_v10 }
  0x3a   : > { %v549_v46 = vrot.slane (!%p788_p13), %v544_v36, %v548_v39  ;;  %v553_v47 = vrot.slane (!%p788_p13), %v544_v36, %v552_v40 }
  0x3c   : > { %492 = vmatpush1.bf16.msra.mxu0 %v868_v11 }
  0x3d   : > { %493 = vmatprep.subr.bf16.mxu0 %v869_v12 }
  0x40   : > { %494 = vmatpush1.bf16.msra.mxu0 %v871_v13 }
  0x41   : > { %495 = vmatprep.subr.bf16.mxu0 %v872_v14 }
  0x44   : > { %496 = vmatpush1.bf16.msra.mxu0 %v874_v15 }
  0x45   : > { %497 = vmatprep.subr.bf16.mxu0 %v875_v16  ;;  %v603_v16 = vld [vmem:[%s1120_s4] sm:$0x3] (!%p788_p13) }
  0x48   : > { %498 = vmatpush1.bf16.msra.mxu0 %v877_v17  ;;  %v619_v17 = vld [vmem:[%s1121_s5] sm:$0x3] (!%p788_p13) }
  0x49   : > { %499 = vmatprep.subr.bf16.mxu0 %v878_v18  ;;  %v608_v18 = vrot.slane (!%p788_p13), %v603_v16, %v548_v39 }
  0x4c   : > { %500 = vmatpush1.bf16.msra.mxu0 %v880_v19  ;;  %v612_v19 = vrot.slane (!%p788_p13), %v603_v16, %v552_v40 }
  0x4f   : > { %518 = vmatmul.mubr.bf16.vlgmr.msra.gmra.mrb[0].mxu0 %v881_v20 }
 0x122   : > { %v519_v23 = vpop.f32.mrb[0].mxu0  ;;  %539 = sbr.rel (%p788_p13) target bundleno = 628 (0x274), region = 93 }
 0x123   : > { %v528_v25 = vadd.f32 %v519_v23, %v377_v21  ;;  %v521_v26 = vpop.f32.mrb[1].mxu0  ;;  %v624_v21 = vrot.slane (!%p788_p13), %v619_v17, %v548_v39 }
 0x124   : > { %v529_v28 = vadd.f32 %v521_v26, %v378_v22  ;;  %v523_v29 = vpop.f32.mrb[2].mxu0  ;;  %v628_v22 = vrot.slane (!%p788_p13), %v619_v17, %v552_v40 }
 0x125   : > { %532 = vst [vmem:[#allocation2] sm:$0xff] %v528_v25  ;;  %v530_v30 = vadd.f32 %v523_v29, %v379_v24  ;;  %v525_v31 = vpop.f32.mrb[3].mxu0 }
 0x126   : > { %533 = vst [vmem:[#allocation2 + $0x8] sm:$0xff] %v529_v28  ;;  %v531_v32 = vadd.f32 %v525_v31, %v380_v27 }
 0x127   : > { %534 = vst [vmem:[#allocation2 + $0x10] sm:$0xff] %v530_v30 }
 0x128   : > { %535 = vst [vmem:[#allocation2 + $0x18] sm:$0xff] %v531_v32 }
 0x12c   : > { %v540_v38 = vld [vmem:[#allocation2] sm:$0xff] }
 0x12d   : > { %v541_v41 = vld [vmem:[#allocation2 + $0x8] sm:$0xff]  ;;  %v556_v50 = vadd.f32 %v549_v46, %v540_v38 }
 0x12e   : > { %v542_v44 = vld [vmem:[#allocation2 + $0x10] sm:$0xff]  ;;  %v557_v51 = vadd.f32 %v553_v47, %v541_v41 }
 0x12f   : > { %v543_v45 = vld [vmem:[#allocation2 + $0x18] sm:$0xff]  ;;  %v558_v52 = vadd.f32 %v549_v46, %v542_v44  ;;  %v566_v54 = vadd.f32 %v562_v42, %v556_v50 }
 0x130   : > { %v559_v53 = vadd.f32 %v553_v47, %v543_v45  ;;  %v567_v55 = vadd.f32 %v563_v43, %v557_v51 }
 0x131   : > { %v568_v56 = vadd.f32 %v564_v48, %v558_v52 }
 0x132   : > { %v569_v57 = vadd.f32 %v565_v49, %v559_v53  ;;  %v570_v58 = vadd.f32 %v567_v55, %v566_v54 }
 0x134   : > { %571 = vadd.xlane.f32.xlu0 %v570_v58  ;;  %v573_v59 = vadd.f32 %v569_v57, %v568_v56 }
 0x138   : > { %574 = vadd.xlane.f32.xlu0 %v573_v59 }
 0x1c1   : > { %v572_v60 = vpop.xlane.xlu0 %571 }
 0x1c2   : > { %v577_v61 = vmul.f32 0.00390625, %v572_v60 }
 0x1c4   : > { %v579_v62 = vsub.f32 %v566_v54, %v577_v61  ;;  %v580_v63 = vsub.f32 %v567_v55, %v577_v61 }
 0x1c5   : > { %v575_v0 = vpop.xlane.xlu0 %574 }
 0x1c6   : > { %v578_v1 = vmul.f32 0.00390625, %v575_v0  ;;  %v583_v2 = vmul.f32 %v579_v62, %v579_v62  ;;  %v584_v3 = vmul.f32 %v580_v63, %v580_v63 }
 0x1c8   : > { %v581_v4 = vsub.f32 %v568_v56, %v578_v1  ;;  %v582_v5 = vsub.f32 %v569_v57, %v578_v1  ;;  %v587_v6 = vadd.f32 %v584_v3, %v583_v2 }
 0x1ca   : > { %588 = vadd.xlane.f32.xlu1 %v587_v6  ;;  %v585_v7 = vmul.f32 %v581_v4, %v581_v4  ;;  %v586_v8 = vmul.f32 %v582_v5, %v582_v5 }
 0x1cc   : > { %v590_v9 = vadd.f32 %v586_v8, %v585_v7 }
 0x1ce   : > { %591 = vadd.xlane.f32.xlu1 %v590_v9 }
 0x257   : > { %v589_v10 = vpop.xlane.xlu1 %588 }
 0x258   : > { %v593_v11 = vmul.f32 0.00390625, %v589_v10 }
 0x25a   : > { %v595_v12 = vadd.f32 1e-12, %v593_v11 }
 0x25b   : > { %v592_v13 = vpop.xlane.xlu1 %591 }
 0x25c   : > { %882 = vrsqrt.f32 %v595_v12  ;;  %v594_v14 = vmul.f32 0.00390625, %v592_v13 }
 0x25e   : > { %v596_v15 = vadd.f32 1e-12, %v594_v14 }
 0x260   : > { %884 = vrsqrt.f32 %v596_v15 }
 0x266   : > { %v883_v20 = vpop.eup %882 }
 0x267   : > { %v599_v23 = vmul.f32 %v883_v20, %v579_v62  ;;  %v600_v24 = vmul.f32 %v883_v20, %v580_v63 }
 0x269   : > { %v615_v25 = vmul.f32 %v608_v18, %v599_v23  ;;  %v616_v26 = vmul.f32 %v612_v19, %v600_v24 }
 0x26a   : > { %v885_v27 = vpop.eup %884 }
 0x26b   : > { %v631_v28 = vadd.f32 %v624_v21, %v615_v25  ;;  %v632_v29 = vadd.f32 %v628_v22, %v616_v26  ;;  %v601_v30 = vmul.f32 %v885_v27, %v581_v4  ;;  %v602_v31 = vmul.f32 %v885_v27, %v582_v5 }
 0x26d   : > { %v797_v32 = vpack.c.bf16 %v632_v29, %v631_v28  ;;  %v617_v33 = vmul.f32 %v608_v18, %v601_v30  ;;  %v618_v34 = vmul.f32 %v612_v19, %v602_v31 }
 0x26f   : > { %647 = vst [vmem:[%s1059_s19] sm:$0xff] %v797_v32  ;;  %v633_v35 = vadd.f32 %v624_v21, %v617_v33  ;;  %v634_v36 = vadd.f32 %v628_v22, %v618_v34 }
 0x271   : > { %v798_v37 = vpack.c.bf16 %v634_v36, %v633_v35 }
 0x273   : > { %648 = vst [vmem:[%s1059_s19 + $0x8] sm:$0xff] %v798_v37 }
 0x274 PF: > { %s16_s27 = sadd.s32 1, %s940_s27   ;;  %s1123_s21 = smov %s920_s22 }
 0x275   : > { %p13_p0 = scmp.ge.s32.totalorder %s16_s27, 6   ;;  %s1124_s22 = smov %s1030_s10 }
 0x276   : > { %s1125_s23 = smov %s932_s25  ;;  %s1126_s24 = smov %s936_s26 }
 0x277   : > { %s1127_s25 = smov %s1130_s28  ;;  %s1128_s26 = smov %s1134_s29 }
 0x278   :  { %15 = sbr.rel (!%p13_p0) target bundleno = 4 (0x4), region = 134 }

// kernel: _lambda_.20
= control target key start
LH: loop header
LB: loop body
LE: loop exit
PB: predicated region body
PF: predicated region fallthrough
CT: control target
= control target key end

     0   :  { %s940_s18 = smov 0   ;;  %s942_s19 = smov 0   ;;  %s1080_s0 = inlined_call_operand.vmem [shape: bf16[32,256], index: 0, kind: input, shape index: {}]   ;;  %s1081_s1 = inlined_call_operand.vmem [shape: bf16[256,256], index: 1, kind: input, shape index: {}]   ;;  %s1082_s2 = inlined_call_operand.vmem [shape: f32[1,256], index: 2, kind: input, shape index: {}]   ;;  %s1083_s3 = inlined_call_operand.vmem [shape: f32[1,256], index: 3, kind: input, shape index: {}]   ;;  %s1084_s4 = inlined_call_operand.vmem [shape: f32[1,256], index: 4, kind: input, shape index: {}]   ;;  %s1085_s5 = inlined_call_operand.vmem [shape: bf16[32,256], index: 5, kind: output, shape index: {}]  }
   0x1   :  { %s944_s20 = smov 0   ;;  %s946_s21 = smov 0  }
   0x2   :  { %s948_s22 = smov 0   ;;  %s950_s23 = smov 0  }
   0x3   :  { %s952_s24 = smov 0  }
   0x4 LB: > { %s24_s25 = sadd.s32 1, %s898_s22  ;;  %s27_s26 = sadd.s32 1, %s902_s23  ;;  %s906_s24 = sphi %s952_s24, %s15_s24   ;;  %s902_s23 = sphi %s950_s23, %s1091_s23   ;;  %s898_s22 = sphi %s948_s22, %s1090_s22   ;;  %s894_s21 = sphi %s946_s21, %s1089_s21   ;;  %s890_s20 = sphi %s944_s20, %s1088_s20   ;;  %s886_s19 = sphi %s942_s19, %s1087_s19   ;;  %s882_s18 = sphi %s940_s18, %s1086_s18  }
   0x5   : > { %p25_p0 = scmp.ge.s32.totalorder %s24_s25, 2  ;;  %p43_p1 = scmp.ne.s32.totalorder %s886_s19, %s882_s18 }
   0x6   : > { %p44_p2 = scmp.eq.s32.totalorder %s906_s24, 0  ;;  %s36_s30 = sadd.s32 1, %s886_s19 }
   0x7   : > { %s1093_s25 = smov (%p25_p0, %s24_s25), 0  ;;  %s1095_s26 = smov (!%p25_p0, %s27_s26), %s902_s23 }
   0x8   : > { %p45_p3 = por %p44_p2, %p43_p1  ;;  %p29_p4 = scmp.ge.s32.totalorder %s1095_s26, 2 }
   0x9   : > { %s32_s27 = ssub.s32 %s898_s22, %s1093_s25  ;;  %p716_p6 = scmp.ge.s32.totalorder %s906_s24, 4 }
   0xa   : > { %s1097_s26 = smov (%p29_p4, %s1095_s26), 0 }
   0xb   : > { %s31_s28 = ssub.s32 %s902_s23, %s1097_s26  ;;  %193 = sbr.rel (%p716_p6) target bundleno = 25 (0x19), region = 28 }
   0xc   : > { %s33_s29 = sor.u32 %s32_s27, %s31_s28 }
   0xd   : > { %p34_p5 = scmp.eq.s32.totalorder %s33_s29, 0 }
   0xf   : > { %s991_s6 = scalar_select %p34_p5, %s886_s19, %s36_s30  }
  0x12   : > { %196 = sbr.rel (!%p45_p3) target bundleno = 25 (0x19), region = 32  ;;  %s198_s7 = sand.u32 (%p45_p3), 1, %s886_s19  }
  0x13   : > { %s752_s8 = sshll.u32 (%p45_p3), %s902_s23, 2  ;;  %s717_s9 = sshll.u32 (%p45_p3), %s198_s7, 3 }
  0x14   : > { %s203_s10 = sadd.s32 (%p45_p3), %s898_s22, %s752_s8  ;;  %s200_s15 = scalar_lea.vmem (%p45_p3), [#allocation3], %s717_s9 }
  0x15   : > { %s720_s11 = sshll.u32 (%p45_p3), %s203_s10, 2 }
  0x16   : > { %s205_s14 = scalar_lea.vmem (%p45_p3), %s1080_s0, %s720_s11 }
  0x17   : > { %v221_v0 = vld [vmem:[%s205_s14] sm:$0xf] (%p45_p3)  ;;  %v223_v1 = vld [vmem:[%s205_s14 + $0x8] sm:$0xf] (%p45_p3) }
  0x18   : > { %222 = vst [vmem:[%s200_s15] sm:$0xf] (%p45_p3), %v221_v0  ;;  %224 = vst [vmem:[%s200_s15 + $0x4] sm:$0xf] (%p45_p3), %v223_v1 }
  0x19 PF: > { %p721_p7 = scmp.ge.s32.totalorder %s906_s24, 1  ;;  %p260_p8 = scmp.lt.s32.totalorder %s906_s24, 5 }
  0x1b   : > { %p261_p9 = pnand %p721_p7, %p260_p8 }
  0x1c   : > { %s267_s16 = sand.u32 (!%p261_p9), 1, %s882_s18   ;;  %s723_s17 = sshll.u32 (!%p261_p9), %s890_s20, 4 }
  0x1d   : > { %264 = sbr.rel (%p261_p9) target bundleno = 653 (0x28d), region = 77  ;;  %s1004_s27 = sshll.u32 (!%p261_p9), %s267_s16, 3 }
  0x1e   : > { %p303_p10 = scmp.lt.s32.totalorder (!%p261_p9), %s723_s17, 31  ;;  %s726_s28 = sshll.u32 (!%p261_p9), %s894_s21, 1 }
  0x1f   : > { %p310_p11 = scmp.lt.s32.totalorder (!%p261_p9), %s726_s28, 3  ;;  %s269_s12 = scalar_lea.vmem (!%p261_p9), [#allocation3], %s1004_s27 }
  0x20   : > { %p729_p12 = scmp.ne.s32.totalorder (!%p261_p9), %s890_s20, 0 }
  0x24   : > { %s1099_s17 = smov (!%p303_p10, %s723_s17), 31  ;;  %s1101_s28 = smov (!%p310_p11, %s726_s28), 3 }
  0x25   : > { %s753_s29 = sshll.u32 %s1099_s17, 3  ;;  %s754_s9 = sshll.u32 %s1101_s28, 3  ;;  %v908_v2 = vmov (!%p729_p12), 0.0  }
  0x26   : > { %s1010_s8 = scalar_lea.vmem %s1081_s1, %s753_s29  ;;  %s1015_s18 = scalar_lea.vmem %s1085_s5, %s754_s9  ;;  %321 = vst [vmem:[#allocation2] sm:$0xff] (!%p729_p12), %v908_v2  ;;  %322 = vst [vmem:[#allocation2 + $0x8] sm:$0xff] (!%p729_p12), %v908_v2 }
  0x27   : > { %320 = sbr.rel (%p729_p12) target bundleno = 46 (0x2e), region = 85  ;;  %323 = vst [vmem:[#allocation2 + $0x10] sm:$0xff] (!%p729_p12), %v908_v2  ;;  %324 = vst [vmem:[#allocation2 + $0x18] sm:$0xff] (!%p729_p12), %v908_v2 }
  0x2e PF: > { %v815_v3 = vld [vmem:[%s1010_s8 + $0x4] ss:$8 sps:$4 sm:$0xff]   ;;  %v817_v4 = vld [vmem:[%s1010_s8] ss:$8 sps:$4 sm:$0xff]   ;;  %v909_v5 = vmov 0   ;;  %v327_v24 = vld [vmem:[#allocation2 + $0x10] sm:$0xff] }
  0x2f   : > { %465 = vmatprep.mubr.bf16.mxu0 %v909_v5  ;;  %433 = vmatprep.subr.bf16.mxu0 %v815_v3  ;;  %v818_v6 = vld [vmem:[%s1010_s8 + $0x14] ss:$8 sps:$4 sm:$0xff]   ;;  %v820_v7 = vld [vmem:[%s1010_s8 + $0x10] ss:$8 sps:$4 sm:$0xff]   ;;  %v821_v8 = vld [vmem:[%s1010_s8 + $0x24] ss:$8 sps:$4 sm:$0xff]  }
  0x30   : > { %434 = vmatpush1.bf16.msra.mxu0 %v817_v4  ;;  %v823_v9 = vld [vmem:[%s1010_s8 + $0x20] ss:$8 sps:$4 sm:$0xff]   ;;  %v824_v10 = vld [vmem:[%s1010_s8 + $0x34] ss:$8 sps:$4 sm:$0xff]   ;;  %v826_v11 = vld [vmem:[%s1010_s8 + $0x30] ss:$8 sps:$4 sm:$0xff]  }
  0x31   : > { %435 = vmatprep.subr.bf16.mxu0 %v818_v6  ;;  %v827_v12 = vld [vmem:[%s1010_s8 + $0x44] ss:$8 sps:$4 sm:$0xff]   ;;  %v829_v13 = vld [vmem:[%s1010_s8 + $0x40] ss:$8 sps:$4 sm:$0xff]   ;;  %v830_v14 = vld [vmem:[%s1010_s8 + $0x54] ss:$8 sps:$4 sm:$0xff]  }
  0x32   : > { %v832_v15 = vld [vmem:[%s1010_s8 + $0x50] ss:$8 sps:$4 sm:$0xff]   ;;  %v833_v16 = vld [vmem:[%s1010_s8 + $0x64] ss:$8 sps:$4 sm:$0xff]   ;;  %v835_v17 = vld [vmem:[%s1010_s8 + $0x60] ss:$8 sps:$4 sm:$0xff]  }
  0x33   : > { %v836_v18 = vld [vmem:[%s1010_s8 + $0x74] ss:$8 sps:$4 sm:$0xff]   ;;  %v838_v19 = vld [vmem:[%s1010_s8 + $0x70] ss:$8 sps:$4 sm:$0xff]   ;;  %v839_v20 = vld [vmem:[%s269_s12] sm:$0xff]   ;;  %p747_p13 = scmp.ne.s32.totalorder %s890_s20, 1 }
  0x34   : > { %436 = vmatpush1.bf16.msra.mxu0 %v820_v7  ;;  %v325_v21 = vld [vmem:[#allocation2] sm:$0xff]  ;;  %v326_v22 = vld [vmem:[#allocation2 + $0x8] sm:$0xff]  ;;  %v328_v27 = vld [vmem:[#allocation2 + $0x18] sm:$0xff]  ;;  %v494_v33 = vlaneseq (!%p747_p13) }
  0x35   : > { %437 = vmatprep.subr.bf16.mxu0 %v821_v8  ;;  %v492_v35 = vld [vmem:[%s1082_s2] sm:$0x3] (!%p747_p13) }
  0x36   : > { %v495_v34 = vshrl.u32 (!%p747_p13), %v494_v33, 7 }
  0x38   : > { %438 = vmatpush1.bf16.msra.mxu0 %v823_v9  ;;  %v1041_v37 = vsub.s32 (!%p747_p13), 0, %v495_v34  ;;  %v1043_v38 = vsub.s32 (!%p747_p13), 1, %v495_v34 }
  0x39   : > { %439 = vmatprep.subr.bf16.mxu0 %v824_v10 }
  0x3a   : > { %v497_v42 = vrot.slane (!%p747_p13), %v492_v35, %v1041_v37  ;;  %v501_v43 = vrot.slane (!%p747_p13), %v492_v35, %v1043_v38 }
  0x3c   : > { %440 = vmatpush1.bf16.msra.mxu0 %v826_v11 }
  0x3d   : > { %441 = vmatprep.subr.bf16.mxu0 %v827_v12 }
  0x40   : > { %442 = vmatpush1.bf16.msra.mxu0 %v829_v13 }
  0x41   : > { %443 = vmatprep.subr.bf16.mxu0 %v830_v14 }
  0x44   : > { %444 = vmatpush1.bf16.msra.mxu0 %v832_v15 }
  0x45   : > { %445 = vmatprep.subr.bf16.mxu0 %v833_v16 }
  0x48   : > { %446 = vmatpush1.bf16.msra.mxu0 %v835_v17 }
  0x49   : > { %447 = vmatprep.subr.bf16.mxu0 %v836_v18 }
  0x4c   : > { %448 = vmatpush1.bf16.msra.mxu0 %v838_v19 }
  0x4f   : > { %466 = vmatmul.mubr.bf16.vlgmr.msra.gmra.mrb[0].mxu0 %v839_v20 }
 0x122   : > { %v467_v23 = vpop.f32.mrb[0].mxu0  ;;  %487 = sbr.rel (%p747_p13) target bundleno = 653 (0x28d), region = 89 }
 0x123   : > { %v476_v25 = vadd.f32 %v467_v23, %v325_v21  ;;  %v469_v26 = vpop.f32.mrb[1].mxu0 }
 0x124   : > { %v477_v28 = vadd.f32 %v469_v26, %v326_v22  ;;  %v471_v29 = vpop.f32.mrb[2].mxu0 }
 0x125   : > { %480 = vst [vmem:[#allocation2] sm:$0xff] %v476_v25  ;;  %v478_v30 = vadd.f32 %v471_v29, %v327_v24  ;;  %v473_v31 = vpop.f32.mrb[3].mxu0 }
 0x126   : > { %481 = vst [vmem:[#allocation2 + $0x8] sm:$0xff] %v477_v28  ;;  %v479_v32 = vadd.f32 %v473_v31, %v328_v27 }
 0x127   : > { %482 = vst [vmem:[#allocation2 + $0x10] sm:$0xff] %v478_v30 }
 0x128   : > { %483 = vst [vmem:[#allocation2 + $0x18] sm:$0xff] %v479_v32 }
 0x12c   : > { %v488_v36 = vld [vmem:[#allocation2] sm:$0xff] }
 0x12d   : > { %v489_v39 = vld [vmem:[#allocation2 + $0x8] sm:$0xff]  ;;  %v504_v44 = vadd.f32 %v497_v42, %v488_v36 }
 0x12e   : > { %v490_v40 = vld [vmem:[#allocation2 + $0x10] sm:$0xff]  ;;  %v505_v45 = vadd.f32 %v501_v43, %v489_v39 }
 0x12f   : > { %v491_v41 = vld [vmem:[#allocation2 + $0x18] sm:$0xff]  ;;  %v506_v46 = vadd.f32 %v497_v42, %v490_v40  ;;  %v508_v48 = vmul.f32 %v504_v44, %v504_v44 }
 0x130   : > { %v507_v47 = vadd.f32 %v501_v43, %v491_v41  ;;  %v509_v49 = vmul.f32 %v505_v45, %v505_v45 }
 0x131   : > { %v510_v50 = vmul.f32 %v506_v46, %v506_v46  ;;  %v512_v52 = vmul.f32 %v508_v48, %v504_v44 }
 0x132   : > { %v511_v51 = vmul.f32 %v507_v47, %v507_v47  ;;  %v513_v53 = vmul.f32 %v509_v49, %v505_v45 }
 0x133   : > { %v514_v54 = vmul.f32 %v510_v50, %v506_v46  ;;  %v516_v56 = vmul.f32 0.044715, %v512_v52 }
 0x134   : > { %v515_v55 = vmul.f32 %v511_v51, %v507_v47  ;;  %v517_v57 = vmul.f32 0.044715, %v513_v53 }
 0x135   : > { %v518_v58 = vmul.f32 0.044715, %v514_v54  ;;  %v520_v60 = vadd.f32 %v516_v56, %v504_v44 }
 0x136   : > { %v519_v59 = vmul.f32 0.044715, %v515_v55  ;;  %v521_v61 = vadd.f32 %v517_v57, %v505_v45 }
 0x137   : > { %v522_v62 = vadd.f32 %v518_v58, %v506_v46  ;;  %v524_v0 = vmul.f32 0.7978846, %v520_v60 }
 0x138   : > { %v523_v63 = vadd.f32 %v519_v59, %v507_v47  ;;  %v525_v1 = vmul.f32 0.7978846, %v521_v61 }
 0x139   : > { %v526_v2 = vmul.f32 0.7978846, %v522_v62  ;;  %840 = vtanh.f32 %v524_v0 }
 0x13a   : > { %v527_v3 = vmul.f32 0.7978846, %v523_v63  ;;  %842 = vtanh.f32 %v525_v1 }
 0x13b   : > { %844 = vtanh.f32 %v526_v2 }
 0x13c   : > { %846 = vtanh.f32 %v527_v3 }
 0x143   : > { %v841_v4 = vpop.eup %840 }
 0x144   : > { %v843_v5 = vpop.eup %842  ;;  %v532_v6 = vadd.f32 1.0, %v841_v4 }
 0x145   : > { %v845_v7 = vpop.eup %844  ;;  %v533_v8 = vadd.f32 1.0, %v843_v5 }
 0x146   : > { %v847_v9 = vpop.eup %846  ;;  %v536_v10 = vmul.f32 0.5, %v532_v6  ;;  %v534_v11 = vadd.f32 1.0, %v845_v7 }
 0x147   : > { %v537_v12 = vmul.f32 0.5, %v533_v8  ;;  %v535_v13 = vadd.f32 1.0, %v847_v9 }
 0x148   : > { %v540_v14 = vmul.f32 %v536_v10, %v504_v44  ;;  %v538_v15 = vmul.f32 0.5, %v534_v11  ;;  %v577_v44 = vld [vmem:[%s1083_s3] sm:$0x3] }
 0x149   : > { %v541_v16 = vmul.f32 %v537_v12, %v505_v45  ;;  %v539_v17 = vmul.f32 0.5, %v535_v13  ;;  %v593_v45 = vld [vmem:[%s1084_s4] sm:$0x3] }
 0x14a   : > { %v542_v18 = vmul.f32 %v538_v15, %v506_v46  ;;  %v582_v46 = vrot.slane %v577_v44, %v1041_v37  ;;  %v598_v49 = vrot.slane %v593_v45, %v1041_v37  ;;  %v602_v50 = vrot.slane %v593_v45, %v1043_v38 }
 0x14b   : > { %v544_v19 = vadd.f32 %v541_v16, %v540_v14  ;;  %v543_v20 = vmul.f32 %v539_v17, %v507_v47  ;;  %v586_v47 = vrot.slane %v577_v44, %v1043_v38 }
 0x14d   : > { %545 = vadd.xlane.f32.xlu0 %v544_v19  ;;  %v547_v21 = vadd.f32 %v543_v20, %v542_v18 }
 0x151   : > { %548 = vadd.xlane.f32.xlu0 %v547_v21 }
 0x1da   : > { %v546_v22 = vpop.xlane.xlu0 %545 }
 0x1db   : > { %v551_v23 = vmul.f32 0.00390625, %v546_v22 }
 0x1dd   : > { %v553_v24 = vsub.f32 %v540_v14, %v551_v23  ;;  %v554_v25 = vsub.f32 %v541_v16, %v551_v23 }
 0x1de   : > { %v549_v26 = vpop.xlane.xlu0 %548 }
 0x1df   : > { %v552_v27 = vmul.f32 0.00390625, %v549_v26  ;;  %v557_v28 = vmul.f32 %v553_v24, %v553_v24  ;;  %v558_v29 = vmul.f32 %v554_v25, %v554_v25 }
 0x1e1   : > { %v555_v30 = vsub.f32 %v542_v18, %v552_v27  ;;  %v556_v31 = vsub.f32 %v543_v20, %v552_v27  ;;  %v561_v32 = vadd.f32 %v558_v29, %v557_v28 }
 0x1e3   : > { %562 = vadd.xlane.f32.xlu1 %v561_v32  ;;  %v559_v33 = vmul.f32 %v555_v30, %v555_v30  ;;  %v560_v34 = vmul.f32 %v556_v31, %v556_v31 }
 0x1e5   : > { %v564_v35 = vadd.f32 %v560_v34, %v559_v33 }
 0x1e7   : > { %565 = vadd.xlane.f32.xlu1 %v564_v35 }
 0x270   : > { %v563_v36 = vpop.xlane.xlu1 %562 }
 0x271   : > { %v567_v39 = vmul.f32 0.00390625, %v563_v36 }
 0x273   : > { %v569_v40 = vadd.f32 1e-12, %v567_v39 }
 0x274   : > { %v566_v41 = vpop.xlane.xlu1 %565 }
 0x275   : > { %848 = vrsqrt.f32 %v569_v40  ;;  %v568_v42 = vmul.f32 0.00390625, %v566_v41 }
 0x277   : > { %v570_v43 = vadd.f32 1e-12, %v568_v42 }
 0x279   : > { %850 = vrsqrt.f32 %v570_v43 }
 0x27f   : > { %v849_v48 = vpop.eup %848 }
 0x280   : > { %v573_v51 = vmul.f32 %v849_v48, %v553_v24  ;;  %v574_v52 = vmul.f32 %v849_v48, %v554_v25 }
 0x282   : > { %v589_v53 = vmul.f32 %v582_v46, %v573_v51  ;;  %v590_v54 = vmul.f32 %v586_v47, %v574_v52 }
 0x283   : > { %v851_v55 = vpop.eup %850 }
 0x284   : > { %v605_v56 = vadd.f32 %v598_v49, %v589_v53  ;;  %v606_v57 = vadd.f32 %v602_v50, %v590_v54  ;;  %v575_v58 = vmul.f32 %v851_v55, %v555_v30  ;;  %v576_v59 = vmul.f32 %v851_v55, %v556_v31 }
 0x286   : > { %v755_v60 = vpack.c.bf16 %v606_v57, %v605_v56  ;;  %v591_v61 = vmul.f32 %v582_v46, %v575_v58  ;;  %v592_v62 = vmul.f32 %v586_v47, %v576_v59 }
 0x288   : > { %621 = vst [vmem:[%s1015_s18] sm:$0xff] %v755_v60  ;;  %v607_v63 = vadd.f32 %v598_v49, %v591_v61  ;;  %v608_v0 = vadd.f32 %v602_v50, %v592_v62 }
 0x28a   : > { %v756_v1 = vpack.c.bf16 %v608_v0, %v607_v63 }
 0x28c   : > { %622 = vst [vmem:[%s1015_s18 + $0x8] sm:$0xff] %v756_v1 }
 0x28d PF: > { %s15_s24 = sadd.s32 1, %s906_s24   ;;  %s1086_s18 = smov %s886_s19 }
 0x28e   : > { %p12_p0 = scmp.ge.s32.totalorder %s15_s24, 6   ;;  %s1087_s19 = smov %s991_s6 }
 0x28f   : > { %s1088_s20 = smov %s898_s22  ;;  %s1089_s21 = smov %s902_s23 }
 0x290   : > { %s1090_s22 = smov %s1093_s25  ;;  %s1091_s23 = smov %s1097_s26 }
 0x291   :  { %14 = sbr.rel (!%p12_p0) target bundleno = 4 (0x4), region = 127 }

// kernel: _lambda_.15
= control target key start
LH: loop header
LB: loop body
LE: loop exit
PB: predicated region body
PF: predicated region fallthrough
CT: control target
= control target key end

     0   :  { %s1921_s24 = smov 0   ;;  %s2413_s0 = inlined_call_operand.vmem [shape: bf16[32,256], index: 0, kind: input, shape index: {}]   ;;  %s2414_s1 = inlined_call_operand.vmem [shape: bf16[256,512], index: 1, kind: input, shape index: {}]   ;;  %s2415_s2 = inlined_call_operand.vmem [shape: f32[1,512], index: 2, kind: input, shape index: {}]   ;;  %s2416_s3 = inlined_call_operand.vmem [shape: bf16[512,256], index: 3, kind: input, shape index: {}]   ;;  %s2417_s4 = inlined_call_operand.vmem [shape: f32[1,256], index: 4, kind: input, shape index: {}]   ;;  %s2418_s5 = inlined_call_operand.vmem [shape: f32[1,256], index: 5, kind: input, shape index: {}]   ;;  %s2419_s6 = inlined_call_operand.vmem [shape: f32[1,256], index: 6, kind: input, shape index: {}]   ;;  %s2420_s7 = inlined_call_operand.vmem [shape: bf16[32,256], index: 7, kind: output, shape index: {}]  }
   0x1 LB: > { %s1494_s25 = sadd.s32 4294967295, %s1879_s24   ;;  %p1498_p0 = scmp.ge.s32.totalorder %s1879_s24, 1  ;;  %s1879_s24 = sphi %s1921_s24, %s17_s24  }
   0x2   : > { %p239_p1 = scmp.lt.s32.totalorder %s1879_s24, 3 }
   0x4   : > { %p240_p2 = pnand %p1498_p0, %p239_p1 }
   0x5   : > { %v1659_v0 = vld [vmem:[%s2414_s1 + $0x4] ss:$16 sps:$4 sm:$0xff] (!%p240_p2)   ;;  %v1661_v1 = vld [vmem:[%s2414_s1] ss:$16 sps:$4 sm:$0xff] (!%p240_p2)   ;;  %s1499_s13 = sshll.u32 (!%p240_p2), %s1494_s25, 1 }
   0x6   : > { %243 = sbr.rel (%p240_p2) target bundleno = 920 (0x398), region = 48  ;;  %705 = vmatprep.subr.bf16.mxu1 (!%p240_p2), %v1659_v0  ;;  %v1662_v2 = vld [vmem:[%s2414_s1 + $0x24] ss:$16 sps:$4 sm:$0xff] (!%p240_p2)   ;;  %v1664_v3 = vld [vmem:[%s2414_s1 + $0x20] ss:$16 sps:$4 sm:$0xff] (!%p240_p2)   ;;  %p274_p3 = scmp.lt.s32.totalorder (!%p240_p2), %s1499_s13, 3 }
   0x7   : > { %706 = vmatpush1.bf16.msra.mxu1 (!%p240_p2), %v1661_v1  ;;  %v1665_v4 = vld [vmem:[%s2414_s1 + $0x44] ss:$16 sps:$4 sm:$0xff] (!%p240_p2)   ;;  %v1667_v5 = vld [vmem:[%s2414_s1 + $0x40] ss:$16 sps:$4 sm:$0xff] (!%p240_p2)   ;;  %v1711_v45 = vld [vmem:[%s2414_s1 + $0xc] ss:$16 sps:$4 sm:$0xff] (!%p240_p2)  }
   0x8   : > { %707 = vmatprep.subr.bf16.mxu1 (!%p240_p2), %v1662_v2  ;;  %v1668_v6 = vld [vmem:[%s2414_s1 + $0x64] ss:$16 sps:$4 sm:$0xff] (!%p240_p2)   ;;  %v1670_v7 = vld [vmem:[%s2414_s1 + $0x60] ss:$16 sps:$4 sm:$0xff] (!%p240_p2)   ;;  %v1709_v47 = vld [vmem:[%s2414_s1 + $0x8] ss:$16 sps:$4 sm:$0xff] (!%p240_p2)  }
   0x9   : > { %v1671_v8 = vld [vmem:[%s2414_s1 + $0x84] ss:$16 sps:$4 sm:$0xff] (!%p240_p2)   ;;  %v1673_v9 = vld [vmem:[%s2414_s1 + $0x80] ss:$16 sps:$4 sm:$0xff] (!%p240_p2)   ;;  %v1714_v49 = vld [vmem:[%s2414_s1 + $0x2c] ss:$16 sps:$4 sm:$0xff] (!%p240_p2)  }
   0xa   : > { %v1674_v10 = vld [vmem:[%s2414_s1 + $0xa4] ss:$16 sps:$4 sm:$0xff] (!%p240_p2)   ;;  %v1676_v11 = vld [vmem:[%s2414_s1 + $0xa0] ss:$16 sps:$4 sm:$0xff] (!%p240_p2)   ;;  %v1712_v52 = vld [vmem:[%s2414_s1 + $0x28] ss:$16 sps:$4 sm:$0xff] (!%p240_p2)  }
   0xb   : > { %708 = vmatpush1.bf16.msra.mxu1 (!%p240_p2), %v1664_v3  ;;  %v1677_v12 = vld [vmem:[%s2414_s1 + $0xc4] ss:$16 sps:$4 sm:$0xff] (!%p240_p2)   ;;  %v1679_v16 = vld [vmem:[%s2414_s1 + $0xc0] ss:$16 sps:$4 sm:$0xff] (!%p240_p2)   ;;  %v1717_v53 = vld [vmem:[%s2414_s1 + $0x4c] ss:$16 sps:$4 sm:$0xff] (!%p240_p2)  }
   0xc   : > { %709 = vmatprep.subr.bf16.mxu1 (!%p240_p2), %v1665_v4  ;;  %v1680_v17 = vld [vmem:[%s2414_s1 + $0xe4] ss:$16 sps:$4 sm:$0xff] (!%p240_p2)   ;;  %v1682_v18 = vld [vmem:[%s2414_s1 + $0xe0] ss:$16 sps:$4 sm:$0xff] (!%p240_p2)   ;;  %v1715_v55 = vld [vmem:[%s2414_s1 + $0x48] ss:$16 sps:$4 sm:$0xff] (!%p240_p2)  }
   0xd   : > { %s2422_s13 = smov (!%p274_p3, %s1499_s13), 3  ;;  %v1683_v19 = vld [vmem:[%s2414_s1 + $0x104] ss:$16 sps:$4 sm:$0xff]   ;;  %v1685_v20 = vld [vmem:[%s2414_s1 + $0x100] ss:$16 sps:$4 sm:$0xff]  }
   0xe   : > { %s1639_s25 = sshll.u32 %s2422_s13, 3  ;;  %v1686_v21 = vld [vmem:[%s2414_s1 + $0x124] ss:$16 sps:$4 sm:$0xff]   ;;  %v1688_v22 = vld [vmem:[%s2414_s1 + $0x120] ss:$16 sps:$4 sm:$0xff]  }
   0xf   : > { %710 = vmatpush1.bf16.msra.mxu1 %v1667_v5  ;;  %s278_s30 = scalar_lea.vmem %s2413_s0, %s1639_s25  ;;  %v1689_v23 = vld [vmem:[%s2414_s1 + $0x144] ss:$16 sps:$4 sm:$0xff]   ;;  %v1691_v24 = vld [vmem:[%s2414_s1 + $0x140] ss:$16 sps:$4 sm:$0xff]   ;;  %v1720_v56 = vld [vmem:[%s2414_s1 + $0x6c] ss:$16 sps:$4 sm:$0xff]   ;;  %s285_s12 = scalar_lea.vmem %s2420_s7, %s1639_s25 }
  0x10   : > { %711 = vmatprep.subr.bf16.mxu1 %v1668_v6  ;;  %v1976_v13 = vld [vmem:[%s278_s30] sm:$0xff]  ;;  %v1978_v14 = vld [vmem:[%s278_s30 + $0x8] sm:$0xff]  ;;  %v1760_v30 = vld [vmem:[%s2416_s3 + $0x14] ss:$8 sps:$4 sm:$0xff]  }
  0x11   : > { %v1982_v15 = vcombine.high %v1976_v13, %v1978_v14  ;;  %v1692_v25 = vld [vmem:[%s2414_s1 + $0x164] ss:$16 sps:$4 sm:$0xff]   ;;  %v1694_v26 = vld [vmem:[%s2414_s1 + $0x160] ss:$16 sps:$4 sm:$0xff]   ;;  %v2083_v48 = vcombine.low %v1976_v13, %v1978_v14  ;;  %v1718_v57 = vld [vmem:[%s2414_s1 + $0x68] ss:$16 sps:$4 sm:$0xff]  }
  0x12   : > { %v1695_v27 = vld [vmem:[%s2414_s1 + $0x184] ss:$16 sps:$4 sm:$0xff]   ;;  %v1759_v29 = vld [vmem:[%s2416_s3] ss:$8 sps:$4 sm:$0xff]   ;;  %v1762_v32 = vld [vmem:[%s2416_s3 + $0x10] ss:$8 sps:$4 sm:$0xff]  }
  0x13   : > { %712 = vmatpush1.bf16.msra.mxu1 %v1670_v7  ;;  %737 = vmatprep.mubr.bf16.mxu1 %v1982_v15  ;;  %v1757_v28 = vld [vmem:[%s2416_s3 + $0x4] ss:$8 sps:$4 sm:$0xff]   ;;  %v1697_v31 = vld [vmem:[%s2414_s1 + $0x180] ss:$16 sps:$4 sm:$0xff]   ;;  %v1766_v38 = vld [vmem:[%s2416_s3 + $0x34] ss:$8 sps:$4 sm:$0xff]  }
  0x14   : > { %713 = vmatprep.subr.bf16.mxu1 %v1671_v8  ;;  %1263 = vmatprep.subr.bf16.mxu0 %v1757_v28  ;;  %v1698_v33 = vld [vmem:[%s2414_s1 + $0x1a4] ss:$16 sps:$4 sm:$0xff]   ;;  %v1700_v35 = vld [vmem:[%s2414_s1 + $0x1a0] ss:$16 sps:$4 sm:$0xff]   ;;  %v1723_v58 = vld [vmem:[%s2414_s1 + $0x8c] ss:$16 sps:$4 sm:$0xff]  }
  0x15   : > { %1264 = vmatpush1.bf16.msra.mxu0 %v1759_v29  ;;  %v1763_v34 = vld [vmem:[%s2416_s3 + $0x24] ss:$8 sps:$4 sm:$0xff]   ;;  %v1765_v36 = vld [vmem:[%s2416_s3 + $0x20] ss:$8 sps:$4 sm:$0xff]   ;;  %v1768_v40 = vld [vmem:[%s2416_s3 + $0x30] ss:$8 sps:$4 sm:$0xff]  }
  0x16   : > { %1265 = vmatprep.subr.bf16.mxu0 %v1760_v30  ;;  %v1701_v37 = vld [vmem:[%s2414_s1 + $0x1c4] ss:$16 sps:$4 sm:$0xff]   ;;  %v1703_v39 = vld [vmem:[%s2414_s1 + $0x1c0] ss:$16 sps:$4 sm:$0xff]   ;;  %v1721_v59 = vld [vmem:[%s2414_s1 + $0x88] ss:$16 sps:$4 sm:$0xff]  }
  0x17   : > { %714 = vmatpush1.bf16.msra.mxu1 %v1673_v9  ;;  %v1704_v41 = vld [vmem:[%s2414_s1 + $0x1e4] ss:$16 sps:$4 sm:$0xff]   ;;  %v1706_v43 = vld [vmem:[%s2414_s1 + $0x1e0] ss:$16 sps:$4 sm:$0xff]   ;;  %v1726_v60 = vld [vmem:[%s2414_s1 + $0xac] ss:$16 sps:$4 sm:$0xff]  }
  0x18   : > { %715 = vmatprep.subr.bf16.mxu1 %v1674_v10  ;;  %v1769_v42 = vld [vmem:[%s2416_s3 + $0x44] ss:$8 sps:$4 sm:$0xff]   ;;  %v1771_v44 = vld [vmem:[%s2416_s3 + $0x40] ss:$8 sps:$4 sm:$0xff]   ;;  %v1772_v46 = vld [vmem:[%s2416_s3 + $0x54] ss:$8 sps:$4 sm:$0xff]  }
  0x19   : > { %1266 = vmatpush1.bf16.msra.mxu0 %v1762_v32  ;;  %v1774_v50 = vld [vmem:[%s2416_s3 + $0x50] ss:$8 sps:$4 sm:$0xff]   ;;  %v1775_v51 = vld [vmem:[%s2416_s3 + $0x64] ss:$8 sps:$4 sm:$0xff]   ;;  %v1777_v54 = vld [vmem:[%s2416_s3 + $0x60] ss:$8 sps:$4 sm:$0xff]  }
  0x1a   : > { %1267 = vmatprep.subr.bf16.mxu0 %v1763_v34  ;;  %v1724_v61 = vld [vmem:[%s2414_s1 + $0xa8] ss:$16 sps:$4 sm:$0xff]   ;;  %v1729_v62 = vld [vmem:[%s2414_s1 + $0xcc] ss:$16 sps:$4 sm:$0xff]  }
  0x1b   : > { %716 = vmatpush1.bf16.msra.mxu1 %v1676_v11  ;;  %v1727_v63 = vld [vmem:[%s2414_s1 + $0xc8] ss:$16 sps:$4 sm:$0xff]   ;;  %v1732_v0 = vld [vmem:[%s2414_s1 + $0xec] ss:$16 sps:$4 sm:$0xff]  }
  0x1c   : > { %717 = vmatprep.subr.bf16.mxu1 %v1677_v12  ;;  %v1730_v1 = vld [vmem:[%s2414_s1 + $0xe8] ss:$16 sps:$4 sm:$0xff]   ;;  %v1735_v2 = vld [vmem:[%s2414_s1 + $0x10c] ss:$16 sps:$4 sm:$0xff]  }
  0x1d   : > { %1268 = vmatpush1.bf16.msra.mxu0 %v1765_v36  ;;  %v1733_v3 = vld [vmem:[%s2414_s1 + $0x108] ss:$16 sps:$4 sm:$0xff]   ;;  %v1738_v4 = vld [vmem:[%s2414_s1 + $0x12c] ss:$16 sps:$4 sm:$0xff]  }
  0x1e   : > { %1269 = vmatprep.subr.bf16.mxu0 %v1766_v38  ;;  %v1736_v5 = vld [vmem:[%s2414_s1 + $0x128] ss:$16 sps:$4 sm:$0xff]   ;;  %v1741_v6 = vld [vmem:[%s2414_s1 + $0x14c] ss:$16 sps:$4 sm:$0xff]  }
  0x1f   : > { %718 = vmatpush1.bf16.msra.mxu1 %v1679_v16  ;;  %v1739_v7 = vld [vmem:[%s2414_s1 + $0x148] ss:$16 sps:$4 sm:$0xff]   ;;  %v1744_v8 = vld [vmem:[%s2414_s1 + $0x16c] ss:$16 sps:$4 sm:$0xff]  }
  0x20   : > { %719 = vmatprep.subr.bf16.mxu1 %v1680_v17  ;;  %v1742_v9 = vld [vmem:[%s2414_s1 + $0x168] ss:$16 sps:$4 sm:$0xff]   ;;  %v1747_v10 = vld [vmem:[%s2414_s1 + $0x18c] ss:$16 sps:$4 sm:$0xff]  }
  0x21   : > { %1270 = vmatpush1.bf16.msra.mxu0 %v1768_v40  ;;  %v1745_v11 = vld [vmem:[%s2414_s1 + $0x188] ss:$16 sps:$4 sm:$0xff]   ;;  %v1750_v12 = vld [vmem:[%s2414_s1 + $0x1ac] ss:$16 sps:$4 sm:$0xff]  }
  0x22   : > { %1271 = vmatprep.subr.bf16.mxu0 %v1769_v42  ;;  %v1753_v16 = vld [vmem:[%s2414_s1 + $0x1cc] ss:$16 sps:$4 sm:$0xff]   ;;  %v1751_v17 = vld [vmem:[%s2414_s1 + $0x1c8] ss:$16 sps:$4 sm:$0xff]   ;;  %v2252_v42 = vld [vmem:[%s2415_s2] sm:$0xf] }
  0x23   : > { %720 = vmatpush1.bf16.msra.mxu1 %v1682_v18  ;;  %v1756_v18 = vld [vmem:[%s2414_s1 + $0x1ec] ss:$16 sps:$4 sm:$0xff]   ;;  %v1792_v29 = vld [vmem:[%s2416_s3 + $0xb0] ss:$8 sps:$4 sm:$0xff]  }
  0x24   : > { %721 = vmatprep.subr.bf16.mxu1 %v1683_v19  ;;  %v1754_v19 = vld [vmem:[%s2414_s1 + $0x1e8] ss:$16 sps:$4 sm:$0xff]   ;;  %v1790_v28 = vld [vmem:[%s2416_s3 + $0xb4] ss:$8 sps:$4 sm:$0xff]   ;;  %v1793_v30 = vld [vmem:[%s2416_s3 + $0xc4] ss:$8 sps:$4 sm:$0xff]  }
  0x25   : > { %1272 = vmatpush1.bf16.msra.mxu0 %v1771_v44  ;;  %v1796_v32 = vld [vmem:[%s2416_s3 + $0xd4] ss:$8 sps:$4 sm:$0xff]   ;;  %v1799_v34 = vld [vmem:[%s2416_s3 + $0xe4] ss:$8 sps:$4 sm:$0xff]  }
  0x26   : > { %1273 = vmatprep.subr.bf16.mxu0 %v1772_v46  ;;  %v1802_v36 = vld [vmem:[%s2416_s3 + $0xf4] ss:$8 sps:$4 sm:$0xff]   ;;  %v1807_v38 = vld [vmem:[%s2416_s3 + $0x104] ss:$8 sps:$4 sm:$0xff]  }
  0x27   : > { %722 = vmatpush1.bf16.msra.mxu1 %v1685_v20  ;;  %v1778_v20 = vld [vmem:[%s2416_s3 + $0x74] ss:$8 sps:$4 sm:$0xff]  }
  0x28   : > { %723 = vmatprep.subr.bf16.mxu1 %v1686_v21  ;;  %v1780_v21 = vld [vmem:[%s2416_s3 + $0x70] ss:$8 sps:$4 sm:$0xff]  }
  0x29   : > { %1274 = vmatpush1.bf16.msra.mxu0 %v1774_v50 }
  0x2a   : > { %1275 = vmatprep.subr.bf16.mxu0 %v1775_v51 }
  0x2b   : > { %724 = vmatpush1.bf16.msra.mxu1 %v1688_v22  ;;  %v1781_v22 = vld [vmem:[%s2416_s3 + $0x84] ss:$8 sps:$4 sm:$0xff]  }
  0x2c   : > { %725 = vmatprep.subr.bf16.mxu1 %v1689_v23  ;;  %v1783_v23 = vld [vmem:[%s2416_s3 + $0x80] ss:$8 sps:$4 sm:$0xff]  }
  0x2d   : > { %1276 = vmatpush1.bf16.msra.mxu0 %v1777_v54 }
  0x2e   : > { %1277 = vmatprep.subr.bf16.mxu0 %v1778_v20 }
  0x2f   : > { %726 = vmatpush1.bf16.msra.mxu1 %v1691_v24  ;;  %v1784_v24 = vld [vmem:[%s2416_s3 + $0x94] ss:$8 sps:$4 sm:$0xff]  }
  0x30   : > { %727 = vmatprep.subr.bf16.mxu1 %v1692_v25  ;;  %v1786_v25 = vld [vmem:[%s2416_s3 + $0x90] ss:$8 sps:$4 sm:$0xff]  }
  0x31   : > { %1278 = vmatpush1.bf16.msra.mxu0 %v1780_v21 }
  0x32   : > { %1279 = vmatprep.subr.bf16.mxu0 %v1781_v22 }
  0x33   : > { %728 = vmatpush1.bf16.msra.mxu1 %v1694_v26  ;;  %v1787_v26 = vld [vmem:[%s2416_s3 + $0xa4] ss:$8 sps:$4 sm:$0xff]  }
  0x34   : > { %729 = vmatprep.subr.bf16.mxu1 %v1695_v27  ;;  %v1789_v27 = vld [vmem:[%s2416_s3 + $0xa0] ss:$8 sps:$4 sm:$0xff]  }
  0x35   : > { %1280 = vmatpush1.bf16.msra.mxu0 %v1783_v23 }
  0x36   : > { %1281 = vmatprep.subr.bf16.mxu0 %v1784_v24 }
  0x37   : > { %730 = vmatpush1.bf16.msra.mxu1 %v1697_v31  ;;  %v1795_v31 = vld [vmem:[%s2416_s3 + $0xc0] ss:$8 sps:$4 sm:$0xff]  }
  0x38   : > { %731 = vmatprep.subr.bf16.mxu1 %v1698_v33  ;;  %v1798_v33 = vld [vmem:[%s2416_s3 + $0xd0] ss:$8 sps:$4 sm:$0xff]  }
  0x39   : > { %1282 = vmatpush1.bf16.msra.mxu0 %v1786_v25 }
  0x3a   : > { %1283 = vmatprep.subr.bf16.mxu0 %v1787_v26 }
  0x3b   : > { %732 = vmatpush1.bf16.msra.mxu1 %v1700_v35  ;;  %v1801_v35 = vld [vmem:[%s2416_s3 + $0xe0] ss:$8 sps:$4 sm:$0xff]  }
  0x3c   : > { %733 = vmatprep.subr.bf16.mxu1 %v1701_v37  ;;  %v1804_v37 = vld [vmem:[%s2416_s3 + $0xf0] ss:$8 sps:$4 sm:$0xff]  }
  0x3d   : > { %1284 = vmatpush1.bf16.msra.mxu0 %v1789_v27 }
  0x3e   : > { %1285 = vmatprep.subr.bf16.mxu0 %v1790_v28 }
  0x3f   : > { %734 = vmatpush1.bf16.msra.mxu1 %v1703_v39  ;;  %v355_v39 = vlaneseq }
  0x40   : > { %735 = vmatprep.subr.bf16.mxu1 %v1704_v41 }
  0x41   : > { %1286 = vmatpush1.bf16.msra.mxu0 %v1792_v29  ;;  %v2244_v40 = vshrl.u32 %v355_v39, 7  ;;  %v1822_v39 = vld [vmem:[%s2416_s3 + $0x154] ss:$8 sps:$4 sm:$0xff]  }
  0x42   : > { %1287 = vmatprep.subr.bf16.mxu0 %v1793_v30  ;;  %v1805_v30 = vld [vmem:[%s2416_s3 + $0x100] ss:$8 sps:$4 sm:$0xff]  }
  0x43   : > { %736 = vmatpush1.bf16.msra.mxu1 %v1706_v43  ;;  %v2247_v41 = vsub.s32 0, %v2244_v40  ;;  %v2255_v43 = vsub.s32 1, %v2244_v40 }
  0x44   : > { %748 = vmatprep.subr.bf16.mxu1 %v1711_v45 }
  0x45   : > { %1288 = vmatpush1.bf16.msra.mxu0 %v1795_v31  ;;  %v358_v44 = vrot.slane %v2252_v42, %v2247_v41  ;;  %v362_v45 = vrot.slane %v2252_v42, %v2255_v43  ;;  %v1810_v31 = vld [vmem:[%s2416_s3 + $0x114] ss:$8 sps:$4 sm:$0xff]  }
  0x46   : > { %738 = vmatmul.mubr.bf16.vlgmr.msra.gmra.mrb[0].mxu1 %v2083_v48  ;;  %1289 = vmatprep.subr.bf16.mxu0 %v1796_v32  ;;  %v1808_v32 = vld [vmem:[%s2416_s3 + $0x110] ss:$8 sps:$4 sm:$0xff]  }
  0x47   : > { %749 = vmatpush1.bf16.msra.mxu1 %v1709_v47  ;;  %780 = vmatprep.mubr.bf16.mxu1 %v1982_v15  ;;  %v1748_v15 = vld [vmem:[%s2414_s1 + $0x1a8] ss:$16 sps:$4 sm:$0xff]  }
  0x48   : > { %750 = vmatprep.subr.bf16.mxu1 %v1714_v49 }
  0x49   : > { %1290 = vmatpush1.bf16.msra.mxu0 %v1798_v33  ;;  %v1813_v33 = vld [vmem:[%s2416_s3 + $0x124] ss:$8 sps:$4 sm:$0xff]  }
  0x4a   : > { %1291 = vmatprep.subr.bf16.mxu0 %v1799_v34  ;;  %v1811_v34 = vld [vmem:[%s2416_s3 + $0x120] ss:$8 sps:$4 sm:$0xff]  }
  0x4b   : > { %751 = vmatpush1.bf16.msra.mxu1 %v1712_v52 }
  0x4c   : > { %752 = vmatprep.subr.bf16.mxu1 %v1717_v53 }
  0x4d   : > { %1292 = vmatpush1.bf16.msra.mxu0 %v1801_v35  ;;  %v1816_v35 = vld [vmem:[%s2416_s3 + $0x134] ss:$8 sps:$4 sm:$0xff]  }
  0x4e   : > { %1293 = vmatprep.subr.bf16.mxu0 %v1802_v36  ;;  %v1814_v36 = vld [vmem:[%s2416_s3 + $0x130] ss:$8 sps:$4 sm:$0xff]  }
  0x4f   : > { %753 = vmatpush1.bf16.msra.mxu1 %v1715_v55 }
  0x50   : > { %754 = vmatprep.subr.bf16.mxu1 %v1720_v56 }
  0x51   : > { %1294 = vmatpush1.bf16.msra.mxu0 %v1804_v37  ;;  %v1819_v37 = vld [vmem:[%s2416_s3 + $0x144] ss:$8 sps:$4 sm:$0xff]  }
  0x52   : > { %1306 = vmatprep.subr.bf16.mxu0 %v1807_v38  ;;  %v1817_v38 = vld [vmem:[%s2416_s3 + $0x140] ss:$8 sps:$4 sm:$0xff]  }
  0x53   : > { %755 = vmatpush1.bf16.msra.mxu1 %v1718_v57 }
  0x54   : > { %756 = vmatprep.subr.bf16.mxu1 %v1723_v58 }
  0x57   : > { %757 = vmatpush1.bf16.msra.mxu1 %v1721_v59 }
  0x58   : > { %758 = vmatprep.subr.bf16.mxu1 %v1726_v60 }
  0x5b   : > { %759 = vmatpush1.bf16.msra.mxu1 %v1724_v61 }
  0x5c   : > { %760 = vmatprep.subr.bf16.mxu1 %v1729_v62 }
  0x5f   : > { %761 = vmatpush1.bf16.msra.mxu1 %v1727_v63 }
  0x60   : > { %762 = vmatprep.subr.bf16.mxu1 %v1732_v0 }
  0x63   : > { %763 = vmatpush1.bf16.msra.mxu1 %v1730_v1 }
  0x64   : > { %764 = vmatprep.subr.bf16.mxu1 %v1735_v2 }
  0x67   : > { %765 = vmatpush1.bf16.msra.mxu1 %v1733_v3 }
  0x68   : > { %766 = vmatprep.subr.bf16.mxu1 %v1738_v4 }
  0x6b   : > { %767 = vmatpush1.bf16.msra.mxu1 %v1736_v5 }
  0x6c   : > { %768 = vmatprep.subr.bf16.mxu1 %v1741_v6 }
  0x6f   : > { %769 = vmatpush1.bf16.msra.mxu1 %v1739_v7 }
  0x70   : > { %770 = vmatprep.subr.bf16.mxu1 %v1744_v8 }
  0x73   : > { %771 = vmatpush1.bf16.msra.mxu1 %v1742_v9 }
  0x74   : > { %772 = vmatprep.subr.bf16.mxu1 %v1747_v10 }
  0x77   : > { %773 = vmatpush1.bf16.msra.mxu1 %v1745_v11 }
  0x78   : > { %774 = vmatprep.subr.bf16.mxu1 %v1750_v12 }
  0x7b   : > { %775 = vmatpush1.bf16.msra.mxu1 %v1748_v15 }
  0x7c   : > { %776 = vmatprep.subr.bf16.mxu1 %v1753_v16 }
  0x7f   : > { %777 = vmatpush1.bf16.msra.mxu1 %v1751_v17 }
  0x80   : > { %778 = vmatprep.subr.bf16.mxu1 %v1756_v18 }
  0x83   : > { %779 = vmatpush1.bf16.msra.mxu1 %v1754_v19 }
  0x86   : > { %781 = vmatmul.mubr.bf16.vlgmr.msra.gmra.mrb[4].mxu1 %v2083_v48 }
 0x119   : > { %v739_v46 = vpop.f32.mrb[0].mxu1 }
 0x11a   : > { %v740_v47 = vadd.f32 %v739_v46, %v358_v44  ;;  %v741_v48 = vpop.f32.mrb[1].mxu1  ;;  %v1823_v46 = vld [vmem:[%s2416_s3 + $0x160] ss:$8 sps:$4 sm:$0xff]  }
 0x11b   : > { %v742_v49 = vadd.f32 %v741_v48, %v362_v45  ;;  %v743_v50 = vpop.f32.mrb[2].mxu1  ;;  %v1828_v48 = vld [vmem:[%s2416_s3 + $0x174] ss:$8 sps:$4 sm:$0xff]  }
 0x11c   : > { %v791_v51 = vmul.f32 %v740_v47, %v740_v47  ;;  %v744_v52 = vadd.f32 %v743_v50, %v358_v44  ;;  %v745_v53 = vpop.f32.mrb[3].mxu1  ;;  %v1820_v44 = vld [vmem:[%s2416_s3 + $0x150] ss:$8 sps:$4 sm:$0xff]  }
 0x11d   : > { %v792_v54 = vmul.f32 %v742_v49, %v742_v49  ;;  %v746_v55 = vadd.f32 %v745_v53, %v362_v45  ;;  %v1825_v45 = vld [vmem:[%s2416_s3 + $0x164] ss:$8 sps:$4 sm:$0xff]  }
 0x11e   : > { %v799_v56 = vmul.f32 %v791_v51, %v740_v47  ;;  %v795_v57 = vmul.f32 %v744_v52, %v744_v52  ;;  %v1826_v51 = vld [vmem:[%s2416_s3 + $0x170] ss:$8 sps:$4 sm:$0xff]   ;;  %v1831_v53 = vld [vmem:[%s2416_s3 + $0x184] ss:$8 sps:$4 sm:$0xff]  }
 0x11f   : > { %v800_v58 = vmul.f32 %v792_v54, %v742_v49  ;;  %v796_v59 = vmul.f32 %v746_v55, %v746_v55 }
 0x120   : > { %v807_v60 = vmul.f32 0.044715, %v799_v56  ;;  %v803_v61 = vmul.f32 %v795_v57, %v744_v52 }
 0x121   : > { %v808_v62 = vmul.f32 0.044715, %v800_v58  ;;  %v804_v63 = vmul.f32 %v796_v59, %v746_v55 }
 0x122   : > { %v815_v0 = vadd.f32 %v807_v60, %v740_v47  ;;  %v811_v1 = vmul.f32 0.044715, %v803_v61 }
 0x123   : > { %v812_v2 = vmul.f32 0.044715, %v804_v63  ;;  %v816_v3 = vadd.f32 %v808_v62, %v742_v49 }
 0x124   : > { %v823_v4 = vmul.f32 0.7978846, %v815_v0  ;;  %v819_v5 = vadd.f32 %v811_v1, %v744_v52 }
 0x125   : > { %v820_v6 = vadd.f32 %v812_v2, %v746_v55  ;;  %v824_v7 = vmul.f32 0.7978846, %v816_v3  ;;  %v1832_v2 = vld [vmem:[%s2416_s3 + $0x190] ss:$8 sps:$4 sm:$0xff]  }
 0x126   : > { %1853 = vtanh.f32 %v823_v4  ;;  %v827_v8 = vmul.f32 0.7978846, %v819_v5  ;;  %v1837_v5 = vld [vmem:[%s2416_s3 + $0x1a4] ss:$8 sps:$4 sm:$0xff]  }
 0x127   : > { %v828_v9 = vmul.f32 0.7978846, %v820_v6  ;;  %1855 = vtanh.f32 %v824_v7 }
 0x128   : > { %1857 = vtanh.f32 %v827_v8 }
 0x129   : > { %1859 = vtanh.f32 %v828_v9 }
 0x130   : > { %v1854_v10 = vpop.eup %1853 }
 0x131   : > { %v1856_v11 = vpop.eup %1855  ;;  %v839_v12 = vadd.f32 1.0, %v1854_v10 }
 0x132   : > { %v1858_v15 = vpop.eup %1857  ;;  %v840_v16 = vadd.f32 1.0, %v1856_v11 }
 0x133   : > { %v1860_v17 = vpop.eup %1859  ;;  %v843_v18 = vadd.f32 1.0, %v1858_v15  ;;  %v847_v19 = vmul.f32 0.5, %v839_v12  ;;  %v1835_v12 = vld [vmem:[%s2416_s3 + $0x1a0] ss:$8 sps:$4 sm:$0xff]  }
 0x134   : > { %v844_v20 = vadd.f32 1.0, %v1860_v17  ;;  %v848_v21 = vmul.f32 0.5, %v840_v16  ;;  %v1840_v17 = vld [vmem:[%s2416_s3 + $0x1b4] ss:$8 sps:$4 sm:$0xff]  }
 0x135   : > { %v851_v22 = vmul.f32 0.5, %v843_v18  ;;  %v855_v24 = vmul.f32 %v847_v19, %v740_v47  ;;  %v365_v47 = vsub.s32 2, %v2244_v40 }
 0x136   : > { %v852_v23 = vmul.f32 0.5, %v844_v20  ;;  %v856_v26 = vmul.f32 %v848_v21, %v742_v49  ;;  %v369_v49 = vsub.s32 3, %v2244_v40  ;;  %v1829_v40 = vld [vmem:[%s2416_s3 + $0x180] ss:$8 sps:$4 sm:$0xff]  }
 0x137   : > { %v859_v25 = vmul.f32 %v851_v22, %v744_v52  ;;  %v366_v50 = vrot.slane %v2252_v42, %v365_v47  ;;  %v1850_v47 = vld [vmem:[%s2416_s3 + $0x1f0] ss:$8 sps:$4 sm:$0xff]  }
 0x138   : > { %v860_v27 = vmul.f32 %v852_v23, %v746_v55  ;;  %v370_v52 = vrot.slane %v2252_v42, %v369_v49  ;;  %v1834_v42 = vld [vmem:[%s2416_s3 + $0x194] ss:$8 sps:$4 sm:$0xff]   ;;  %v1838_v23 = vld [vmem:[%s2416_s3 + $0x1b0] ss:$8 sps:$4 sm:$0xff]  }
 0x139   : > { %v863_v28 = vpack.c.bf16 %v859_v25, %v855_v24  ;;  %v1843_v25 = vld [vmem:[%s2416_s3 + $0x1c4] ss:$8 sps:$4 sm:$0xff]  }
 0x13a   : > { %v864_v29 = vpack.c.bf16 %v860_v27, %v856_v26  ;;  %v1841_v26 = vld [vmem:[%s2416_s3 + $0x1c0] ss:$8 sps:$4 sm:$0xff]   ;;  %v1846_v27 = vld [vmem:[%s2416_s3 + $0x1d4] ss:$8 sps:$4 sm:$0xff]  }
 0x13c   : > { %1295 = vmatprep.mubr.bf16.mxu0 %v864_v29  ;;  %v1849_v29 = vld [vmem:[%s2416_s3 + $0x1e4] ss:$8 sps:$4 sm:$0xff]  }
 0x13d   : > { %1296 = vmatmul.mubr.bf16.vlgmr.msra.gmra.mrb[0].mxu0 %v863_v28  ;;  %v1844_v28 = vld [vmem:[%s2416_s3 + $0x1d0] ss:$8 sps:$4 sm:$0xff]  }
 0x13e   : > { %1307 = vmatpush1.bf16.msra.mxu0 %v1805_v30 }
 0x13f   : > { %1308 = vmatprep.subr.bf16.mxu0 %v1810_v31 }
 0x142   : > { %1309 = vmatpush1.bf16.msra.mxu0 %v1808_v32 }
 0x143   : > { %1310 = vmatprep.subr.bf16.mxu0 %v1813_v33 }
 0x146   : > { %1311 = vmatpush1.bf16.msra.mxu0 %v1811_v34  ;;  %v1847_v34 = vld [vmem:[%s2416_s3 + $0x1e0] ss:$8 sps:$4 sm:$0xff]  }
 0x147   : > { %1312 = vmatprep.subr.bf16.mxu0 %v1816_v35 }
 0x14a   : > { %1313 = vmatpush1.bf16.msra.mxu0 %v1814_v36 }
 0x14b   : > { %1314 = vmatprep.subr.bf16.mxu0 %v1819_v37 }
 0x14e   : > { %1315 = vmatpush1.bf16.msra.mxu0 %v1817_v38 }
 0x14f   : > { %1316 = vmatprep.subr.bf16.mxu0 %v1822_v39  ;;  %v1852_v39 = vld [vmem:[%s2416_s3 + $0x1f4] ss:$8 sps:$4 sm:$0xff]  }
 0x152   : > { %1317 = vmatpush1.bf16.msra.mxu0 %v1820_v44 }
 0x153   : > { %1318 = vmatprep.subr.bf16.mxu0 %v1825_v45 }
 0x156   : > { %1319 = vmatpush1.bf16.msra.mxu0 %v1823_v46 }
 0x157   : > { %1320 = vmatprep.subr.bf16.mxu0 %v1828_v48 }
 0x159   : > { %v782_v54 = vpop.f32.mrb[4].mxu1 }
 0x15a   : > { %v2313_v55 = vadd.f32 %v782_v54, %v366_v50  ;;  %v784_v56 = vpop.f32.mrb[5].mxu1  ;;  %1321 = vmatpush1.bf16.msra.mxu0 %v1826_v51 }
 0x15b   : > { %v2318_v57 = vadd.f32 %v784_v56, %v370_v52  ;;  %v786_v58 = vpop.f32.mrb[6].mxu1  ;;  %1322 = vmatprep.subr.bf16.mxu0 %v1831_v53  ;;  %v931_v56 = vld [vmem:[%s2417_s4] sm:$0x3] }
 0x15c   : > { %v793_v59 = vmul.f32 %v2313_v55, %v2313_v55  ;;  %v2325_v60 = vadd.f32 %v786_v58, %v366_v50  ;;  %v788_v61 = vpop.f32.mrb[7].mxu1  ;;  %v1349_v58 = vunpack.c.l.bf16 %v1976_v13 }
 0x15d   : > { %v794_v62 = vmul.f32 %v2318_v57, %v2318_v57  ;;  %v2329_v63 = vadd.f32 %v788_v61, %v370_v52 }
 0x15e   : > { %v801_v0 = vmul.f32 %v793_v59, %v2313_v55  ;;  %v797_v1 = vmul.f32 %v2325_v60, %v2325_v60  ;;  %1323 = vmatpush1.bf16.msra.mxu0 %v1829_v40  ;;  %v936_v40 = vrot.slane %v931_v56, %v2247_v41 }
 0x15f   : > { %v802_v3 = vmul.f32 %v794_v62, %v2318_v57  ;;  %v798_v4 = vmul.f32 %v2329_v63, %v2329_v63  ;;  %1324 = vmatprep.subr.bf16.mxu0 %v1834_v42 }
 0x160   : > { %v809_v6 = vmul.f32 0.044715, %v801_v0  ;;  %v805_v7 = vmul.f32 %v797_v1, %v2325_v60  ;;  %v1352_v0 = vunpack.c.h.bf16 %v1978_v14 }
 0x161   : > { %v810_v8 = vmul.f32 0.044715, %v802_v3  ;;  %v806_v9 = vmul.f32 %v798_v4, %v2329_v63 }
 0x162   : > { %v817_v10 = vadd.f32 %v809_v6, %v2313_v55  ;;  %v813_v11 = vmul.f32 0.044715, %v805_v7  ;;  %1325 = vmatpush1.bf16.msra.mxu0 %v1832_v2 }
 0x163   : > { %v818_v15 = vadd.f32 %v810_v8, %v2318_v57  ;;  %v814_v16 = vmul.f32 0.044715, %v806_v9  ;;  %1326 = vmatprep.subr.bf16.mxu0 %v1837_v5 }
 0x164   : > { %v825_v18 = vmul.f32 0.7978846, %v817_v10  ;;  %v821_v19 = vadd.f32 %v813_v11, %v2325_v60 }
 0x165   : > { %v826_v20 = vmul.f32 0.7978846, %v818_v15  ;;  %v822_v21 = vadd.f32 %v814_v16, %v2329_v63 }
 0x166   : > { %1861 = vtanh.f32 %v825_v18  ;;  %v829_v22 = vmul.f32 0.7978846, %v821_v19  ;;  %1327 = vmatpush1.bf16.msra.mxu0 %v1835_v12 }
 0x167   : > { %1863 = vtanh.f32 %v826_v20  ;;  %v830_v24 = vmul.f32 0.7978846, %v822_v21  ;;  %1328 = vmatprep.subr.bf16.mxu0 %v1840_v17 }
 0x168   : > { %1865 = vtanh.f32 %v829_v22 }
 0x169   : > { %1867 = vtanh.f32 %v830_v24 }
 0x16a   : > { %1329 = vmatpush1.bf16.msra.mxu0 %v1838_v23 }
 0x16b   : > { %1330 = vmatprep.subr.bf16.mxu0 %v1843_v25 }
 0x16e   : > { %1331 = vmatpush1.bf16.msra.mxu0 %v1841_v26 }
 0x16f   : > { %1332 = vmatprep.subr.bf16.mxu0 %v1846_v27 }
 0x170   : > { %v1862_v30 = vpop.eup %1861 }
 0x171   : > { %v1864_v31 = vpop.eup %1863  ;;  %v841_v32 = vadd.f32 1.0, %v1862_v30  ;;  %v1390_v30 = vld [vmem:[%s2418_s5] sm:$0x3] }
 0x172   : > { %v1866_v33 = vpop.eup %1865  ;;  %1333 = vmatpush1.bf16.msra.mxu0 %v1844_v28  ;;  %v842_v35 = vadd.f32 1.0, %v1864_v31  ;;  %v1406_v31 = vld [vmem:[%s2419_s6] sm:$0x3] }
 0x173   : > { %v1868_v36 = vpop.eup %1867  ;;  %v849_v37 = vmul.f32 0.5, %v841_v32  ;;  %v845_v38 = vadd.f32 1.0, %v1866_v33  ;;  %1334 = vmatprep.subr.bf16.mxu0 %v1849_v29  ;;  %v1395_v32 = vrot.slane %v1390_v30, %v2247_v41  ;;  %v1399_v33 = vrot.slane %v1390_v30, %v2255_v43 }
 0x174   : > { %v846_v44 = vadd.f32 1.0, %v1868_v36  ;;  %v850_v45 = vmul.f32 0.5, %v842_v35  ;;  %v1411_v35 = vrot.slane %v1406_v31, %v2247_v41  ;;  %v1415_v36 = vrot.slane %v1406_v31, %v2255_v43 }
 0x175   : > { %v853_v46 = vmul.f32 0.5, %v845_v38  ;;  %v857_v49 = vmul.f32 %v849_v37, %v2313_v55  ;;  %v940_v55 = vrot.slane %v931_v56, %v2255_v43 }
 0x176   : > { %1335 = vmatpush1.bf16.msra.mxu0 %v1847_v34  ;;  %v854_v48 = vmul.f32 0.5, %v846_v44  ;;  %v858_v51 = vmul.f32 %v850_v45, %v2318_v57  ;;  %v1350_v57 = vunpack.c.h.bf16 %v1976_v13 }
 0x177   : > { %v861_v50 = vmul.f32 %v853_v46, %v2325_v60  ;;  %1336 = vmatprep.subr.bf16.mxu0 %v1852_v39 }
 0x178   : > { %v862_v52 = vmul.f32 %v854_v48, %v2329_v63  ;;  %v1351_v63 = vunpack.c.l.bf16 %v1978_v14 }
 0x179   : > { %v865_v53 = vpack.c.bf16 %v861_v50, %v857_v49 }
 0x17a   : > { %1337 = vmatpush1.bf16.msra.mxu0 %v1850_v47  ;;  %v866_v54 = vpack.c.bf16 %v862_v52, %v858_v51 }
 0x17c   : > { %1338 = vmatprep.mubr.bf16.mxu0 %v866_v54 }
 0x17d   : > { %1339 = vmatmul.mubr.bf16.vlgmr.msra.gmra.mrb[0].mxu0 %v865_v53 }
 0x250   : > { %v1340_v42 = vpop.f32.mrb[0].mxu0 }
 0x251   : > { %v1643_v59 = vadd.f32 %v1340_v42, %v936_v40  ;;  %v1342_v60 = vpop.f32.mrb[1].mxu0 }
 0x252   : > { %v1644_v61 = vadd.f32 %v1342_v60, %v940_v55  ;;  %v1344_v62 = vpop.f32.mrb[2].mxu0 }
 0x253   : > { %v1645_v1 = vadd.f32 %v1344_v62, %v936_v40  ;;  %v1346_v2 = vpop.f32.mrb[3].mxu0  ;;  %v1353_v3 = vadd.f32 %v1643_v59, %v1349_v58 }
 0x254   : > { %v1646_v4 = vadd.f32 %v1346_v2, %v940_v55  ;;  %v1354_v5 = vadd.f32 %v1644_v61, %v1350_v57 }
 0x255   : > { %v1355_v6 = vadd.f32 %v1645_v1, %v1351_v63 }
 0x256   : > { %v1356_v7 = vadd.f32 %v1646_v4, %v1352_v0  ;;  %v1357_v8 = vadd.f32 %v1354_v5, %v1353_v3 }
 0x258   : > { %1358 = vadd.xlane.f32.xlu0 %v1357_v8  ;;  %v1360_v9 = vadd.f32 %v1356_v7, %v1355_v6 }
 0x25c   : > { %1361 = vadd.xlane.f32.xlu0 %v1360_v9 }
 0x2e5   : > { %v1359_v13 = vpop.xlane.xlu0 %1358 }
 0x2e6   : > { %v1364_v10 = vmul.f32 0.00390625, %v1359_v13 }
 0x2e8   : > { %v1366_v11 = vsub.f32 %v1353_v3, %v1364_v10  ;;  %v1367_v12 = vsub.f32 %v1354_v5, %v1364_v10 }
 0x2e9   : > { %v1362_v15 = vpop.xlane.xlu0 %1361 }
 0x2ea   : > { %v1365_v16 = vmul.f32 0.00390625, %v1362_v15  ;;  %v1370_v17 = vmul.f32 %v1366_v11, %v1366_v11  ;;  %v1371_v18 = vmul.f32 %v1367_v12, %v1367_v12 }
 0x2ec   : > { %v1368_v14 = vsub.f32 %v1355_v6, %v1365_v16  ;;  %v1369_v19 = vsub.f32 %v1356_v7, %v1365_v16  ;;  %v1374_v20 = vadd.f32 %v1371_v18, %v1370_v17 }
 0x2ee   : > { %1375 = vadd.xlane.f32.xlu1 %v1374_v20  ;;  %v1372_v21 = vmul.f32 %v1368_v14, %v1368_v14  ;;  %v1373_v22 = vmul.f32 %v1369_v19, %v1369_v19 }
 0x2f0   : > { %v1377_v23 = vadd.f32 %v1373_v22, %v1372_v21 }
 0x2f2   : > { %1378 = vadd.xlane.f32.xlu1 %v1377_v23 }
 0x37b   : > { %v1376_v24 = vpop.xlane.xlu1 %1375 }
 0x37c   : > { %v1380_v25 = vmul.f32 0.00390625, %v1376_v24 }
 0x37e   : > { %v1382_v26 = vadd.f32 1e-12, %v1380_v25 }
 0x37f   : > { %v1379_v27 = vpop.xlane.xlu1 %1378 }
 0x380   : > { %1869 = vrsqrt.f32 %v1382_v26  ;;  %v1381_v28 = vmul.f32 0.00390625, %v1379_v27 }
 0x382   : > { %v1383_v29 = vadd.f32 1e-12, %v1381_v28 }
 0x384   : > { %1871 = vrsqrt.f32 %v1383_v29 }
 0x38a   : > { %v1870_v34 = vpop.eup %1869 }
 0x38b   : > { %v1386_v37 = vmul.f32 %v1870_v34, %v1366_v11  ;;  %v1387_v38 = vmul.f32 %v1870_v34, %v1367_v12 }
 0x38d   : > { %v1402_v39 = vmul.f32 %v1395_v32, %v1386_v37  ;;  %v1403_v44 = vmul.f32 %v1399_v33, %v1387_v38 }
 0x38e   : > { %v1872_v45 = vpop.eup %1871 }
 0x38f   : > { %v1418_v46 = vadd.f32 %v1411_v35, %v1402_v39  ;;  %v1419_v47 = vadd.f32 %v1415_v36, %v1403_v44  ;;  %v1388_v48 = vmul.f32 %v1872_v45, %v1368_v14  ;;  %v1389_v49 = vmul.f32 %v1872_v45, %v1369_v19 }
 0x391   : > { %v1641_v50 = vpack.c.bf16 %v1419_v47, %v1418_v46  ;;  %v1404_v51 = vmul.f32 %v1395_v32, %v1388_v48  ;;  %v1405_v52 = vmul.f32 %v1399_v33, %v1389_v49 }
 0x393   : > { %1434 = vst [vmem:[%s285_s12] sm:$0xff] %v1641_v50  ;;  %v1420_v41 = vadd.f32 %v1411_v35, %v1404_v51  ;;  %v1421_v43 = vadd.f32 %v1415_v36, %v1405_v52 }
 0x395   : > { %v1642_v53 = vpack.c.bf16 %v1421_v43, %v1420_v41 }
 0x397   : > { %1435 = vst [vmem:[%s285_s12 + $0x8] sm:$0xff] %v1642_v53 }
 0x398 PF: > { %s17_s24 = sadd.s32 1, %s1879_s24  }
 0x399   : > { %p14_p4 = scmp.ge.s32.totalorder %s17_s24, 4  }
 0x39b   :  { %16 = sbr.rel (!%p14_p4) target bundleno = 1 (0x1), region = 78 }

// kernel: _lambda_.21
= control target key start
LH: loop header
LB: loop body
LE: loop exit
PB: predicated region body
PF: predicated region fallthrough
CT: control target
= control target key end

     0   :  { %s1074_s15 = smov 0   ;;  %s1076_s16 = smov 0   ;;  %s1287_s0 = inlined_call_operand.vmem [shape: bf16[32,256], index: 0, kind: input, shape index: {}]   ;;  %s1288_s1 = inlined_call_operand.vmem [shape: bf16[256,512], index: 1, kind: input, shape index: {}]   ;;  %s1289_s2 = inlined_call_operand.vmem [shape: f32[1,512], index: 2, kind: input, shape index: {}]   ;;  %s1290_s3 = inlined_call_operand.vmem [shape: s32[32,1], index: 3, kind: input, shape index: {}]   ;;  %s1291_s4 = inlined_call_operand.vmem [shape: f32[32,1], index: 4, kind: output, shape index: {}]  }
   0x1   :  { %s1078_s17 = smov 0   ;;  %s1080_s18 = smov 0  }
   0x2   :  { %s1082_s19 = smov 0   ;;  %s1084_s20 = smov 0  }
   0x3   :  { %s1086_s21 = smov 0  }
   0x4 LB: > { %s23_s22 = sadd.s32 1, %s1036_s19  ;;  %s26_s23 = sadd.s32 1, %s1040_s20  ;;  %s1044_s21 = sphi %s1086_s21, %s14_s21   ;;  %s1040_s20 = sphi %s1084_s20, %s1297_s20   ;;  %s1036_s19 = sphi %s1082_s19, %s1296_s19   ;;  %s1032_s18 = sphi %s1080_s18, %s1295_s18   ;;  %s1028_s17 = sphi %s1078_s17, %s1294_s17   ;;  %s1024_s16 = sphi %s1076_s16, %s1293_s16   ;;  %s1020_s15 = sphi %s1074_s15, %s1292_s15  }
   0x5   : > { %p24_p0 = scmp.ge.s32.totalorder %s23_s22, 4  ;;  %s59_s24 = sadd.s32 1, %s1024_s16 }
   0x6   : > { %p66_p1 = scmp.ne.s32.totalorder %s1024_s16, %s1020_s15  ;;  %p67_p2 = scmp.eq.s32.totalorder %s1044_s21, 0 }
   0x7   : > { %s1299_s22 = smov (%p24_p0, %s23_s22), 0  ;;  %s1301_s23 = smov (!%p24_p0, %s26_s23), %s1040_s20 }
   0x8   : > { %s56_s25 = ssub.s32 %s1036_s19, %s1299_s22  ;;  %p68_p3 = por %p67_p2, %p66_p1 }
   0x9   : > { %p28_p4 = scmp.ge.s32.totalorder %s1301_s23, 2  ;;  %p57_p5 = scmp.eq.s32.totalorder %s56_s25, 0 }
   0xa   : > { %p839_p6 = scmp.ge.s32.totalorder %s1044_s21, 8 }
   0xb   : > { %s1303_s23 = smov (%p28_p4, %s1301_s23), 0 }
   0xc   : > { %s1123_s26 = scalar_select %p57_p5, %s1024_s16, %s59_s24  }
   0xd   : > { %170 = sbr.rel (%p839_p6) target bundleno = 45 (0x2d), region = 16 }
  0x14   : > { %183 = sbr.rel (!%p68_p3) target bundleno = 45 (0x2d), region = 24  ;;  %s185_s27 = sand.u32 (%p68_p3), 1, %s1024_s16  }
  0x15   : > { %s841_s28 = sshll.u32 (%p68_p3), %s1036_s19, 2  ;;  %s840_s29 = sshll.u32 (%p68_p3), %s185_s27, 7 }
  0x16   : > { %s1131_s6 = scalar_lea.vmem (%p68_p3), %s1288_s1, %s841_s28  ;;  %s1135_s7 = scalar_lea.vmem (%p68_p3), [#allocation5], %s840_s29 }
  0x17   : > { %v205_v0 = vld [vmem:[%s1131_s6] sm:$0xf] (%p68_p3)  ;;  %v207_v1 = vld [vmem:[%s1131_s6 + $0x10] sm:$0xf] (%p68_p3) }
  0x18   : > { %206 = vst [vmem:[%s1135_s7] sm:$0xf] (%p68_p3), %v205_v0  ;;  %208 = vst [vmem:[%s1135_s7 + $0x4] sm:$0xf] (%p68_p3), %v207_v1  ;;  %v209_v2 = vld [vmem:[%s1131_s6 + $0x20] sm:$0xf] (%p68_p3) }
  0x19   : > { %v211_v3 = vld [vmem:[%s1131_s6 + $0x30] sm:$0xf] (%p68_p3)  ;;  %v213_v4 = vld [vmem:[%s1131_s6 + $0x40] sm:$0xf] (%p68_p3)  ;;  %210 = vst [vmem:[%s1135_s7 + $0x8] sm:$0xf] (%p68_p3), %v209_v2 }
  0x1a   : > { %212 = vst [vmem:[%s1135_s7 + $0xc] sm:$0xf] (%p68_p3), %v211_v3  ;;  %214 = vst [vmem:[%s1135_s7 + $0x10] sm:$0xf] (%p68_p3), %v213_v4  ;;  %v215_v5 = vld [vmem:[%s1131_s6 + $0x50] sm:$0xf] (%p68_p3) }
  0x1b   : > { %v217_v6 = vld [vmem:[%s1131_s6 + $0x60] sm:$0xf]  ;;  %v219_v7 = vld [vmem:[%s1131_s6 + $0x70] sm:$0xf]  ;;  %216 = vst [vmem:[%s1135_s7 + $0x14] sm:$0xf] %v215_v5 }
  0x1c   : > { %218 = vst [vmem:[%s1135_s7 + $0x18] sm:$0xf] %v217_v6  ;;  %220 = vst [vmem:[%s1135_s7 + $0x1c] sm:$0xf] %v219_v7  ;;  %v221_v8 = vld [vmem:[%s1131_s6 + $0x80] sm:$0xf] }
  0x1d   : > { %v223_v9 = vld [vmem:[%s1131_s6 + $0x90] sm:$0xf]  ;;  %v225_v10 = vld [vmem:[%s1131_s6 + $0xa0] sm:$0xf]  ;;  %222 = vst [vmem:[%s1135_s7 + $0x20] sm:$0xf] %v221_v8 }
  0x1e   : > { %224 = vst [vmem:[%s1135_s7 + $0x24] sm:$0xf] %v223_v9  ;;  %226 = vst [vmem:[%s1135_s7 + $0x28] sm:$0xf] %v225_v10  ;;  %v227_v11 = vld [vmem:[%s1131_s6 + $0xb0] sm:$0xf] }
  0x1f   : > { %v229_v12 = vld [vmem:[%s1131_s6 + $0xc0] sm:$0xf]  ;;  %v231_v13 = vld [vmem:[%s1131_s6 + $0xd0] sm:$0xf]  ;;  %228 = vst [vmem:[%s1135_s7 + $0x2c] sm:$0xf] %v227_v11 }
  0x20   : > { %230 = vst [vmem:[%s1135_s7 + $0x30] sm:$0xf] %v229_v12  ;;  %232 = vst [vmem:[%s1135_s7 + $0x34] sm:$0xf] %v231_v13  ;;  %v233_v14 = vld [vmem:[%s1131_s6 + $0xe0] sm:$0xf] }
  0x21   : > { %v235_v15 = vld [vmem:[%s1131_s6 + $0xf0] sm:$0xf]  ;;  %v237_v16 = vld [vmem:[%s1131_s6 + $0x100] sm:$0xf]  ;;  %234 = vst [vmem:[%s1135_s7 + $0x38] sm:$0xf] %v233_v14 }
  0x22   : > { %236 = vst [vmem:[%s1135_s7 + $0x3c] sm:$0xf] %v235_v15  ;;  %238 = vst [vmem:[%s1135_s7 + $0x40] sm:$0xf] %v237_v16  ;;  %v239_v17 = vld [vmem:[%s1131_s6 + $0x110] sm:$0xf] }
  0x23   : > { %v241_v18 = vld [vmem:[%s1131_s6 + $0x120] sm:$0xf]  ;;  %v243_v19 = vld [vmem:[%s1131_s6 + $0x130] sm:$0xf]  ;;  %240 = vst [vmem:[%s1135_s7 + $0x44] sm:$0xf] %v239_v17 }
  0x24   : > { %242 = vst [vmem:[%s1135_s7 + $0x48] sm:$0xf] %v241_v18  ;;  %244 = vst [vmem:[%s1135_s7 + $0x4c] sm:$0xf] %v243_v19  ;;  %v245_v20 = vld [vmem:[%s1131_s6 + $0x140] sm:$0xf] }
  0x25   : > { %v247_v21 = vld [vmem:[%s1131_s6 + $0x150] sm:$0xf]  ;;  %v249_v22 = vld [vmem:[%s1131_s6 + $0x160] sm:$0xf]  ;;  %246 = vst [vmem:[%s1135_s7 + $0x50] sm:$0xf] %v245_v20 }
  0x26   : > { %248 = vst [vmem:[%s1135_s7 + $0x54] sm:$0xf] %v247_v21  ;;  %250 = vst [vmem:[%s1135_s7 + $0x58] sm:$0xf] %v249_v22  ;;  %v251_v23 = vld [vmem:[%s1131_s6 + $0x170] sm:$0xf] }
  0x27   : > { %v253_v24 = vld [vmem:[%s1131_s6 + $0x180] sm:$0xf]  ;;  %v255_v25 = vld [vmem:[%s1131_s6 + $0x190] sm:$0xf]  ;;  %252 = vst [vmem:[%s1135_s7 + $0x5c] sm:$0xf] %v251_v23 }
  0x28   : > { %254 = vst [vmem:[%s1135_s7 + $0x60] sm:$0xf] %v253_v24  ;;  %256 = vst [vmem:[%s1135_s7 + $0x64] sm:$0xf] %v255_v25  ;;  %v257_v26 = vld [vmem:[%s1131_s6 + $0x1a0] sm:$0xf] }
  0x29   : > { %v259_v27 = vld [vmem:[%s1131_s6 + $0x1b0] sm:$0xf]  ;;  %v261_v28 = vld [vmem:[%s1131_s6 + $0x1c0] sm:$0xf]  ;;  %258 = vst [vmem:[%s1135_s7 + $0x68] sm:$0xf] %v257_v26 }
  0x2a   : > { %260 = vst [vmem:[%s1135_s7 + $0x6c] sm:$0xf] %v259_v27  ;;  %262 = vst [vmem:[%s1135_s7 + $0x70] sm:$0xf] %v261_v28  ;;  %v263_v29 = vld [vmem:[%s1131_s6 + $0x1d0] sm:$0xf] }
  0x2b   : > { %v265_v30 = vld [vmem:[%s1131_s6 + $0x1e0] sm:$0xf]  ;;  %v267_v31 = vld [vmem:[%s1131_s6 + $0x1f0] sm:$0xf]  ;;  %264 = vst [vmem:[%s1135_s7 + $0x74] sm:$0xf] %v263_v29 }
  0x2c   : > { %266 = vst [vmem:[%s1135_s7 + $0x78] sm:$0xf] %v265_v30  ;;  %268 = vst [vmem:[%s1135_s7 + $0x7c] sm:$0xf] %v267_v31 }
  0x2d PF: > { %p842_p7 = scmp.ge.s32.totalorder %s1044_s21, 1  ;;  %p369_p8 = scmp.lt.s32.totalorder %s1044_s21, 9 }
  0x2f   : > { %p370_p9 = pnand %p842_p7, %p369_p8 }
  0x30   : > { %s376_s8 = sand.u32 (!%p370_p9), 1, %s1020_s15   ;;  %s844_s9 = sshll.u32 (!%p370_p9), %s1032_s18, 1 }
  0x31   : > { %373 = sbr.rel (%p370_p9) target bundleno = 774 (0x306), region = 73  ;;  %s843_s10 = sshll.u32 (!%p370_p9), %s376_s8, 7 }
  0x32   : > { %p416_p10 = scmp.lt.s32.totalorder (!%p370_p9), %s844_s9, 3  ;;  %p422_p11 = scmp.lt.s32.totalorder (!%p370_p9), %s1028_s17, 3 }
  0x33   : > { %s1226_s7 = scalar_lea.vmem (!%p370_p9), [#allocation5], %s843_s10  ;;  %p851_p12 = scmp.ne.s32.totalorder (!%p370_p9), %s1028_s17, 0 }
  0x38   : > { %s1305_s9 = smov (!%p416_p10, %s844_s9), 3  ;;  %441 = sbr.rel (%p851_p12) target bundleno = 63 (0x3f), region = 81 }
  0x39   : > { %s1205_s11 = scalar_select %p422_p11, %s1028_s17, 3 }
  0x3a   : > { %s875_s12 = sshll.u32 %s1305_s9, 3  ;;  %vm442_vm0 = vcmask (!%p851_p12), 7168   ;;  %v1046_v32 = vmov (!%p851_p12), -inf   ;;  %v1047_v33 = vmov (!%p851_p12), 0.0  }
  0x3b   : > { %s1210_s24 = scalar_lea.vmem %s1287_s0, %s875_s12  ;;  %s424_s28 = scalar_lea.vmem %s1289_s2, %s1205_s11  ;;  %443 = vst.msk [vmem:[#allocation2] sm:$0xff] (!%p851_p12), %vm442_vm0, %v1046_v32  ;;  %444 = vst.msk [vmem:[#allocation2 + $0x8] sm:$0xff] (!%p851_p12), %vm442_vm0, %v1046_v32 }
  0x3c   : > { %s1219_s18 = scalar_lea.vmem %s1290_s3, %s875_s12  ;;  %s1224_s6 = scalar_lea.vmem %s1291_s4, %s875_s12  ;;  %445 = vst.msk [vmem:[#allocation3] sm:$0xff] (!%p851_p12), %vm442_vm0, %v1047_v33  ;;  %446 = vst.msk [vmem:[#allocation3 + $0x8] sm:$0xff] (!%p851_p12), %vm442_vm0, %v1047_v33 }
  0x3d   : > { %447 = vst.msk [vmem:[#allocation4] sm:$0xff] (!%p851_p12), %vm442_vm0, %v1047_v33  ;;  %448 = vst.msk [vmem:[#allocation4 + $0x8] sm:$0xff] (!%p851_p12), %vm442_vm0, %v1047_v33 }
  0x3f PF: > { %v959_v34 = vld [vmem:[%s1226_s7 + $0x40] sm:$0xff]   ;;  %v961_v36 = vld [vmem:[%s1226_s7 + $0x48] sm:$0xff]   ;;  %v963_v38 = vld [vmem:[%s1226_s7 + $0x50] sm:$0xff]   ;;  %v1048_v52 = vmov 0   ;;  %vm662_vm1 = vcmask 7168   ;;  %v639_v8 = vlaneseq  ;;  %s871_s10 = sshll.u32 %s1028_s17, 7 }
  0x40   : > { %v960_v35 = vld [vmem:[%s1226_s7] sm:$0xff]   ;;  %876 = vmatprep.subr.bf16.mxu0 %v959_v34  ;;  %v962_v37 = vld [vmem:[%s1226_s7 + $0x8] sm:$0xff]   ;;  %v964_v39 = vld [vmem:[%s1226_s7 + $0x10] sm:$0xff]   ;;  %958 = vset.pattern.permute.xlu0 %v1048_v52  ;;  %v642_v10 = vstv %s871_s10  ;;  %p872_p13 = scmp.ne.s32.totalorder %s1028_s17, 3 }
  0x41   : > { %877 = vmatpush3.bf16.msra.mxu0 %v960_v35  ;;  %v965_v40 = vld [vmem:[%s1226_s7 + $0x58] sm:$0xff]   ;;  %v967_v42 = vld [vmem:[%s1226_s7 + $0x60] sm:$0xff]   ;;  %v969_v44 = vld [vmem:[%s1226_s7 + $0x68] sm:$0xff]   ;;  %957 = vset.pattern.permute.xlu1 %v1048_v52  ;;  %v640_v9 = vand.u32 127, %v639_v8 }
  0x42   : > { %878 = vmatprep.subr.bf16.mxu0 %v961_v36  ;;  %v966_v41 = vld [vmem:[%s1226_s7 + $0x18] sm:$0xff]   ;;  %v968_v43 = vld [vmem:[%s1226_s7 + $0x20] sm:$0xff]   ;;  %v970_v46 = vld [vmem:[%s1226_s7 + $0x28] sm:$0xff]  }
  0x43   : > { %v977_v45 = vld [vmem:[%s1210_s24 + $0x4] ss:$8 sps:$4 sm:$0xff]   ;;  %v975_v51 = vld [vmem:[%s1210_s24] ss:$8 sps:$4 sm:$0xff]   ;;  %v643_v11 = vadd.s32 %v642_v10, %v640_v9  ;;  %v673_v33 = vld [vmem:[#allocation3] sm:$0xff] }
  0x44   : > { %628 = vmatprep.mubr.bf16.mxu0 %v977_v45  ;;  %v971_v47 = vld [vmem:[%s1226_s7 + $0x70] sm:$0xff]   ;;  %v973_v49 = vld [vmem:[%s1226_s7 + $0x78] sm:$0xff]  }
  0x45   : > { %879 = vmatpush3.bf16.msra.mxu0 %v962_v37  ;;  %v972_v48 = vld [vmem:[%s1226_s7 + $0x30] sm:$0xff]   ;;  %v974_v50 = vld [vmem:[%s1226_s7 + $0x38] sm:$0xff]   ;;  %v674_v37 = vld [vmem:[#allocation3 + $0x8] sm:$0xff] }
  0x46   : > { %880 = vmatprep.subr.bf16.mxu0 %v963_v38  ;;  %v852_v54 = vld [vmem:[%s424_s28] ss:$0 sm:$0xff]  ;;  %v666_v2 = vld [vmem:[#allocation2 + $0x8] sm:$0xff] }
  0x47   : > { %v637_v62 = vld [vmem:[%s1219_s18] sm:$0xff]  ;;  %v638_v7 = vld [vmem:[%s1219_s18 + $0x8] sm:$0xff] }
  0x48   : > { %v665_v63 = vld [vmem:[#allocation2] sm:$0xff]  ;;  %v645_v29 = vld [vmem:[#allocation4 + $0x8] sm:$0xff] }
  0x49   : > { %881 = vmatpush3.bf16.msra.mxu0 %v964_v39  ;;  %v644_v24 = vld [vmem:[#allocation4] sm:$0xff] }
  0x4a   : > { %882 = vmatprep.subr.bf16.mxu0 %v965_v40 }
  0x4d   : > { %883 = vmatpush3.bf16.msra.mxu0 %v966_v41 }
  0x4e   : > { %884 = vmatprep.subr.bf16.mxu0 %v967_v42 }
  0x51   : > { %885 = vmatpush3.bf16.msra.mxu0 %v968_v43 }
  0x52   : > { %886 = vmatprep.subr.bf16.mxu0 %v969_v44 }
  0x55   : > { %887 = vmatpush3.bf16.msra.mxu0 %v970_v46 }
  0x56   : > { %888 = vmatprep.subr.bf16.mxu0 %v971_v47 }
  0x59   : > { %889 = vmatpush3.bf16.msra.mxu0 %v972_v48 }
  0x5a   : > { %890 = vmatprep.subr.bf16.mxu0 %v973_v49 }
  0x5d   : > { %891 = vmatpush3.bf16.msra.mxu0 %v974_v50 }
  0x60   : > { %629 = vmatmul.mubr.bf16.vlgmr.msra.gmra.mrb[0].mxu0 %v975_v51 }
 0x133   : > { %v892_v53 = vpop.f32.mrb[0].mxu0 }
 0x134   : > { %v893_v55 = vpop.f32.mrb[1].mxu0 }
 0x135   : > { %v894_v56 = vadd.f32 %v893_v55, %v892_v53  ;;  %v895_v57 = vpop.f32.mrb[2].mxu0 }
 0x136   : > { %v896_v58 = vpop.f32.mrb[3].mxu0 }
 0x137   : > { %v631_v59 = vadd.f32 %v894_v56, %v852_v54  ;;  %v897_v60 = vadd.f32 %v896_v58, %v895_v57 }
 0x139   : > { %667 = vmax.xlane.f32.xlu0 %v631_v59  ;;  %v634_v61 = vadd.f32 %v897_v60, %v852_v54 }
 0x13d   : > { %669 = vmax.xlane.f32.xlu0 %v634_v61 }
 0x153   : > { %647 = vperm.xlu0 %958, %v637_v62  }
 0x1c6   : > { %v668_v0 = vpop.xlane.xlu0 %667 }
 0x1c7   : > { %v671_v1 = vmax.f32 %v665_v63, %v668_v0 }
 0x1c9   : > { %v675_v3 = vsub.f32 %v665_v63, %v671_v1  ;;  %707 = vst.msk [vmem:[#allocation2] sm:$0xff] %vm662_vm1, %v671_v1  ;;  %685 = vperm.xlu1 %957, %v671_v1  }
 0x1ca   : > { %v670_v4 = vpop.xlane.xlu0 %669 }
 0x1cb   : > { %v672_v5 = vmax.f32 %v666_v2, %v670_v4  ;;  %v677_v27 = vmul.f32 1.442695, %v675_v3 }
 0x1cd   : > { %v676_v6 = vsub.f32 %v666_v2, %v672_v5  ;;  %708 = vst.msk [vmem:[#allocation2 + $0x8] sm:$0xff] %vm662_vm1, %v672_v5  ;;  %690 = vperm.xlu1 %957, %v672_v5  }
 0x1cf   : > { %v679_v28 = vmul.f32 1.442695, %v676_v6 }
 0x1d0   : > { %v713_v45 = vld [vmem:[#allocation2] sm:$0xff] (!%p872_p13) }
 0x1d1   : > { %650 = vperm.xlu1 %957, %v638_v7  }
 0x1d2   : > { %v648_v12 = vpop.permute.xlu0 %647 }
 0x1d3   : > { %vm652_vm2 = vcmp.eq.s32.totalorder %v643_v11, %v648_v12 }
 0x1d4   : > { %v654_v13 = vsel %vm652_vm2, %v631_v59, 0.0  ;;  %v714_v48 = vld [vmem:[#allocation2 + $0x8] sm:$0xff] (!%p872_p13) }
 0x1f5   : > { %656 = vadd.xlane.f32.xlu1 %v654_v13 }
 0x248   : > { %v686_v14 = vpop.permute.xlu1 %685 }
 0x249   : > { %v693_v15 = vsub.f32 %v631_v59, %v686_v14 }
 0x24b   : > { %v695_v16 = vmul.f32 1.442695, %v693_v15 }
 0x24c   : > { %v691_v17 = vpop.permute.xlu1 %690 }
 0x24d   : > { %978 = vpow2.f32 %v695_v16  ;;  %v694_v18 = vsub.f32 %v634_v61, %v691_v17 }
 0x24f   : > { %v697_v19 = vmul.f32 1.442695, %v694_v18 }
 0x250   : > { %v651_v20 = vpop.permute.xlu1 %650 }
 0x251   : > { %980 = vpow2.f32 %v697_v19  ;;  %vm653_vm3 = vcmp.eq.s32.totalorder %v643_v11, %v651_v20 }
 0x252   : > { %v655_v21 = vsel %vm653_vm3, %v634_v61, 0.0  ;;  %982 = vpow2.f32 %v677_v27 }
 0x253   : > { %658 = vadd.xlane.f32.xlu1 %v655_v21  ;;  %984 = vpow2.f32 %v679_v28 }
 0x257   : > { %v979_v22 = vpop.eup %978 }
 0x258   : > { %699 = vadd.xlane.f32.xlu0 %v979_v22 }
 0x25b   : > { %v981_v23 = vpop.eup %980 }
 0x25c   : > { %701 = vadd.xlane.f32.xlu1 %v981_v23  ;;  %v983_v31 = vpop.eup %982 }
 0x25d   : > { %v681_v34 = vmul.f32 %v983_v31, %v673_v33  ;;  %v985_v35 = vpop.eup %984 }
 0x25e   : > { %v682_v39 = vmul.f32 %v985_v35, %v674_v37 }
 0x282   : > { %v657_v25 = vpop.xlane.xlu1 %656 }
 0x283   : > { %v660_v26 = vadd.f32 %v657_v25, %v644_v24 }
 0x285   : > { %663 = vst.msk [vmem:[#allocation4] sm:$0xff] %vm662_vm1, %v660_v26 }
 0x28c   : > { %v723_v49 = vld [vmem:[#allocation4] sm:$0xff] (!%p872_p13) }
 0x2e0   : > { %v659_v30 = vpop.xlane.xlu1 %658 }
 0x2e1   : > { %v661_v32 = vadd.f32 %v659_v30, %v645_v29 }
 0x2e3   : > { %664 = vst.msk [vmem:[#allocation4 + $0x8] sm:$0xff] %vm662_vm1, %v661_v32 }
 0x2e5   : > { %v700_v36 = vpop.xlane.xlu0 %699 }
 0x2e6   : > { %v703_v38 = vadd.f32 %v700_v36, %v681_v34  ;;  %712 = sbr.rel (%p872_p13) target bundleno = 774 (0x306), region = 85 }
 0x2e8   : > { %705 = vst.msk [vmem:[#allocation3] sm:$0xff] %vm662_vm1, %v703_v38 }
 0x2e9   : > { %v702_v40 = vpop.xlane.xlu1 %701 }
 0x2ea   : > { %v704_v41 = vadd.f32 %v702_v40, %v682_v39  ;;  %v724_v52 = vld [vmem:[#allocation4 + $0x8] sm:$0xff] (!%p872_p13) }
 0x2ec   : > { %706 = vst.msk [vmem:[#allocation3 + $0x8] sm:$0xff] %vm662_vm1, %v704_v41 }
 0x2ef   : > { %v715_v42 = vld [vmem:[#allocation3] sm:$0xff] }
 0x2f0   : > { %986 = vlog2.f32 %v715_v42 }
 0x2f3   : > { %v716_v43 = vld [vmem:[#allocation3 + $0x8] sm:$0xff] }
 0x2f4   : > { %988 = vlog2.f32 %v716_v43 }
 0x2fa   : > { %v987_v44 = vpop.eup %986 }
 0x2fb   : > { %v718_v47 = vmul.f32 0.6931472, %v987_v44 }
 0x2fd   : > { %v721_v51 = vadd.f32 %v718_v47, %v713_v45 }
 0x2fe   : > { %v989_v46 = vpop.eup %988 }
 0x2ff   : > { %v720_v50 = vmul.f32 0.6931472, %v989_v46  ;;  %v725_v54 = vsub.f32 %v721_v51, %v723_v49 }
 0x301   : > { %v722_v53 = vadd.f32 %v720_v50, %v714_v48  ;;  %727 = vst.msk [vmem:[%s1224_s6] sm:$0xff] %vm662_vm1, %v725_v54 }
 0x303   : > { %v726_v55 = vsub.f32 %v722_v53, %v724_v52 }
 0x305   : > { %728 = vst.msk [vmem:[%s1224_s6 + $0x8] sm:$0xff] %vm662_vm1, %v726_v55 }
 0x306 PF: > { %s14_s21 = sadd.s32 1, %s1044_s21   ;;  %s1292_s15 = smov %s1024_s16 }
 0x307   : > { %p11_p0 = scmp.ge.s32.totalorder %s14_s21, 10   ;;  %s1293_s16 = smov %s1123_s26 }
 0x308   : > { %s1294_s17 = smov %s1036_s19  ;;  %s1295_s18 = smov %s1040_s20 }
 0x309   : > { %s1296_s19 = smov %s1299_s22  ;;  %s1297_s20 = smov %s1303_s23 }
 0x30a   :  { %13 = sbr.rel (!%p11_p0) target bundleno = 4 (0x4), region = 129 }

</bundles_post_ra>
